<compile_context>
chip_gen: v5e
topology: v5e:2x2
jax: 0.10.0
libtpu: 0.0.40
codegen_flags: <defaults>
</compile_context>

<pallas_src>
import functools

import jax
import jax.numpy as jnp
import numpy as np
from jax.experimental import pallas as pl
from jax.experimental.pallas import tpu as pltpu

NEG_SLOPE = 0.01   # torch.nn.LeakyReLU default
BN_EPS = 1e-5      # torch.nn.BatchNorm2d default
PAD = 2
K = 3


def _fused_trans_conv_kernel(w1_ref, s1_ref, t1_ref, w2_ref, s2_ref, t2_ref,
                             x_ref, o_ref, xpad_ref, midpad_ref,
                             *, H, W, Cin, C1, C2):
    """One batch element: (conv3x3 + BN-affine + LeakyReLU) x 2, fused.

    w*_ref:     flat conv weights (SMEM), layout ((kh*K+kw)*Cin + ci)*Cout + co
    s*_ref:     folded BN scale  gamma/sqrt(var+eps)                  (SMEM)
    t*_ref:     folded BN shift  beta - mean*scale + scale*conv_bias  (SMEM)
    x_ref:      (1, Cin, H, W)       input tile   (VMEM)
    o_ref:      (1, C2, H+4, W+4)    output tile  (VMEM)
    xpad_ref:   (Cin, H+4, W+4)      scratch: zero-padded input
    midpad_ref: (C1, H+6, W+6)       scratch: zero-padded layer-1 output
    """
    H1, W1 = H + 2, W + 2          # layer-1 output size
    H2, W2 = H + 4, W + 4          # layer-2 output size

    # ---- in-kernel zero padding (pad = 2 on each spatial side) ----
    xpad_ref[...] = jnp.zeros_like(xpad_ref)
    xpad_ref[:, PAD:PAD + H, PAD:PAD + W] = x_ref[0]
    midpad_ref[...] = jnp.zeros_like(midpad_ref)

    # ---- layer 1: conv3x3 as VPU scalar-weight FMAs + BN affine + LeakyReLU ----
    for co in range(C1):
        acc = jnp.zeros((H1, W1), jnp.float32)
        for ci in range(Cin):
            for kh in range(K):
                for kw in range(K):
                    w = w1_ref[((kh * K + kw) * Cin + ci) * C1 + co]
                    acc = acc + w * xpad_ref[ci, kh:kh + H1, kw:kw + W1]
        y = acc * s1_ref[co] + t1_ref[co]
        y = jnp.where(y > 0, y, NEG_SLOPE * y)              # LeakyReLU
        midpad_ref[co, PAD:PAD + H1, PAD:PAD + W1] = y       # stays in VMEM

    # ---- layer 2 ----
    for co in range(C2):
        acc = jnp.zeros((H2, W2), jnp.float32)
        for ci in range(C1):
            for kh in range(K):
                for kw in range(K):
                    w = w2_ref[((kh * K + kw) * C1 + ci) * C2 + co]
                    acc = acc + w * midpad_ref[ci, kh:kh + H2, kw:kw + W2]
        y = acc * s2_ref[co] + t2_ref[co]
        y = jnp.where(y > 0, y, NEG_SLOPE * y)
        o_ref[0, co, :, :] = y.astype(o_ref.dtype)


def trans_conv(x_nchw, params):
    """Full Trans_Conv forward.  Input NCHW, output NCHW (N, C/4, H+4, W+4)."""
    (w1, b1, s1, t1), (w2, b2, s2, t2) = params
    N, Cin, H, W = x_nchw.shape
    C1, C2 = w1.shape[-1], w2.shape[-1]
    H2, W2 = H + 4, W + 4

    # Fold conv bias into BN shift:  (conv + b)*s + t == conv*s + (t + s*b)
    t1f = (t1 + s1 * b1).astype(jnp.float32)
    t2f = (t2 + s2 * b2).astype(jnp.float32)
    w1f = w1.reshape(-1).astype(jnp.float32)     # (K*K*Cin*C1,)
    w2f = w2.reshape(-1).astype(jnp.float32)     # (K*K*C1*C2,)

    kernel = functools.partial(_fused_trans_conv_kernel,
                               H=H, W=W, Cin=Cin, C1=C1, C2=C2)
    smem_specs = [pl.BlockSpec(memory_space=pltpu.MemorySpace.SMEM)
                  for _ in range(6)]

    return pl.pallas_call(
        kernel,
        out_shape=jax.ShapeDtypeStruct((N, C2, H2, W2), x_nchw.dtype),
        grid=(N,),
        in_specs=smem_specs + [
            pl.BlockSpec((1, Cin, H, W), lambda n: (n, 0, 0, 0)),
        ],
        out_specs=pl.BlockSpec((1, C2, H2, W2), lambda n: (n, 0, 0, 0)),
        scratch_shapes=[
            pltpu.VMEM((Cin, H + 2 * PAD, W + 2 * PAD), jnp.float32),
            pltpu.VMEM((C1, H + 2 + 2 * PAD, W + 2 + 2 * PAD), jnp.float32),
        ],
        compiler_params=pltpu.CompilerParams(
            dimension_semantics=("parallel",)),
    )(w1f, s1.astype(jnp.float32), t1f, w2f, s2.astype(jnp.float32), t2f,
      x_nchw)


def make_params(key, in_channel):
    """Deterministic synthetic parameters with the shapes Trans_Conv implies."""
    c1 = in_channel // 2
    c2 = in_channel // 4
    ks = jax.random.split(key, 12)

    def bn(kg, kb, km, kv, c):
        gamma = 1.0 + 0.1 * jax.random.normal(kg, (c,), jnp.float32)
        beta = 0.1 * jax.random.normal(kb, (c,), jnp.float32)
        mean = 0.1 * jax.random.normal(km, (c,), jnp.float32)
        var = jax.random.uniform(kv, (c,), jnp.float32, 0.5, 1.5)
        scale = gamma / jnp.sqrt(var + BN_EPS)
        shift = beta - mean * scale
        return scale, shift

    w1 = 0.1 * jax.random.normal(ks[0], (K, K, in_channel, c1), jnp.float32)
    b1 = 0.1 * jax.random.normal(ks[1], (c1,), jnp.float32)
    s1, t1 = bn(ks[2], ks[3], ks[4], ks[5], c1)
    w2 = 0.1 * jax.random.normal(ks[6], (K, K, c1, c2), jnp.float32)
    b2 = 0.1 * jax.random.normal(ks[7], (c2,), jnp.float32)
    s2, t2 = bn(ks[8], ks[9], ks[10], ks[11], c2)
    return (w1, b1, s1, t1), (w2, b2, s2, t2)


def _reference(x_nchw, params):
    """Pure-JAX reference (lax conv) for a correctness check."""
    (w1, b1, s1, t1), (w2, b2, s2, t2) = params

    def layer(x, w, b, s, t):
        w_oihw = jnp.transpose(w, (3, 2, 0, 1))          # (kh,kw,Cin,Cout)->OIHW
        y = jax.lax.conv_general_dilated(
            x, w_oihw, window_strides=(1, 1),
            padding=((PAD, PAD), (PAD, PAD)),
            dimension_numbers=("NCHW", "OIHW", "NCHW"))
        y = y + b[None, :, None, None]
        y = y * s[None, :, None, None] + t[None, :, None, None]
        return jnp.where(y > 0, y, NEG_SLOPE * y)

    y = layer(x_nchw, w1, b1, s1, t1)
    return layer(y, w2, b2, s2, t2)


if __name__ == "__main__":
    key = jax.random.PRNGKey(0)
    k_x, k_p = jax.random.split(key)

    N, C, H, W = 2, 4, 16, 16                            # in_channel = 4
    x = jax.random.normal(k_x, (N, C, H, W), jnp.float32)
    params = make_params(k_p, C)

    out = jax.block_until_ready(trans_conv(x, params))
    assert out.shape == (N, C // 4, H + 4, W + 4), out.shape

    ref = jax.block_until_ready(_reference(x, params))
    np.testing.assert_allclose(np.asarray(out), np.asarray(ref),
                               atol=1e-4, rtol=1e-4)
    print("KERNEL_OK")
</pallas_src>

<mosaic_0001>
module attributes {stable_mosaic.version = 11 : i64} {
  func.func @_fused_trans_conv_kernel(%arg0: i32, %arg1: memref<72xf32, #tpu.memory_space<smem>>, %arg2: memref<2xf32, #tpu.memory_space<smem>>, %arg3: memref<2xf32, #tpu.memory_space<smem>>, %arg4: memref<18xf32, #tpu.memory_space<smem>>, %arg5: memref<1xf32, #tpu.memory_space<smem>>, %arg6: memref<1xf32, #tpu.memory_space<smem>>, %arg7: memref<1x4x16x16xf32, #tpu.memory_space<vmem>>, %arg8: memref<1x1x20x20xf32, #tpu.memory_space<vmem>>, %arg9: memref<4x20x20xf32, #tpu.memory_space<vmem>>, %arg10: memref<2x22x22xf32, #tpu.memory_space<vmem>>) attributes {dimension_semantics = [#tpu.dimension_semantics<parallel>], iteration_bounds = array<i64: 2>, scalar_prefetch = 0 : i64, scratch_operands = 2 : i64, tpu.core_type = #tpu.core_type<tc>, window_params = [{transform_indices = @transform_0, window_bounds = array<i64: 72>}, {transform_indices = @transform_1, window_bounds = array<i64: 2>}, {transform_indices = @transform_2, window_bounds = array<i64: 2>}, {transform_indices = @transform_3, window_bounds = array<i64: 18>}, {transform_indices = @transform_4, window_bounds = array<i64: 1>}, {transform_indices = @transform_5, window_bounds = array<i64: 1>}, {transform_indices = @transform_6, window_bounds = array<i64: 1, 4, 16, 16>}, {transform_indices = @transform_7, window_bounds = array<i64: 1, 1, 20, 20>}]} {
    %cst = arith.constant 0.000000e+00 : f32
    %0 = vector.broadcast %cst : f32 to vector<4x20x20xf32>
    %c0 = arith.constant 0 : index
    %c0_0 = arith.constant 0 : index
    %c0_1 = arith.constant 0 : index
    %1 = vector.load %arg9[%c0, %c0_0, %c0_1] : memref<4x20x20xf32, #tpu.memory_space<vmem>>, vector<4x20x20xf32>
    tpu.vector_store %arg9[%c0, %c0_0, %c0_1], %0 {strides = array<i32>} : memref<4x20x20xf32, #tpu.memory_space<vmem>>, vector<4x20x20xf32>,
    %c0_2 = arith.constant 0 : index
    %c0_3 = arith.constant 0 : index
    %c0_4 = arith.constant 0 : index
    %c0_5 = arith.constant 0 : index
    %2 = vector.load %arg7[%c0_2, %c0_3, %c0_4, %c0_5] : memref<1x4x16x16xf32, #tpu.memory_space<vmem>>, vector<1x4x16x16xf32>
    %3 = vector.shape_cast %2 : vector<1x4x16x16xf32> to vector<4x16x16xf32>
    %c0_6 = arith.constant 0 : index
    %c2 = arith.constant 2 : index
    %c2_7 = arith.constant 2 : index
    %4 = vector.load %arg9[%c0_6, %c2, %c2_7] : memref<4x20x20xf32, #tpu.memory_space<vmem>>, vector<4x16x16xf32>
    tpu.vector_store %arg9[%c0_6, %c2, %c2_7], %3 {strides = array<i32>} : memref<4x20x20xf32, #tpu.memory_space<vmem>>, vector<4x16x16xf32>,
    %cst_8 = arith.constant 0.000000e+00 : f32
    %5 = vector.broadcast %cst_8 : f32 to vector<2x22x22xf32>
    %c0_9 = arith.constant 0 : index
    %c0_10 = arith.constant 0 : index
    %c0_11 = arith.constant 0 : index
    %6 = vector.load %arg10[%c0_9, %c0_10, %c0_11] : memref<2x22x22xf32, #tpu.memory_space<vmem>>, vector<2x22x22xf32>
    tpu.vector_store %arg10[%c0_9, %c0_10, %c0_11], %5 {strides = array<i32>} : memref<2x22x22xf32, #tpu.memory_space<vmem>>, vector<2x22x22xf32>,
    %cst_12 = arith.constant 0.000000e+00 : f32
    %7 = vector.broadcast %cst_12 : f32 to vector<18x18xf32>
    %c0_13 = arith.constant 0 : index
    %8 = memref.load %arg1[%c0_13] : memref<72xf32, #tpu.memory_space<smem>>
    %c0_14 = arith.constant 0 : index
    %c0_15 = arith.constant 0 : index
    %c0_16 = arith.constant 0 : index
    %9 = vector.load %arg9[%c0_14, %c0_15, %c0_16] : memref<4x20x20xf32, #tpu.memory_space<vmem>>, vector<1x18x18xf32>
    %10 = vector.shape_cast %9 : vector<1x18x18xf32> to vector<18x18xf32>
    %11 = vector.broadcast %8 : f32 to vector<18x18xf32>
    %12 = arith.mulf %11, %10 : vector<18x18xf32>
    %13 = arith.addf %7, %12 : vector<18x18xf32>
    %c8 = arith.constant 8 : index
    %14 = memref.load %arg1[%c8] : memref<72xf32, #tpu.memory_space<smem>>
    %c0_17 = arith.constant 0 : index
    %c0_18 = arith.constant 0 : index
    %c1 = arith.constant 1 : index
    %15 = vector.load %arg9[%c0_17, %c0_18, %c1] : memref<4x20x20xf32, #tpu.memory_space<vmem>>, vector<1x18x18xf32>
    %16 = vector.shape_cast %15 : vector<1x18x18xf32> to vector<18x18xf32>
    %17 = vector.broadcast %14 : f32 to vector<18x18xf32>
    %18 = arith.mulf %17, %16 : vector<18x18xf32>
    %19 = arith.addf %13, %18 : vector<18x18xf32>
    %c16 = arith.constant 16 : index
    %20 = memref.load %arg1[%c16] : memref<72xf32, #tpu.memory_space<smem>>
    %c0_19 = arith.constant 0 : index
    %c0_20 = arith.constant 0 : index
    %c2_21 = arith.constant 2 : index
    %21 = vector.load %arg9[%c0_19, %c0_20, %c2_21] : memref<4x20x20xf32, #tpu.memory_space<vmem>>, vector<1x18x18xf32>
    %22 = vector.shape_cast %21 : vector<1x18x18xf32> to vector<18x18xf32>
    %23 = vector.broadcast %20 : f32 to vector<18x18xf32>
    %24 = arith.mulf %23, %22 : vector<18x18xf32>
    %25 = arith.addf %19, %24 : vector<18x18xf32>
    %c24 = arith.constant 24 : index
    %26 = memref.load %arg1[%c24] : memref<72xf32, #tpu.memory_space<smem>>
    %c0_22 = arith.constant 0 : index
    %c1_23 = arith.constant 1 : index
    %c0_24 = arith.constant 0 : index
    %27 = vector.load %arg9[%c0_22, %c1_23, %c0_24] : memref<4x20x20xf32, #tpu.memory_space<vmem>>, vector<1x18x18xf32>
    %28 = vector.shape_cast %27 : vector<1x18x18xf32> to vector<18x18xf32>
    %29 = vector.broadcast %26 : f32 to vector<18x18xf32>
    %30 = arith.mulf %29, %28 : vector<18x18xf32>
    %31 = arith.addf %25, %30 : vector<18x18xf32>
    %c32 = arith.constant 32 : index
    %32 = memref.load %arg1[%c32] : memref<72xf32, #tpu.memory_space<smem>>
    %c0_25 = arith.constant 0 : index
    %c1_26 = arith.constant 1 : index
    %c1_27 = arith.constant 1 : index
    %33 = vector.load %arg9[%c0_25, %c1_26, %c1_27] : memref<4x20x20xf32, #tpu.memory_space<vmem>>, vector<1x18x18xf32>
    %34 = vector.shape_cast %33 : vector<1x18x18xf32> to vector<18x18xf32>
    %35 = vector.broadcast %32 : f32 to vector<18x18xf32>
    %36 = arith.mulf %35, %34 : vector<18x18xf32>
    %37 = arith.addf %31, %36 : vector<18x18xf32>
    %c40 = arith.constant 40 : index
    %38 = memref.load %arg1[%c40] : memref<72xf32, #tpu.memory_space<smem>>
    %c0_28 = arith.constant 0 : index
    %c1_29 = arith.constant 1 : index
    %c2_30 = arith.constant 2 : index
    %39 = vector.load %arg9[%c0_28, %c1_29, %c2_30] : memref<4x20x20xf32, #tpu.memory_space<vmem>>, vector<1x18x18xf32>
    %40 = vector.shape_cast %39 : vector<1x18x18xf32> to vector<18x18xf32>
    %41 = vector.broadcast %38 : f32 to vector<18x18xf32>
    %42 = arith.mulf %41, %40 : vector<18x18xf32>
    %43 = arith.addf %37, %42 : vector<18x18xf32>
    %c48 = arith.constant 48 : index
    %44 = memref.load %arg1[%c48] : memref<72xf32, #tpu.memory_space<smem>>
    %c0_31 = arith.constant 0 : index
    %c2_32 = arith.constant 2 : index
    %c0_33 = arith.constant 0 : index
    %45 = vector.load %arg9[%c0_31, %c2_32, %c0_33] : memref<4x20x20xf32, #tpu.memory_space<vmem>>, vector<1x18x18xf32>
    %46 = vector.shape_cast %45 : vector<1x18x18xf32> to vector<18x18xf32>
    %47 = vector.broadcast %44 : f32 to vector<18x18xf32>
    %48 = arith.mulf %47, %46 : vector<18x18xf32>
    %49 = arith.addf %43, %48 : vector<18x18xf32>
    %c56 = arith.constant 56 : index
    %50 = memref.load %arg1[%c56] : memref<72xf32, #tpu.memory_space<smem>>
    %c0_34 = arith.constant 0 : index
    %c2_35 = arith.constant 2 : index
    %c1_36 = arith.constant 1 : index
    %51 = vector.load %arg9[%c0_34, %c2_35, %c1_36] : memref<4x20x20xf32, #tpu.memory_space<vmem>>, vector<1x18x18xf32>
    %52 = vector.shape_cast %51 : vector<1x18x18xf32> to vector<18x18xf32>
    %53 = vector.broadcast %50 : f32 to vector<18x18xf32>
    %54 = arith.mulf %53, %52 : vector<18x18xf32>
    %55 = arith.addf %49, %54 : vector<18x18xf32>
    %c64 = arith.constant 64 : index
    %56 = memref.load %arg1[%c64] : memref<72xf32, #tpu.memory_space<smem>>
    %c0_37 = arith.constant 0 : index
    %c2_38 = arith.constant 2 : index
    %c2_39 = arith.constant 2 : index
    %57 = vector.load %arg9[%c0_37, %c2_38, %c2_39] : memref<4x20x20xf32, #tpu.memory_space<vmem>>, vector<1x18x18xf32>
    %58 = vector.shape_cast %57 : vector<1x18x18xf32> to vector<18x18xf32>
    %59 = vector.broadcast %56 : f32 to vector<18x18xf32>
    %60 = arith.mulf %59, %58 : vector<18x18xf32>
    %61 = arith.addf %55, %60 : vector<18x18xf32>
    %c2_40 = arith.constant 2 : index
    %62 = memref.load %arg1[%c2_40] : memref<72xf32, #tpu.memory_space<smem>>
    %c1_41 = arith.constant 1 : index
    %c0_42 = arith.constant 0 : index
    %c0_43 = arith.constant 0 : index
    %63 = vector.load %arg9[%c1_41, %c0_42, %c0_43] : memref<4x20x20xf32, #tpu.memory_space<vmem>>, vector<1x18x18xf32>
    %64 = vector.shape_cast %63 : vector<1x18x18xf32> to vector<18x18xf32>
    %65 = vector.broadcast %62 : f32 to vector<18x18xf32>
    %66 = arith.mulf %65, %64 : vector<18x18xf32>
    %67 = arith.addf %61, %66 : vector<18x18xf32>
    %c10 = arith.constant 10 : index
    %68 = memref.load %arg1[%c10] : memref<72xf32, #tpu.memory_space<smem>>
    %c1_44 = arith.constant 1 : index
    %c0_45 = arith.constant 0 : index
    %c1_46 = arith.constant 1 : index
    %69 = vector.load %arg9[%c1_44, %c0_45, %c1_46] : memref<4x20x20xf32, #tpu.memory_space<vmem>>, vector<1x18x18xf32>
    %70 = vector.shape_cast %69 : vector<1x18x18xf32> to vector<18x18xf32>
    %71 = vector.broadcast %68 : f32 to vector<18x18xf32>
    %72 = arith.mulf %71, %70 : vector<18x18xf32>
    %73 = arith.addf %67, %72 : vector<18x18xf32>
    %c18 = arith.constant 18 : index
    %74 = memref.load %arg1[%c18] : memref<72xf32, #tpu.memory_space<smem>>
    %c1_47 = arith.constant 1 : index
    %c0_48 = arith.constant 0 : index
    %c2_49 = arith.constant 2 : index
    %75 = vector.load %arg9[%c1_47, %c0_48, %c2_49] : memref<4x20x20xf32, #tpu.memory_space<vmem>>, vector<1x18x18xf32>
    %76 = vector.shape_cast %75 : vector<1x18x18xf32> to vector<18x18xf32>
    %77 = vector.broadcast %74 : f32 to vector<18x18xf32>
    %78 = arith.mulf %77, %76 : vector<18x18xf32>
    %79 = arith.addf %73, %78 : vector<18x18xf32>
    %c26 = arith.constant 26 : index
    %80 = memref.load %arg1[%c26] : memref<72xf32, #tpu.memory_space<smem>>
    %c1_50 = arith.constant 1 : index
    %c1_51 = arith.constant 1 : index
    %c0_52 = arith.constant 0 : index
    %81 = vector.load %arg9[%c1_50, %c1_51, %c0_52] : memref<4x20x20xf32, #tpu.memory_space<vmem>>, vector<1x18x18xf32>
    %82 = vector.shape_cast %81 : vector<1x18x18xf32> to vector<18x18xf32>
    %83 = vector.broadcast %80 : f32 to vector<18x18xf32>
    %84 = arith.mulf %83, %82 : vector<18x18xf32>
    %85 = arith.addf %79, %84 : vector<18x18xf32>
    %c34 = arith.constant 34 : index
    %86 = memref.load %arg1[%c34] : memref<72xf32, #tpu.memory_space<smem>>
    %c1_53 = arith.constant 1 : index
    %c1_54 = arith.constant 1 : index
    %c1_55 = arith.constant 1 : index
    %87 = vector.load %arg9[%c1_53, %c1_54, %c1_55] : memref<4x20x20xf32, #tpu.memory_space<vmem>>, vector<1x18x18xf32>
    %88 = vector.shape_cast %87 : vector<1x18x18xf32> to vector<18x18xf32>
    %89 = vector.broadcast %86 : f32 to vector<18x18xf32>
    %90 = arith.mulf %89, %88 : vector<18x18xf32>
    %91 = arith.addf %85, %90 : vector<18x18xf32>
    %c42 = arith.constant 42 : index
    %92 = memref.load %arg1[%c42] : memref<72xf32, #tpu.memory_space<smem>>
    %c1_56 = arith.constant 1 : index
    %c1_57 = arith.constant 1 : index
    %c2_58 = arith.constant 2 : index
    %93 = vector.load %arg9[%c1_56, %c1_57, %c2_58] : memref<4x20x20xf32, #tpu.memory_space<vmem>>, vector<1x18x18xf32>
    %94 = vector.shape_cast %93 : vector<1x18x18xf32> to vector<18x18xf32>
    %95 = vector.broadcast %92 : f32 to vector<18x18xf32>
    %96 = arith.mulf %95, %94 : vector<18x18xf32>
    %97 = arith.addf %91, %96 : vector<18x18xf32>
    %c50 = arith.constant 50 : index
    %98 = memref.load %arg1[%c50] : memref<72xf32, #tpu.memory_space<smem>>
    %c1_59 = arith.constant 1 : index
    %c2_60 = arith.constant 2 : index
    %c0_61 = arith.constant 0 : index
    %99 = vector.load %arg9[%c1_59, %c2_60, %c0_61] : memref<4x20x20xf32, #tpu.memory_space<vmem>>, vector<1x18x18xf32>
    %100 = vector.shape_cast %99 : vector<1x18x18xf32> to vector<18x18xf32>
    %101 = vector.broadcast %98 : f32 to vector<18x18xf32>
    %102 = arith.mulf %101, %100 : vector<18x18xf32>
    %103 = arith.addf %97, %102 : vector<18x18xf32>
    %c58 = arith.constant 58 : index
    %104 = memref.load %arg1[%c58] : memref<72xf32, #tpu.memory_space<smem>>
    %c1_62 = arith.constant 1 : index
    %c2_63 = arith.constant 2 : index
    %c1_64 = arith.constant 1 : index
    %105 = vector.load %arg9[%c1_62, %c2_63, %c1_64] : memref<4x20x20xf32, #tpu.memory_space<vmem>>, vector<1x18x18xf32>
    %106 = vector.shape_cast %105 : vector<1x18x18xf32> to vector<18x18xf32>
    %107 = vector.broadcast %104 : f32 to vector<18x18xf32>
    %108 = arith.mulf %107, %106 : vector<18x18xf32>
    %109 = arith.addf %103, %108 : vector<18x18xf32>
    %c66 = arith.constant 66 : index
    %110 = memref.load %arg1[%c66] : memref<72xf32, #tpu.memory_space<smem>>
    %c1_65 = arith.constant 1 : index
    %c2_66 = arith.constant 2 : index
    %c2_67 = arith.constant 2 : index
    %111 = vector.load %arg9[%c1_65, %c2_66, %c2_67] : memref<4x20x20xf32, #tpu.memory_space<vmem>>, vector<1x18x18xf32>
    %112 = vector.shape_cast %111 : vector<1x18x18xf32> to vector<18x18xf32>
    %113 = vector.broadcast %110 : f32 to vector<18x18xf32>
    %114 = arith.mulf %113, %112 : vector<18x18xf32>
    %115 = arith.addf %109, %114 : vector<18x18xf32>
    %c4 = arith.constant 4 : index
    %116 = memref.load %arg1[%c4] : memref<72xf32, #tpu.memory_space<smem>>
    %c2_68 = arith.constant 2 : index
    %c0_69 = arith.constant 0 : index
    %c0_70 = arith.constant 0 : index
    %117 = vector.load %arg9[%c2_68, %c0_69, %c0_70] : memref<4x20x20xf32, #tpu.memory_space<vmem>>, vector<1x18x18xf32>
    %118 = vector.shape_cast %117 : vector<1x18x18xf32> to vector<18x18xf32>
    %119 = vector.broadcast %116 : f32 to vector<18x18xf32>
    %120 = arith.mulf %119, %118 : vector<18x18xf32>
    %121 = arith.addf %115, %120 : vector<18x18xf32>
    %c12 = arith.constant 12 : index
    %122 = memref.load %arg1[%c12] : memref<72xf32, #tpu.memory_space<smem>>
    %c2_71 = arith.constant 2 : index
    %c0_72 = arith.constant 0 : index
    %c1_73 = arith.constant 1 : index
    %123 = vector.load %arg9[%c2_71, %c0_72, %c1_73] : memref<4x20x20xf32, #tpu.memory_space<vmem>>, vector<1x18x18xf32>
    %124 = vector.shape_cast %123 : vector<1x18x18xf32> to vector<18x18xf32>
    %125 = vector.broadcast %122 : f32 to vector<18x18xf32>
    %126 = arith.mulf %125, %124 : vector<18x18xf32>
    %127 = arith.addf %121, %126 : vector<18x18xf32>
    %c20 = arith.constant 20 : index
    %128 = memref.load %arg1[%c20] : memref<72xf32, #tpu.memory_space<smem>>
    %c2_74 = arith.constant 2 : index
    %c0_75 = arith.constant 0 : index
    %c2_76 = arith.constant 2 : index
    %129 = vector.load %arg9[%c2_74, %c0_75, %c2_76] : memref<4x20x20xf32, #tpu.memory_space<vmem>>, vector<1x18x18xf32>
    %130 = vector.shape_cast %129 : vector<1x18x18xf32> to vector<18x18xf32>
    %131 = vector.broadcast %128 : f32 to vector<18x18xf32>
    %132 = arith.mulf %131, %130 : vector<18x18xf32>
    %133 = arith.addf %127, %132 : vector<18x18xf32>
    %c28 = arith.constant 28 : index
    %134 = memref.load %arg1[%c28] : memref<72xf32, #tpu.memory_space<smem>>
    %c2_77 = arith.constant 2 : index
    %c1_78 = arith.constant 1 : index
    %c0_79 = arith.constant 0 : index
    %135 = vector.load %arg9[%c2_77, %c1_78, %c0_79] : memref<4x20x20xf32, #tpu.memory_space<vmem>>, vector<1x18x18xf32>
    %136 = vector.shape_cast %135 : vector<1x18x18xf32> to vector<18x18xf32>
    %137 = vector.broadcast %134 : f32 to vector<18x18xf32>
    %138 = arith.mulf %137, %136 : vector<18x18xf32>
    %139 = arith.addf %133, %138 : vector<18x18xf32>
    %c36 = arith.constant 36 : index
    %140 = memref.load %arg1[%c36] : memref<72xf32, #tpu.memory_space<smem>>
    %c2_80 = arith.constant 2 : index
    %c1_81 = arith.constant 1 : index
    %c1_82 = arith.constant 1 : index
    %141 = vector.load %arg9[%c2_80, %c1_81, %c1_82] : memref<4x20x20xf32, #tpu.memory_space<vmem>>, vector<1x18x18xf32>
    %142 = vector.shape_cast %141 : vector<1x18x18xf32> to vector<18x18xf32>
    %143 = vector.broadcast %140 : f32 to vector<18x18xf32>
    %144 = arith.mulf %143, %142 : vector<18x18xf32>
    %145 = arith.addf %139, %144 : vector<18x18xf32>
    %c44 = arith.constant 44 : index
    %146 = memref.load %arg1[%c44] : memref<72xf32, #tpu.memory_space<smem>>
    %c2_83 = arith.constant 2 : index
    %c1_84 = arith.constant 1 : index
    %c2_85 = arith.constant 2 : index
    %147 = vector.load %arg9[%c2_83, %c1_84, %c2_85] : memref<4x20x20xf32, #tpu.memory_space<vmem>>, vector<1x18x18xf32>
    %148 = vector.shape_cast %147 : vector<1x18x18xf32> to vector<18x18xf32>
    %149 = vector.broadcast %146 : f32 to vector<18x18xf32>
    %150 = arith.mulf %149, %148 : vector<18x18xf32>
    %151 = arith.addf %145, %150 : vector<18x18xf32>
    %c52 = arith.constant 52 : index
    %152 = memref.load %arg1[%c52] : memref<72xf32, #tpu.memory_space<smem>>
    %c2_86 = arith.constant 2 : index
    %c2_87 = arith.constant 2 : index
    %c0_88 = arith.constant 0 : index
    %153 = vector.load %arg9[%c2_86, %c2_87, %c0_88] : memref<4x20x20xf32, #tpu.memory_space<vmem>>, vector<1x18x18xf32>
    %154 = vector.shape_cast %153 : vector<1x18x18xf32> to vector<18x18xf32>
    %155 = vector.broadcast %152 : f32 to vector<18x18xf32>
    %156 = arith.mulf %155, %154 : vector<18x18xf32>
    %157 = arith.addf %151, %156 : vector<18x18xf32>
    %c60 = arith.constant 60 : index
    %158 = memref.load %arg1[%c60] : memref<72xf32, #tpu.memory_space<smem>>
    %c2_89 = arith.constant 2 : index
    %c2_90 = arith.constant 2 : index
    %c1_91 = arith.constant 1 : index
    %159 = vector.load %arg9[%c2_89, %c2_90, %c1_91] : memref<4x20x20xf32, #tpu.memory_space<vmem>>, vector<1x18x18xf32>
    %160 = vector.shape_cast %159 : vector<1x18x18xf32> to vector<18x18xf32>
    %161 = vector.broadcast %158 : f32 to vector<18x18xf32>
    %162 = arith.mulf %161, %160 : vector<18x18xf32>
    %163 = arith.addf %157, %162 : vector<18x18xf32>
    %c68 = arith.constant 68 : index
    %164 = memref.load %arg1[%c68] : memref<72xf32, #tpu.memory_space<smem>>
    %c2_92 = arith.constant 2 : index
    %c2_93 = arith.constant 2 : index
    %c2_94 = arith.constant 2 : index
    %165 = vector.load %arg9[%c2_92, %c2_93, %c2_94] : memref<4x20x20xf32, #tpu.memory_space<vmem>>, vector<1x18x18xf32>
    %166 = vector.shape_cast %165 : vector<1x18x18xf32> to vector<18x18xf32>
    %167 = vector.broadcast %164 : f32 to vector<18x18xf32>
    %168 = arith.mulf %167, %166 : vector<18x18xf32>
    %169 = arith.addf %163, %168 : vector<18x18xf32>
    %c6 = arith.constant 6 : index
    %170 = memref.load %arg1[%c6] : memref<72xf32, #tpu.memory_space<smem>>
    %c3 = arith.constant 3 : index
    %c0_95 = arith.constant 0 : index
    %c0_96 = arith.constant 0 : index
    %171 = vector.load %arg9[%c3, %c0_95, %c0_96] : memref<4x20x20xf32, #tpu.memory_space<vmem>>, vector<1x18x18xf32>
    %172 = vector.shape_cast %171 : vector<1x18x18xf32> to vector<18x18xf32>
    %173 = vector.broadcast %170 : f32 to vector<18x18xf32>
    %174 = arith.mulf %173, %172 : vector<18x18xf32>
    %175 = arith.addf %169, %174 : vector<18x18xf32>
    %c14 = arith.constant 14 : index
    %176 = memref.load %arg1[%c14] : memref<72xf32, #tpu.memory_space<smem>>
    %c3_97 = arith.constant 3 : index
    %c0_98 = arith.constant 0 : index
    %c1_99 = arith.constant 1 : index
    %177 = vector.load %arg9[%c3_97, %c0_98, %c1_99] : memref<4x20x20xf32, #tpu.memory_space<vmem>>, vector<1x18x18xf32>
    %178 = vector.shape_cast %177 : vector<1x18x18xf32> to vector<18x18xf32>
    %179 = vector.broadcast %176 : f32 to vector<18x18xf32>
    %180 = arith.mulf %179, %178 : vector<18x18xf32>
    %181 = arith.addf %175, %180 : vector<18x18xf32>
    %c22 = arith.constant 22 : index
    %182 = memref.load %arg1[%c22] : memref<72xf32, #tpu.memory_space<smem>>
    %c3_100 = arith.constant 3 : index
    %c0_101 = arith.constant 0 : index
    %c2_102 = arith.constant 2 : index
    %183 = vector.load %arg9[%c3_100, %c0_101, %c2_102] : memref<4x20x20xf32, #tpu.memory_space<vmem>>, vector<1x18x18xf32>
    %184 = vector.shape_cast %183 : vector<1x18x18xf32> to vector<18x18xf32>
    %185 = vector.broadcast %182 : f32 to vector<18x18xf32>
    %186 = arith.mulf %185, %184 : vector<18x18xf32>
    %187 = arith.addf %181, %186 : vector<18x18xf32>
    %c30 = arith.constant 30 : index
    %188 = memref.load %arg1[%c30] : memref<72xf32, #tpu.memory_space<smem>>
    %c3_103 = arith.constant 3 : index
    %c1_104 = arith.constant 1 : index
    %c0_105 = arith.constant 0 : index
    %189 = vector.load %arg9[%c3_103, %c1_104, %c0_105] : memref<4x20x20xf32, #tpu.memory_space<vmem>>, vector<1x18x18xf32>
    %190 = vector.shape_cast %189 : vector<1x18x18xf32> to vector<18x18xf32>
    %191 = vector.broadcast %188 : f32 to vector<18x18xf32>
    %192 = arith.mulf %191, %190 : vector<18x18xf32>
    %193 = arith.addf %187, %192 : vector<18x18xf32>
    %c38 = arith.constant 38 : index
    %194 = memref.load %arg1[%c38] : memref<72xf32, #tpu.memory_space<smem>>
    %c3_106 = arith.constant 3 : index
    %c1_107 = arith.constant 1 : index
    %c1_108 = arith.constant 1 : index
    %195 = vector.load %arg9[%c3_106, %c1_107, %c1_108] : memref<4x20x20xf32, #tpu.memory_space<vmem>>, vector<1x18x18xf32>
    %196 = vector.shape_cast %195 : vector<1x18x18xf32> to vector<18x18xf32>
    %197 = vector.broadcast %194 : f32 to vector<18x18xf32>
    %198 = arith.mulf %197, %196 : vector<18x18xf32>
    %199 = arith.addf %193, %198 : vector<18x18xf32>
    %c46 = arith.constant 46 : index
    %200 = memref.load %arg1[%c46] : memref<72xf32, #tpu.memory_space<smem>>
    %c3_109 = arith.constant 3 : index
    %c1_110 = arith.constant 1 : index
    %c2_111 = arith.constant 2 : index
    %201 = vector.load %arg9[%c3_109, %c1_110, %c2_111] : memref<4x20x20xf32, #tpu.memory_space<vmem>>, vector<1x18x18xf32>
    %202 = vector.shape_cast %201 : vector<1x18x18xf32> to vector<18x18xf32>
    %203 = vector.broadcast %200 : f32 to vector<18x18xf32>
    %204 = arith.mulf %203, %202 : vector<18x18xf32>
    %205 = arith.addf %199, %204 : vector<18x18xf32>
    %c54 = arith.constant 54 : index
    %206 = memref.load %arg1[%c54] : memref<72xf32, #tpu.memory_space<smem>>
    %c3_112 = arith.constant 3 : index
    %c2_113 = arith.constant 2 : index
    %c0_114 = arith.constant 0 : index
    %207 = vector.load %arg9[%c3_112, %c2_113, %c0_114] : memref<4x20x20xf32, #tpu.memory_space<vmem>>, vector<1x18x18xf32>
    %208 = vector.shape_cast %207 : vector<1x18x18xf32> to vector<18x18xf32>
    %209 = vector.broadcast %206 : f32 to vector<18x18xf32>
    %210 = arith.mulf %209, %208 : vector<18x18xf32>
    %211 = arith.addf %205, %210 : vector<18x18xf32>
    %c62 = arith.constant 62 : index
    %212 = memref.load %arg1[%c62] : memref<72xf32, #tpu.memory_space<smem>>
    %c3_115 = arith.constant 3 : index
    %c2_116 = arith.constant 2 : index
    %c1_117 = arith.constant 1 : index
    %213 = vector.load %arg9[%c3_115, %c2_116, %c1_117] : memref<4x20x20xf32, #tpu.memory_space<vmem>>, vector<1x18x18xf32>
    %214 = vector.shape_cast %213 : vector<1x18x18xf32> to vector<18x18xf32>
    %215 = vector.broadcast %212 : f32 to vector<18x18xf32>
    %216 = arith.mulf %215, %214 : vector<18x18xf32>
    %217 = arith.addf %211, %216 : vector<18x18xf32>
    %c70 = arith.constant 70 : index
    %218 = memref.load %arg1[%c70] : memref<72xf32, #tpu.memory_space<smem>>
    %c3_118 = arith.constant 3 : index
    %c2_119 = arith.constant 2 : index
    %c2_120 = arith.constant 2 : index
    %219 = vector.load %arg9[%c3_118, %c2_119, %c2_120] : memref<4x20x20xf32, #tpu.memory_space<vmem>>, vector<1x18x18xf32>
    %220 = vector.shape_cast %219 : vector<1x18x18xf32> to vector<18x18xf32>
    %221 = vector.broadcast %218 : f32 to vector<18x18xf32>
    %222 = arith.mulf %221, %220 : vector<18x18xf32>
    %223 = arith.addf %217, %222 : vector<18x18xf32>
    %c0_121 = arith.constant 0 : index
    %224 = memref.load %arg2[%c0_121] : memref<2xf32, #tpu.memory_space<smem>>
    %225 = vector.broadcast %224 : f32 to vector<18x18xf32>
    %226 = arith.mulf %223, %225 : vector<18x18xf32>
    %c0_122 = arith.constant 0 : index
    %227 = memref.load %arg3[%c0_122] : memref<2xf32, #tpu.memory_space<smem>>
    %228 = vector.broadcast %227 : f32 to vector<18x18xf32>
    %229 = arith.addf %226, %228 : vector<18x18xf32>
    %cst_123 = arith.constant 0.000000e+00 : f32
    %230 = vector.broadcast %cst_123 : f32 to vector<18x18xf32>
    %231 = arith.cmpf ogt, %229, %230 : vector<18x18xf32>
    %cst_124 = arith.constant 0.00999999977 : f32
    %232 = vector.broadcast %cst_124 : f32 to vector<18x18xf32>
    %233 = arith.mulf %232, %229 : vector<18x18xf32>
    %234 = arith.select %231, %229, %233 : vector<18x18xi1>, vector<18x18xf32>
    %c0_125 = arith.constant 0 : index
    %c2_126 = arith.constant 2 : index
    %c2_127 = arith.constant 2 : index
    %235 = vector.load %arg10[%c0_125, %c2_126, %c2_127] : memref<2x22x22xf32, #tpu.memory_space<vmem>>, vector<1x18x18xf32>
    %236 = vector.shape_cast %235 : vector<1x18x18xf32> to vector<18x18xf32>
    %237 = vector.shape_cast %234 : vector<18x18xf32> to vector<1x18x18xf32>
    tpu.vector_store %arg10[%c0_125, %c2_126, %c2_127], %237 {strides = array<i32>} : memref<2x22x22xf32, #tpu.memory_space<vmem>>, vector<1x18x18xf32>,
    %cst_128 = arith.constant 0.000000e+00 : f32
    %238 = vector.broadcast %cst_128 : f32 to vector<18x18xf32>
    %c1_129 = arith.constant 1 : index
    %239 = memref.load %arg1[%c1_129] : memref<72xf32, #tpu.memory_space<smem>>
    %c0_130 = arith.constant 0 : index
    %c0_131 = arith.constant 0 : index
    %c0_132 = arith.constant 0 : index
    %240 = vector.load %arg9[%c0_130, %c0_131, %c0_132] : memref<4x20x20xf32, #tpu.memory_space<vmem>>, vector<1x18x18xf32>
    %241 = vector.shape_cast %240 : vector<1x18x18xf32> to vector<18x18xf32>
    %242 = vector.broadcast %239 : f32 to vector<18x18xf32>
    %243 = arith.mulf %242, %241 : vector<18x18xf32>
    %244 = arith.addf %238, %243 : vector<18x18xf32>
    %c9 = arith.constant 9 : index
    %245 = memref.load %arg1[%c9] : memref<72xf32, #tpu.memory_space<smem>>
    %c0_133 = arith.constant 0 : index
    %c0_134 = arith.constant 0 : index
    %c1_135 = arith.constant 1 : index
    %246 = vector.load %arg9[%c0_133, %c0_134, %c1_135] : memref<4x20x20xf32, #tpu.memory_space<vmem>>, vector<1x18x18xf32>
    %247 = vector.shape_cast %246 : vector<1x18x18xf32> to vector<18x18xf32>
    %248 = vector.broadcast %245 : f32 to vector<18x18xf32>
    %249 = arith.mulf %248, %247 : vector<18x18xf32>
    %250 = arith.addf %244, %249 : vector<18x18xf32>
    %c17 = arith.constant 17 : index
    %251 = memref.load %arg1[%c17] : memref<72xf32, #tpu.memory_space<smem>>
    %c0_136 = arith.constant 0 : index
    %c0_137 = arith.constant 0 : index
    %c2_138 = arith.constant 2 : index
    %252 = vector.load %arg9[%c0_136, %c0_137, %c2_138] : memref<4x20x20xf32, #tpu.memory_space<vmem>>, vector<1x18x18xf32>
    %253 = vector.shape_cast %252 : vector<1x18x18xf32> to vector<18x18xf32>
    %254 = vector.broadcast %251 : f32 to vector<18x18xf32>
    %255 = arith.mulf %254, %253 : vector<18x18xf32>
    %256 = arith.addf %250, %255 : vector<18x18xf32>
    %c25 = arith.constant 25 : index
    %257 = memref.load %arg1[%c25] : memref<72xf32, #tpu.memory_space<smem>>
    %c0_139 = arith.constant 0 : index
    %c1_140 = arith.constant 1 : index
    %c0_141 = arith.constant 0 : index
    %258 = vector.load %arg9[%c0_139, %c1_140, %c0_141] : memref<4x20x20xf32, #tpu.memory_space<vmem>>, vector<1x18x18xf32>
    %259 = vector.shape_cast %258 : vector<1x18x18xf32> to vector<18x18xf32>
    %260 = vector.broadcast %257 : f32 to vector<18x18xf32>
    %261 = arith.mulf %260, %259 : vector<18x18xf32>
    %262 = arith.addf %256, %261 : vector<18x18xf32>
    %c33 = arith.constant 33 : index
    %263 = memref.load %arg1[%c33] : memref<72xf32, #tpu.memory_space<smem>>
    %c0_142 = arith.constant 0 : index
    %c1_143 = arith.constant 1 : index
    %c1_144 = arith.constant 1 : index
    %264 = vector.load %arg9[%c0_142, %c1_143, %c1_144] : memref<4x20x20xf32, #tpu.memory_space<vmem>>, vector<1x18x18xf32>
    %265 = vector.shape_cast %264 : vector<1x18x18xf32> to vector<18x18xf32>
    %266 = vector.broadcast %263 : f32 to vector<18x18xf32>
    %267 = arith.mulf %266, %265 : vector<18x18xf32>
    %268 = arith.addf %262, %267 : vector<18x18xf32>
    %c41 = arith.constant 41 : index
    %269 = memref.load %arg1[%c41] : memref<72xf32, #tpu.memory_space<smem>>
    %c0_145 = arith.constant 0 : index
    %c1_146 = arith.constant 1 : index
    %c2_147 = arith.constant 2 : index
    %270 = vector.load %arg9[%c0_145, %c1_146, %c2_147] : memref<4x20x20xf32, #tpu.memory_space<vmem>>, vector<1x18x18xf32>
    %271 = vector.shape_cast %270 : vector<1x18x18xf32> to vector<18x18xf32>
    %272 = vector.broadcast %269 : f32 to vector<18x18xf32>
    %273 = arith.mulf %272, %271 : vector<18x18xf32>
    %274 = arith.addf %268, %273 : vector<18x18xf32>
    %c49 = arith.constant 49 : index
    %275 = memref.load %arg1[%c49] : memref<72xf32, #tpu.memory_space<smem>>
    %c0_148 = arith.constant 0 : index
    %c2_149 = arith.constant 2 : index
    %c0_150 = arith.constant 0 : index
    %276 = vector.load %arg9[%c0_148, %c2_149, %c0_150] : memref<4x20x20xf32, #tpu.memory_space<vmem>>, vector<1x18x18xf32>
    %277 = vector.shape_cast %276 : vector<1x18x18xf32> to vector<18x18xf32>
    %278 = vector.broadcast %275 : f32 to vector<18x18xf32>
    %279 = arith.mulf %278, %277 : vector<18x18xf32>
    %280 = arith.addf %274, %279 : vector<18x18xf32>
    %c57 = arith.constant 57 : index
    %281 = memref.load %arg1[%c57] : memref<72xf32, #tpu.memory_space<smem>>
    %c0_151 = arith.constant 0 : index
    %c2_152 = arith.constant 2 : index
    %c1_153 = arith.constant 1 : index
    %282 = vector.load %arg9[%c0_151, %c2_152, %c1_153] : memref<4x20x20xf32, #tpu.memory_space<vmem>>, vector<1x18x18xf32>
    %283 = vector.shape_cast %282 : vector<1x18x18xf32> to vector<18x18xf32>
    %284 = vector.broadcast %281 : f32 to vector<18x18xf32>
    %285 = arith.mulf %284, %283 : vector<18x18xf32>
    %286 = arith.addf %280, %285 : vector<18x18xf32>
    %c65 = arith.constant 65 : index
    %287 = memref.load %arg1[%c65] : memref<72xf32, #tpu.memory_space<smem>>
    %c0_154 = arith.constant 0 : index
    %c2_155 = arith.constant 2 : index
    %c2_156 = arith.constant 2 : index
    %288 = vector.load %arg9[%c0_154, %c2_155, %c2_156] : memref<4x20x20xf32, #tpu.memory_space<vmem>>, vector<1x18x18xf32>
    %289 = vector.shape_cast %288 : vector<1x18x18xf32> to vector<18x18xf32>
    %290 = vector.broadcast %287 : f32 to vector<18x18xf32>
    %291 = arith.mulf %290, %289 : vector<18x18xf32>
    %292 = arith.addf %286, %291 : vector<18x18xf32>
    %c3_157 = arith.constant 3 : index
    %293 = memref.load %arg1[%c3_157] : memref<72xf32, #tpu.memory_space<smem>>
    %c1_158 = arith.constant 1 : index
    %c0_159 = arith.constant 0 : index
    %c0_160 = arith.constant 0 : index
    %294 = vector.load %arg9[%c1_158, %c0_159, %c0_160] : memref<4x20x20xf32, #tpu.memory_space<vmem>>, vector<1x18x18xf32>
    %295 = vector.shape_cast %294 : vector<1x18x18xf32> to vector<18x18xf32>
    %296 = vector.broadcast %293 : f32 to vector<18x18xf32>
    %297 = arith.mulf %296, %295 : vector<18x18xf32>
    %298 = arith.addf %292, %297 : vector<18x18xf32>
    %c11 = arith.constant 11 : index
    %299 = memref.load %arg1[%c11] : memref<72xf32, #tpu.memory_space<smem>>
    %c1_161 = arith.constant 1 : index
    %c0_162 = arith.constant 0 : index
    %c1_163 = arith.constant 1 : index
    %300 = vector.load %arg9[%c1_161, %c0_162, %c1_163] : memref<4x20x20xf32, #tpu.memory_space<vmem>>, vector<1x18x18xf32>
    %301 = vector.shape_cast %300 : vector<1x18x18xf32> to vector<18x18xf32>
    %302 = vector.broadcast %299 : f32 to vector<18x18xf32>
    %303 = arith.mulf %302, %301 : vector<18x18xf32>
    %304 = arith.addf %298, %303 : vector<18x18xf32>
    %c19 = arith.constant 19 : index
    %305 = memref.load %arg1[%c19] : memref<72xf32, #tpu.memory_space<smem>>
    %c1_164 = arith.constant 1 : index
    %c0_165 = arith.constant 0 : index
    %c2_166 = arith.constant 2 : index
    %306 = vector.load %arg9[%c1_164, %c0_165, %c2_166] : memref<4x20x20xf32, #tpu.memory_space<vmem>>, vector<1x18x18xf32>
    %307 = vector.shape_cast %306 : vector<1x18x18xf32> to vector<18x18xf32>
    %308 = vector.broadcast %305 : f32 to vector<18x18xf32>
    %309 = arith.mulf %308, %307 : vector<18x18xf32>
    %310 = arith.addf %304, %309 : vector<18x18xf32>
    %c27 = arith.constant 27 : index
    %311 = memref.load %arg1[%c27] : memref<72xf32, #tpu.memory_space<smem>>
    %c1_167 = arith.constant 1 : index
    %c1_168 = arith.constant 1 : index
    %c0_169 = arith.constant 0 : index
    %312 = vector.load %arg9[%c1_167, %c1_168, %c0_169] : memref<4x20x20xf32, #tpu.memory_space<vmem>>, vector<1x18x18xf32>
    %313 = vector.shape_cast %312 : vector<1x18x18xf32> to vector<18x18xf32>
    %314 = vector.broadcast %311 : f32 to vector<18x18xf32>
    %315 = arith.mulf %314, %313 : vector<18x18xf32>
    %316 = arith.addf %310, %315 : vector<18x18xf32>
    %c35 = arith.constant 35 : index
    %317 = memref.load %arg1[%c35] : memref<72xf32, #tpu.memory_space<smem>>
    %c1_170 = arith.constant 1 : index
    %c1_171 = arith.constant 1 : index
    %c1_172 = arith.constant 1 : index
    %318 = vector.load %arg9[%c1_170, %c1_171, %c1_172] : memref<4x20x20xf32, #tpu.memory_space<vmem>>, vector<1x18x18xf32>
    %319 = vector.shape_cast %318 : vector<1x18x18xf32> to vector<18x18xf32>
    %320 = vector.broadcast %317 : f32 to vector<18x18xf32>
    %321 = arith.mulf %320, %319 : vector<18x18xf32>
    %322 = arith.addf %316, %321 : vector<18x18xf32>
    %c43 = arith.constant 43 : index
    %323 = memref.load %arg1[%c43] : memref<72xf32, #tpu.memory_space<smem>>
    %c1_173 = arith.constant 1 : index
    %c1_174 = arith.constant 1 : index
    %c2_175 = arith.constant 2 : index
    %324 = vector.load %arg9[%c1_173, %c1_174, %c2_175] : memref<4x20x20xf32, #tpu.memory_space<vmem>>, vector<1x18x18xf32>
    %325 = vector.shape_cast %324 : vector<1x18x18xf32> to vector<18x18xf32>
    %326 = vector.broadcast %323 : f32 to vector<18x18xf32>
    %327 = arith.mulf %326, %325 : vector<18x18xf32>
    %328 = arith.addf %322, %327 : vector<18x18xf32>
    %c51 = arith.constant 51 : index
    %329 = memref.load %arg1[%c51] : memref<72xf32, #tpu.memory_space<smem>>
    %c1_176 = arith.constant 1 : index
    %c2_177 = arith.constant 2 : index
    %c0_178 = arith.constant 0 : index
    %330 = vector.load %arg9[%c1_176, %c2_177, %c0_178] : memref<4x20x20xf32, #tpu.memory_space<vmem>>, vector<1x18x18xf32>
    %331 = vector.shape_cast %330 : vector<1x18x18xf32> to vector<18x18xf32>
    %332 = vector.broadcast %329 : f32 to vector<18x18xf32>
    %333 = arith.mulf %332, %331 : vector<18x18xf32>
    %334 = arith.addf %328, %333 : vector<18x18xf32>
    %c59 = arith.constant 59 : index
    %335 = memref.load %arg1[%c59] : memref<72xf32, #tpu.memory_space<smem>>
    %c1_179 = arith.constant 1 : index
    %c2_180 = arith.constant 2 : index
    %c1_181 = arith.constant 1 : index
    %336 = vector.load %arg9[%c1_179, %c2_180, %c1_181] : memref<4x20x20xf32, #tpu.memory_space<vmem>>, vector<1x18x18xf32>
    %337 = vector.shape_cast %336 : vector<1x18x18xf32> to vector<18x18xf32>
    %338 = vector.broadcast %335 : f32 to vector<18x18xf32>
    %339 = arith.mulf %338, %337 : vector<18x18xf32>
    %340 = arith.addf %334, %339 : vector<18x18xf32>
    %c67 = arith.constant 67 : index
    %341 = memref.load %arg1[%c67] : memref<72xf32, #tpu.memory_space<smem>>
    %c1_182 = arith.constant 1 : index
    %c2_183 = arith.constant 2 : index
    %c2_184 = arith.constant 2 : index
    %342 = vector.load %arg9[%c1_182, %c2_183, %c2_184] : memref<4x20x20xf32, #tpu.memory_space<vmem>>, vector<1x18x18xf32>
    %343 = vector.shape_cast %342 : vector<1x18x18xf32> to vector<18x18xf32>
    %344 = vector.broadcast %341 : f32 to vector<18x18xf32>
    %345 = arith.mulf %344, %343 : vector<18x18xf32>
    %346 = arith.addf %340, %345 : vector<18x18xf32>
    %c5 = arith.constant 5 : index
    %347 = memref.load %arg1[%c5] : memref<72xf32, #tpu.memory_space<smem>>
    %c2_185 = arith.constant 2 : index
    %c0_186 = arith.constant 0 : index
    %c0_187 = arith.constant 0 : index
    %348 = vector.load %arg9[%c2_185, %c0_186, %c0_187] : memref<4x20x20xf32, #tpu.memory_space<vmem>>, vector<1x18x18xf32>
    %349 = vector.shape_cast %348 : vector<1x18x18xf32> to vector<18x18xf32>
    %350 = vector.broadcast %347 : f32 to vector<18x18xf32>
    %351 = arith.mulf %350, %349 : vector<18x18xf32>
    %352 = arith.addf %346, %351 : vector<18x18xf32>
    %c13 = arith.constant 13 : index
    %353 = memref.load %arg1[%c13] : memref<72xf32, #tpu.memory_space<smem>>
    %c2_188 = arith.constant 2 : index
    %c0_189 = arith.constant 0 : index
    %c1_190 = arith.constant 1 : index
    %354 = vector.load %arg9[%c2_188, %c0_189, %c1_190] : memref<4x20x20xf32, #tpu.memory_space<vmem>>, vector<1x18x18xf32>
    %355 = vector.shape_cast %354 : vector<1x18x18xf32> to vector<18x18xf32>
    %356 = vector.broadcast %353 : f32 to vector<18x18xf32>
    %357 = arith.mulf %356, %355 : vector<18x18xf32>
    %358 = arith.addf %352, %357 : vector<18x18xf32>
    %c21 = arith.constant 21 : index
    %359 = memref.load %arg1[%c21] : memref<72xf32, #tpu.memory_space<smem>>
    %c2_191 = arith.constant 2 : index
    %c0_192 = arith.constant 0 : index
    %c2_193 = arith.constant 2 : index
    %360 = vector.load %arg9[%c2_191, %c0_192, %c2_193] : memref<4x20x20xf32, #tpu.memory_space<vmem>>, vector<1x18x18xf32>
    %361 = vector.shape_cast %360 : vector<1x18x18xf32> to vector<18x18xf32>
    %362 = vector.broadcast %359 : f32 to vector<18x18xf32>
    %363 = arith.mulf %362, %361 : vector<18x18xf32>
    %364 = arith.addf %358, %363 : vector<18x18xf32>
    %c29 = arith.constant 29 : index
    %365 = memref.load %arg1[%c29] : memref<72xf32, #tpu.memory_space<smem>>
    %c2_194 = arith.constant 2 : index
    %c1_195 = arith.constant 1 : index
    %c0_196 = arith.constant 0 : index
    %366 = vector.load %arg9[%c2_194, %c1_195, %c0_196] : memref<4x20x20xf32, #tpu.memory_space<vmem>>, vector<1x18x18xf32>
    %367 = vector.shape_cast %366 : vector<1x18x18xf32> to vector<18x18xf32>
    %368 = vector.broadcast %365 : f32 to vector<18x18xf32>
    %369 = arith.mulf %368, %367 : vector<18x18xf32>
    %370 = arith.addf %364, %369 : vector<18x18xf32>
    %c37 = arith.constant 37 : index
    %371 = memref.load %arg1[%c37] : memref<72xf32, #tpu.memory_space<smem>>
    %c2_197 = arith.constant 2 : index
    %c1_198 = arith.constant 1 : index
    %c1_199 = arith.constant 1 : index
    %372 = vector.load %arg9[%c2_197, %c1_198, %c1_199] : memref<4x20x20xf32, #tpu.memory_space<vmem>>, vector<1x18x18xf32>
    %373 = vector.shape_cast %372 : vector<1x18x18xf32> to vector<18x18xf32>
    %374 = vector.broadcast %371 : f32 to vector<18x18xf32>
    %375 = arith.mulf %374, %373 : vector<18x18xf32>
    %376 = arith.addf %370, %375 : vector<18x18xf32>
    %c45 = arith.constant 45 : index
    %377 = memref.load %arg1[%c45] : memref<72xf32, #tpu.memory_space<smem>>
    %c2_200 = arith.constant 2 : index
    %c1_201 = arith.constant 1 : index
    %c2_202 = arith.constant 2 : index
    %378 = vector.load %arg9[%c2_200, %c1_201, %c2_202] : memref<4x20x20xf32, #tpu.memory_space<vmem>>, vector<1x18x18xf32>
    %379 = vector.shape_cast %378 : vector<1x18x18xf32> to vector<18x18xf32>
    %380 = vector.broadcast %377 : f32 to vector<18x18xf32>
    %381 = arith.mulf %380, %379 : vector<18x18xf32>
    %382 = arith.addf %376, %381 : vector<18x18xf32>
    %c53 = arith.constant 53 : index
    %383 = memref.load %arg1[%c53] : memref<72xf32, #tpu.memory_space<smem>>
    %c2_203 = arith.constant 2 : index
    %c2_204 = arith.constant 2 : index
    %c0_205 = arith.constant 0 : index
    %384 = vector.load %arg9[%c2_203, %c2_204, %c0_205] : memref<4x20x20xf32, #tpu.memory_space<vmem>>, vector<1x18x18xf32>
    %385 = vector.shape_cast %384 : vector<1x18x18xf32> to vector<18x18xf32>
    %386 = vector.broadcast %383 : f32 to vector<18x18xf32>
    %387 = arith.mulf %386, %385 : vector<18x18xf32>
    %388 = arith.addf %382, %387 : vector<18x18xf32>
    %c61 = arith.constant 61 : index
    %389 = memref.load %arg1[%c61] : memref<72xf32, #tpu.memory_space<smem>>
    %c2_206 = arith.constant 2 : index
    %c2_207 = arith.constant 2 : index
    %c1_208 = arith.constant 1 : index
    %390 = vector.load %arg9[%c2_206, %c2_207, %c1_208] : memref<4x20x20xf32, #tpu.memory_space<vmem>>, vector<1x18x18xf32>
    %391 = vector.shape_cast %390 : vector<1x18x18xf32> to vector<18x18xf32>
    %392 = vector.broadcast %389 : f32 to vector<18x18xf32>
    %393 = arith.mulf %392, %391 : vector<18x18xf32>
    %394 = arith.addf %388, %393 : vector<18x18xf32>
    %c69 = arith.constant 69 : index
    %395 = memref.load %arg1[%c69] : memref<72xf32, #tpu.memory_space<smem>>
    %c2_209 = arith.constant 2 : index
    %c2_210 = arith.constant 2 : index
    %c2_211 = arith.constant 2 : index
    %396 = vector.load %arg9[%c2_209, %c2_210, %c2_211] : memref<4x20x20xf32, #tpu.memory_space<vmem>>, vector<1x18x18xf32>
    %397 = vector.shape_cast %396 : vector<1x18x18xf32> to vector<18x18xf32>
    %398 = vector.broadcast %395 : f32 to vector<18x18xf32>
    %399 = arith.mulf %398, %397 : vector<18x18xf32>
    %400 = arith.addf %394, %399 : vector<18x18xf32>
    %c7 = arith.constant 7 : index
    %401 = memref.load %arg1[%c7] : memref<72xf32, #tpu.memory_space<smem>>
    %c3_212 = arith.constant 3 : index
    %c0_213 = arith.constant 0 : index
    %c0_214 = arith.constant 0 : index
    %402 = vector.load %arg9[%c3_212, %c0_213, %c0_214] : memref<4x20x20xf32, #tpu.memory_space<vmem>>, vector<1x18x18xf32>
    %403 = vector.shape_cast %402 : vector<1x18x18xf32> to vector<18x18xf32>
    %404 = vector.broadcast %401 : f32 to vector<18x18xf32>
    %405 = arith.mulf %404, %403 : vector<18x18xf32>
    %406 = arith.addf %400, %405 : vector<18x18xf32>
    %c15 = arith.constant 15 : index
    %407 = memref.load %arg1[%c15] : memref<72xf32, #tpu.memory_space<smem>>
    %c3_215 = arith.constant 3 : index
    %c0_216 = arith.constant 0 : index
    %c1_217 = arith.constant 1 : index
    %408 = vector.load %arg9[%c3_215, %c0_216, %c1_217] : memref<4x20x20xf32, #tpu.memory_space<vmem>>, vector<1x18x18xf32>
    %409 = vector.shape_cast %408 : vector<1x18x18xf32> to vector<18x18xf32>
    %410 = vector.broadcast %407 : f32 to vector<18x18xf32>
    %411 = arith.mulf %410, %409 : vector<18x18xf32>
    %412 = arith.addf %406, %411 : vector<18x18xf32>
    %c23 = arith.constant 23 : index
    %413 = memref.load %arg1[%c23] : memref<72xf32, #tpu.memory_space<smem>>
    %c3_218 = arith.constant 3 : index
    %c0_219 = arith.constant 0 : index
    %c2_220 = arith.constant 2 : index
    %414 = vector.load %arg9[%c3_218, %c0_219, %c2_220] : memref<4x20x20xf32, #tpu.memory_space<vmem>>, vector<1x18x18xf32>
    %415 = vector.shape_cast %414 : vector<1x18x18xf32> to vector<18x18xf32>
    %416 = vector.broadcast %413 : f32 to vector<18x18xf32>
    %417 = arith.mulf %416, %415 : vector<18x18xf32>
    %418 = arith.addf %412, %417 : vector<18x18xf32>
    %c31 = arith.constant 31 : index
    %419 = memref.load %arg1[%c31] : memref<72xf32, #tpu.memory_space<smem>>
    %c3_221 = arith.constant 3 : index
    %c1_222 = arith.constant 1 : index
    %c0_223 = arith.constant 0 : index
    %420 = vector.load %arg9[%c3_221, %c1_222, %c0_223] : memref<4x20x20xf32, #tpu.memory_space<vmem>>, vector<1x18x18xf32>
    %421 = vector.shape_cast %420 : vector<1x18x18xf32> to vector<18x18xf32>
    %422 = vector.broadcast %419 : f32 to vector<18x18xf32>
    %423 = arith.mulf %422, %421 : vector<18x18xf32>
    %424 = arith.addf %418, %423 : vector<18x18xf32>
    %c39 = arith.constant 39 : index
    %425 = memref.load %arg1[%c39] : memref<72xf32, #tpu.memory_space<smem>>
    %c3_224 = arith.constant 3 : index
    %c1_225 = arith.constant 1 : index
    %c1_226 = arith.constant 1 : index
    %426 = vector.load %arg9[%c3_224, %c1_225, %c1_226] : memref<4x20x20xf32, #tpu.memory_space<vmem>>, vector<1x18x18xf32>
    %427 = vector.shape_cast %426 : vector<1x18x18xf32> to vector<18x18xf32>
    %428 = vector.broadcast %425 : f32 to vector<18x18xf32>
    %429 = arith.mulf %428, %427 : vector<18x18xf32>
    %430 = arith.addf %424, %429 : vector<18x18xf32>
    %c47 = arith.constant 47 : index
    %431 = memref.load %arg1[%c47] : memref<72xf32, #tpu.memory_space<smem>>
    %c3_227 = arith.constant 3 : index
    %c1_228 = arith.constant 1 : index
    %c2_229 = arith.constant 2 : index
    %432 = vector.load %arg9[%c3_227, %c1_228, %c2_229] : memref<4x20x20xf32, #tpu.memory_space<vmem>>, vector<1x18x18xf32>
    %433 = vector.shape_cast %432 : vector<1x18x18xf32> to vector<18x18xf32>
    %434 = vector.broadcast %431 : f32 to vector<18x18xf32>
    %435 = arith.mulf %434, %433 : vector<18x18xf32>
    %436 = arith.addf %430, %435 : vector<18x18xf32>
    %c55 = arith.constant 55 : index
    %437 = memref.load %arg1[%c55] : memref<72xf32, #tpu.memory_space<smem>>
    %c3_230 = arith.constant 3 : index
    %c2_231 = arith.constant 2 : index
    %c0_232 = arith.constant 0 : index
    %438 = vector.load %arg9[%c3_230, %c2_231, %c0_232] : memref<4x20x20xf32, #tpu.memory_space<vmem>>, vector<1x18x18xf32>
    %439 = vector.shape_cast %438 : vector<1x18x18xf32> to vector<18x18xf32>
    %440 = vector.broadcast %437 : f32 to vector<18x18xf32>
    %441 = arith.mulf %440, %439 : vector<18x18xf32>
    %442 = arith.addf %436, %441 : vector<18x18xf32>
    %c63 = arith.constant 63 : index
    %443 = memref.load %arg1[%c63] : memref<72xf32, #tpu.memory_space<smem>>
    %c3_233 = arith.constant 3 : index
    %c2_234 = arith.constant 2 : index
    %c1_235 = arith.constant 1 : index
    %444 = vector.load %arg9[%c3_233, %c2_234, %c1_235] : memref<4x20x20xf32, #tpu.memory_space<vmem>>, vector<1x18x18xf32>
    %445 = vector.shape_cast %444 : vector<1x18x18xf32> to vector<18x18xf32>
    %446 = vector.broadcast %443 : f32 to vector<18x18xf32>
    %447 = arith.mulf %446, %445 : vector<18x18xf32>
    %448 = arith.addf %442, %447 : vector<18x18xf32>
    %c71 = arith.constant 71 : index
    %449 = memref.load %arg1[%c71] : memref<72xf32, #tpu.memory_space<smem>>
    %c3_236 = arith.constant 3 : index
    %c2_237 = arith.constant 2 : index
    %c2_238 = arith.constant 2 : index
    %450 = vector.load %arg9[%c3_236, %c2_237, %c2_238] : memref<4x20x20xf32, #tpu.memory_space<vmem>>, vector<1x18x18xf32>
    %451 = vector.shape_cast %450 : vector<1x18x18xf32> to vector<18x18xf32>
    %452 = vector.broadcast %449 : f32 to vector<18x18xf32>
    %453 = arith.mulf %452, %451 : vector<18x18xf32>
    %454 = arith.addf %448, %453 : vector<18x18xf32>
    %c1_239 = arith.constant 1 : index
    %455 = memref.load %arg2[%c1_239] : memref<2xf32, #tpu.memory_space<smem>>
    %456 = vector.broadcast %455 : f32 to vector<18x18xf32>
    %457 = arith.mulf %454, %456 : vector<18x18xf32>
    %c1_240 = arith.constant 1 : index
    %458 = memref.load %arg3[%c1_240] : memref<2xf32, #tpu.memory_space<smem>>
    %459 = vector.broadcast %458 : f32 to vector<18x18xf32>
    %460 = arith.addf %457, %459 : vector<18x18xf32>
    %cst_241 = arith.constant 0.000000e+00 : f32
    %461 = vector.broadcast %cst_241 : f32 to vector<18x18xf32>
    %462 = arith.cmpf ogt, %460, %461 : vector<18x18xf32>
    %cst_242 = arith.constant 0.00999999977 : f32
    %463 = vector.broadcast %cst_242 : f32 to vector<18x18xf32>
    %464 = arith.mulf %463, %460 : vector<18x18xf32>
    %465 = arith.select %462, %460, %464 : vector<18x18xi1>, vector<18x18xf32>
    %c1_243 = arith.constant 1 : index
    %c2_244 = arith.constant 2 : index
    %c2_245 = arith.constant 2 : index
    %466 = vector.load %arg10[%c1_243, %c2_244, %c2_245] : memref<2x22x22xf32, #tpu.memory_space<vmem>>, vector<1x18x18xf32>
    %467 = vector.shape_cast %466 : vector<1x18x18xf32> to vector<18x18xf32>
    %468 = vector.shape_cast %465 : vector<18x18xf32> to vector<1x18x18xf32>
    tpu.vector_store %arg10[%c1_243, %c2_244, %c2_245], %468 {strides = array<i32>} : memref<2x22x22xf32, #tpu.memory_space<vmem>>, vector<1x18x18xf32>,
    %cst_246 = arith.constant 0.000000e+00 : f32
    %469 = vector.broadcast %cst_246 : f32 to vector<20x20xf32>
    %c0_247 = arith.constant 0 : index
    %470 = memref.load %arg4[%c0_247] : memref<18xf32, #tpu.memory_space<smem>>
    %c0_248 = arith.constant 0 : index
    %c0_249 = arith.constant 0 : index
    %c0_250 = arith.constant 0 : index
    %471 = vector.load %arg10[%c0_248, %c0_249, %c0_250] : memref<2x22x22xf32, #tpu.memory_space<vmem>>, vector<1x20x20xf32>
    %472 = vector.shape_cast %471 : vector<1x20x20xf32> to vector<20x20xf32>
    %473 = vector.broadcast %470 : f32 to vector<20x20xf32>
    %474 = arith.mulf %473, %472 : vector<20x20xf32>
    %475 = arith.addf %469, %474 : vector<20x20xf32>
    %c2_251 = arith.constant 2 : index
    %476 = memref.load %arg4[%c2_251] : memref<18xf32, #tpu.memory_space<smem>>
    %c0_252 = arith.constant 0 : index
    %c0_253 = arith.constant 0 : index
    %c1_254 = arith.constant 1 : index
    %477 = vector.load %arg10[%c0_252, %c0_253, %c1_254] : memref<2x22x22xf32, #tpu.memory_space<vmem>>, vector<1x20x20xf32>
    %478 = vector.shape_cast %477 : vector<1x20x20xf32> to vector<20x20xf32>
    %479 = vector.broadcast %476 : f32 to vector<20x20xf32>
    %480 = arith.mulf %479, %478 : vector<20x20xf32>
    %481 = arith.addf %475, %480 : vector<20x20xf32>
    %c4_255 = arith.constant 4 : index
    %482 = memref.load %arg4[%c4_255] : memref<18xf32, #tpu.memory_space<smem>>
    %c0_256 = arith.constant 0 : index
    %c0_257 = arith.constant 0 : index
    %c2_258 = arith.constant 2 : index
    %483 = vector.load %arg10[%c0_256, %c0_257, %c2_258] : memref<2x22x22xf32, #tpu.memory_space<vmem>>, vector<1x20x20xf32>
    %484 = vector.shape_cast %483 : vector<1x20x20xf32> to vector<20x20xf32>
    %485 = vector.broadcast %482 : f32 to vector<20x20xf32>
    %486 = arith.mulf %485, %484 : vector<20x20xf32>
    %487 = arith.addf %481, %486 : vector<20x20xf32>
    %c6_259 = arith.constant 6 : index
    %488 = memref.load %arg4[%c6_259] : memref<18xf32, #tpu.memory_space<smem>>
    %c0_260 = arith.constant 0 : index
    %c1_261 = arith.constant 1 : index
    %c0_262 = arith.constant 0 : index
    %489 = vector.load %arg10[%c0_260, %c1_261, %c0_262] : memref<2x22x22xf32, #tpu.memory_space<vmem>>, vector<1x20x20xf32>
    %490 = vector.shape_cast %489 : vector<1x20x20xf32> to vector<20x20xf32>
    %491 = vector.broadcast %488 : f32 to vector<20x20xf32>
    %492 = arith.mulf %491, %490 : vector<20x20xf32>
    %493 = arith.addf %487, %492 : vector<20x20xf32>
    %c8_263 = arith.constant 8 : index
    %494 = memref.load %arg4[%c8_263] : memref<18xf32, #tpu.memory_space<smem>>
    %c0_264 = arith.constant 0 : index
    %c1_265 = arith.constant 1 : index
    %c1_266 = arith.constant 1 : index
    %495 = vector.load %arg10[%c0_264, %c1_265, %c1_266] : memref<2x22x22xf32, #tpu.memory_space<vmem>>, vector<1x20x20xf32>
    %496 = vector.shape_cast %495 : vector<1x20x20xf32> to vector<20x20xf32>
    %497 = vector.broadcast %494 : f32 to vector<20x20xf32>
    %498 = arith.mulf %497, %496 : vector<20x20xf32>
    %499 = arith.addf %493, %498 : vector<20x20xf32>
    %c10_267 = arith.constant 10 : index
    %500 = memref.load %arg4[%c10_267] : memref<18xf32, #tpu.memory_space<smem>>
    %c0_268 = arith.constant 0 : index
    %c1_269 = arith.constant 1 : index
    %c2_270 = arith.constant 2 : index
    %501 = vector.load %arg10[%c0_268, %c1_269, %c2_270] : memref<2x22x22xf32, #tpu.memory_space<vmem>>, vector<1x20x20xf32>
    %502 = vector.shape_cast %501 : vector<1x20x20xf32> to vector<20x20xf32>
    %503 = vector.broadcast %500 : f32 to vector<20x20xf32>
    %504 = arith.mulf %503, %502 : vector<20x20xf32>
    %505 = arith.addf %499, %504 : vector<20x20xf32>
    %c12_271 = arith.constant 12 : index
    %506 = memref.load %arg4[%c12_271] : memref<18xf32, #tpu.memory_space<smem>>
    %c0_272 = arith.constant 0 : index
    %c2_273 = arith.constant 2 : index
    %c0_274 = arith.constant 0 : index
    %507 = vector.load %arg10[%c0_272, %c2_273, %c0_274] : memref<2x22x22xf32, #tpu.memory_space<vmem>>, vector<1x20x20xf32>
    %508 = vector.shape_cast %507 : vector<1x20x20xf32> to vector<20x20xf32>
    %509 = vector.broadcast %506 : f32 to vector<20x20xf32>
    %510 = arith.mulf %509, %508 : vector<20x20xf32>
    %511 = arith.addf %505, %510 : vector<20x20xf32>
    %c14_275 = arith.constant 14 : index
    %512 = memref.load %arg4[%c14_275] : memref<18xf32, #tpu.memory_space<smem>>
    %c0_276 = arith.constant 0 : index
    %c2_277 = arith.constant 2 : index
    %c1_278 = arith.constant 1 : index
    %513 = vector.load %arg10[%c0_276, %c2_277, %c1_278] : memref<2x22x22xf32, #tpu.memory_space<vmem>>, vector<1x20x20xf32>
    %514 = vector.shape_cast %513 : vector<1x20x20xf32> to vector<20x20xf32>
    %515 = vector.broadcast %512 : f32 to vector<20x20xf32>
    %516 = arith.mulf %515, %514 : vector<20x20xf32>
    %517 = arith.addf %511, %516 : vector<20x20xf32>
    %c16_279 = arith.constant 16 : index
    %518 = memref.load %arg4[%c16_279] : memref<18xf32, #tpu.memory_space<smem>>
    %c0_280 = arith.constant 0 : index
    %c2_281 = arith.constant 2 : index
    %c2_282 = arith.constant 2 : index
    %519 = vector.load %arg10[%c0_280, %c2_281, %c2_282] : memref<2x22x22xf32, #tpu.memory_space<vmem>>, vector<1x20x20xf32>
    %520 = vector.shape_cast %519 : vector<1x20x20xf32> to vector<20x20xf32>
    %521 = vector.broadcast %518 : f32 to vector<20x20xf32>
    %522 = arith.mulf %521, %520 : vector<20x20xf32>
    %523 = arith.addf %517, %522 : vector<20x20xf32>
    %c1_283 = arith.constant 1 : index
    %524 = memref.load %arg4[%c1_283] : memref<18xf32, #tpu.memory_space<smem>>
    %c1_284 = arith.constant 1 : index
    %c0_285 = arith.constant 0 : index
    %c0_286 = arith.constant 0 : index
    %525 = vector.load %arg10[%c1_284, %c0_285, %c0_286] : memref<2x22x22xf32, #tpu.memory_space<vmem>>, vector<1x20x20xf32>
    %526 = vector.shape_cast %525 : vector<1x20x20xf32> to vector<20x20xf32>
    %527 = vector.broadcast %524 : f32 to vector<20x20xf32>
    %528 = arith.mulf %527, %526 : vector<20x20xf32>
    %529 = arith.addf %523, %528 : vector<20x20xf32>
    %c3_287 = arith.constant 3 : index
    %530 = memref.load %arg4[%c3_287] : memref<18xf32, #tpu.memory_space<smem>>
    %c1_288 = arith.constant 1 : index
    %c0_289 = arith.constant 0 : index
    %c1_290 = arith.constant 1 : index
    %531 = vector.load %arg10[%c1_288, %c0_289, %c1_290] : memref<2x22x22xf32, #tpu.memory_space<vmem>>, vector<1x20x20xf32>
    %532 = vector.shape_cast %531 : vector<1x20x20xf32> to vector<20x20xf32>
    %533 = vector.broadcast %530 : f32 to vector<20x20xf32>
    %534 = arith.mulf %533, %532 : vector<20x20xf32>
    %535 = arith.addf %529, %534 : vector<20x20xf32>
    %c5_291 = arith.constant 5 : index
    %536 = memref.load %arg4[%c5_291] : memref<18xf32, #tpu.memory_space<smem>>
    %c1_292 = arith.constant 1 : index
    %c0_293 = arith.constant 0 : index
    %c2_294 = arith.constant 2 : index
    %537 = vector.load %arg10[%c1_292, %c0_293, %c2_294] : memref<2x22x22xf32, #tpu.memory_space<vmem>>, vector<1x20x20xf32>
    %538 = vector.shape_cast %537 : vector<1x20x20xf32> to vector<20x20xf32>
    %539 = vector.broadcast %536 : f32 to vector<20x20xf32>
    %540 = arith.mulf %539, %538 : vector<20x20xf32>
    %541 = arith.addf %535, %540 : vector<20x20xf32>
    %c7_295 = arith.constant 7 : index
    %542 = memref.load %arg4[%c7_295] : memref<18xf32, #tpu.memory_space<smem>>
    %c1_296 = arith.constant 1 : index
    %c1_297 = arith.constant 1 : index
    %c0_298 = arith.constant 0 : index
    %543 = vector.load %arg10[%c1_296, %c1_297, %c0_298] : memref<2x22x22xf32, #tpu.memory_space<vmem>>, vector<1x20x20xf32>
    %544 = vector.shape_cast %543 : vector<1x20x20xf32> to vector<20x20xf32>
    %545 = vector.broadcast %542 : f32 to vector<20x20xf32>
    %546 = arith.mulf %545, %544 : vector<20x20xf32>
    %547 = arith.addf %541, %546 : vector<20x20xf32>
    %c9_299 = arith.constant 9 : index
    %548 = memref.load %arg4[%c9_299] : memref<18xf32, #tpu.memory_space<smem>>
    %c1_300 = arith.constant 1 : index
    %c1_301 = arith.constant 1 : index
    %c1_302 = arith.constant 1 : index
    %549 = vector.load %arg10[%c1_300, %c1_301, %c1_302] : memref<2x22x22xf32, #tpu.memory_space<vmem>>, vector<1x20x20xf32>
    %550 = vector.shape_cast %549 : vector<1x20x20xf32> to vector<20x20xf32>
    %551 = vector.broadcast %548 : f32 to vector<20x20xf32>
    %552 = arith.mulf %551, %550 : vector<20x20xf32>
    %553 = arith.addf %547, %552 : vector<20x20xf32>
    %c11_303 = arith.constant 11 : index
    %554 = memref.load %arg4[%c11_303] : memref<18xf32, #tpu.memory_space<smem>>
    %c1_304 = arith.constant 1 : index
    %c1_305 = arith.constant 1 : index
    %c2_306 = arith.constant 2 : index
    %555 = vector.load %arg10[%c1_304, %c1_305, %c2_306] : memref<2x22x22xf32, #tpu.memory_space<vmem>>, vector<1x20x20xf32>
    %556 = vector.shape_cast %555 : vector<1x20x20xf32> to vector<20x20xf32>
    %557 = vector.broadcast %554 : f32 to vector<20x20xf32>
    %558 = arith.mulf %557, %556 : vector<20x20xf32>
    %559 = arith.addf %553, %558 : vector<20x20xf32>
    %c13_307 = arith.constant 13 : index
    %560 = memref.load %arg4[%c13_307] : memref<18xf32, #tpu.memory_space<smem>>
    %c1_308 = arith.constant 1 : index
    %c2_309 = arith.constant 2 : index
    %c0_310 = arith.constant 0 : index
    %561 = vector.load %arg10[%c1_308, %c2_309, %c0_310] : memref<2x22x22xf32, #tpu.memory_space<vmem>>, vector<1x20x20xf32>
    %562 = vector.shape_cast %561 : vector<1x20x20xf32> to vector<20x20xf32>
    %563 = vector.broadcast %560 : f32 to vector<20x20xf32>
    %564 = arith.mulf %563, %562 : vector<20x20xf32>
    %565 = arith.addf %559, %564 : vector<20x20xf32>
    %c15_311 = arith.constant 15 : index
    %566 = memref.load %arg4[%c15_311] : memref<18xf32, #tpu.memory_space<smem>>
    %c1_312 = arith.constant 1 : index
    %c2_313 = arith.constant 2 : index
    %c1_314 = arith.constant 1 : index
    %567 = vector.load %arg10[%c1_312, %c2_313, %c1_314] : memref<2x22x22xf32, #tpu.memory_space<vmem>>, vector<1x20x20xf32>
    %568 = vector.shape_cast %567 : vector<1x20x20xf32> to vector<20x20xf32>
    %569 = vector.broadcast %566 : f32 to vector<20x20xf32>
    %570 = arith.mulf %569, %568 : vector<20x20xf32>
    %571 = arith.addf %565, %570 : vector<20x20xf32>
    %c17_315 = arith.constant 17 : index
    %572 = memref.load %arg4[%c17_315] : memref<18xf32, #tpu.memory_space<smem>>
    %c1_316 = arith.constant 1 : index
    %c2_317 = arith.constant 2 : index
    %c2_318 = arith.constant 2 : index
    %573 = vector.load %arg10[%c1_316, %c2_317, %c2_318] : memref<2x22x22xf32, #tpu.memory_space<vmem>>, vector<1x20x20xf32>
    %574 = vector.shape_cast %573 : vector<1x20x20xf32> to vector<20x20xf32>
    %575 = vector.broadcast %572 : f32 to vector<20x20xf32>
    %576 = arith.mulf %575, %574 : vector<20x20xf32>
    %577 = arith.addf %571, %576 : vector<20x20xf32>
    %c0_319 = arith.constant 0 : index
    %578 = memref.load %arg5[%c0_319] : memref<1xf32, #tpu.memory_space<smem>>
    %579 = vector.broadcast %578 : f32 to vector<20x20xf32>
    %580 = arith.mulf %577, %579 : vector<20x20xf32>
    %c0_320 = arith.constant 0 : index
    %581 = memref.load %arg6[%c0_320] : memref<1xf32, #tpu.memory_space<smem>>
    %582 = vector.broadcast %581 : f32 to vector<20x20xf32>
    %583 = arith.addf %580, %582 : vector<20x20xf32>
    %cst_321 = arith.constant 0.000000e+00 : f32
    %584 = vector.broadcast %cst_321 : f32 to vector<20x20xf32>
    %585 = arith.cmpf ogt, %583, %584 : vector<20x20xf32>
    %cst_322 = arith.constant 0.00999999977 : f32
    %586 = vector.broadcast %cst_322 : f32 to vector<20x20xf32>
    %587 = arith.mulf %586, %583 : vector<20x20xf32>
    %588 = arith.select %585, %583, %587 : vector<20x20xi1>, vector<20x20xf32>
    %c0_323 = arith.constant 0 : index
    %c0_324 = arith.constant 0 : index
    %c0_325 = arith.constant 0 : index
    %c0_326 = arith.constant 0 : index
    %589 = vector.load %arg8[%c0_323, %c0_324, %c0_325, %c0_326] : memref<1x1x20x20xf32, #tpu.memory_space<vmem>>, vector<1x1x20x20xf32>
    %590 = vector.shape_cast %589 : vector<1x1x20x20xf32> to vector<20x20xf32>
    %591 = vector.shape_cast %588 : vector<20x20xf32> to vector<1x1x20x20xf32>
    tpu.vector_store %arg8[%c0_323, %c0_324, %c0_325, %c0_326], %591 {strides = array<i32>} : memref<1x1x20x20xf32, #tpu.memory_space<vmem>>, vector<1x1x20x20xf32>,
    return
  }
  func.func @transform_0(%arg0: i32) -> i32 {
    %c0_i32 = arith.constant 0 : i32
    %c0_i32_0 = arith.constant 0 : i32
    return %c0_i32 : i32
  }
  func.func @transform_1(%arg0: i32) -> i32 {
    %c0_i32 = arith.constant 0 : i32
    %c0_i32_0 = arith.constant 0 : i32
    return %c0_i32 : i32
  }
  func.func @transform_2(%arg0: i32) -> i32 {
    %c0_i32 = arith.constant 0 : i32
    %c0_i32_0 = arith.constant 0 : i32
    return %c0_i32 : i32
  }
  func.func @transform_3(%arg0: i32) -> i32 {
    %c0_i32 = arith.constant 0 : i32
    %c0_i32_0 = arith.constant 0 : i32
    return %c0_i32 : i32
  }
  func.func @transform_4(%arg0: i32) -> i32 {
    %c0_i32 = arith.constant 0 : i32
    %c0_i32_0 = arith.constant 0 : i32
    return %c0_i32 : i32
  }
  func.func @transform_5(%arg0: i32) -> i32 {
    %c0_i32 = arith.constant 0 : i32
    %c0_i32_0 = arith.constant 0 : i32
    return %c0_i32 : i32
  }
  func.func @transform_6(%arg0: i32) -> (i32, i32, i32, i32) {
    %c0_i32 = arith.constant 0 : i32
    %c0_i32_0 = arith.constant 0 : i32
    %c0_i32_1 = arith.constant 0 : i32
    %c0_i32_2 = arith.constant 0 : i32
    return %arg0, %c0_i32, %c0_i32_0, %c0_i32_1 : i32, i32, i32, i32
  }
  func.func @transform_7(%arg0: i32) -> (i32, i32, i32, i32) {
    %c0_i32 = arith.constant 0 : i32
    %c0_i32_0 = arith.constant 0 : i32
    %c0_i32_1 = arith.constant 0 : i32
    %c0_i32_2 = arith.constant 0 : i32
    return %arg0, %c0_i32, %c0_i32_0, %c0_i32_1 : i32, i32, i32, i32
  }
}

</mosaic_0001>

<bundles_post_ra>
// kernel: tpu_custom_call.1
= control target key start
LH: loop header
LB: loop body
LE: loop exit
PB: predicated region body
PF: predicated region fallthrough
CT: control target
= control target key end

     0   :  { %s3729_s0 = inlined_call_operand.vmem [shape: f32[72], index: 0, kind: input, shape index: {}]   ;;  %s3730_s1 = inlined_call_operand.vmem [shape: f32[2], index: 1, kind: input, shape index: {}]   ;;  %s3731_s2 = inlined_call_operand.vmem [shape: f32[2], index: 2, kind: input, shape index: {}]   ;;  %s3732_s3 = inlined_call_operand.vmem [shape: f32[18], index: 3, kind: input, shape index: {}]   ;;  %s3733_s4 = inlined_call_operand.<no memory space> [shape: f32[1], index: 4, kind: input, shape index: {}]   ;;  %s3734_s5 = inlined_call_operand.<no memory space> [shape: f32[1], index: 5, kind: input, shape index: {}]   ;;  %s3735_s6 = inlined_call_operand.hbm [shape: f32[2,4,16,16], index: 6, kind: input, shape index: {}]   ;;  %s3736_s7 = inlined_call_operand.vmem [shape: f32[2,1,20,20], index: 7, kind: output, shape index: {}]  }
   0x1   :  { %12 = sst [smem:[#allocation4]] %s3733_s4 }
   0x2   :  { %13 = sst [smem:[#allocation5]] %s3734_s5 }
   0x3   :  { %14 = vsyncpa [#allocation8], 0 }
   0x4   :  { %15 = vsyncpa [#allocation10], 0 }
   0x5   :  { %16 = vsyncpa [#allocation13], 0 }
   0x6   :  { %17 = vsyncpa [#allocation7], 0 }
   0x7   :  { %19 = vsyncpa [#allocation7 + $0x1], 0  ;;  %s2569_s28 = smov 0   ;;  %s2571_s29 = smov 0  }
   0x8   :  { %s2573_s30 = smov 0   ;;  %s2575_s8 = smov 0  }
   0x9 LB: > { %s2588_s4 = sadd.s32 4294967295, %s2511_s8   ;;  %p171_p0 = scmp.ne.s32.totalorder %s2503_s29, %s2499_s28  ;;  %s2511_s8 = sphi %s2575_s8, %s3743_s8   ;;  %s2507_s30 = sphi %s2573_s30, %s3742_s30   ;;  %s2503_s29 = sphi %s2571_s29, %s3741_s29   ;;  %s2499_s28 = sphi %s2569_s28, %s3740_s28  }
   0xa   : > { %p172_p1 = scmp.eq.s32.totalorder %s2588_s4, 0  ;;  %p2161_p2 = scmp.ge.s32.totalorder %s2511_s8, 1 }
   0xb   : > { %p208_p3 = scmp.lt.s32.totalorder %s2511_s8, 3  ;;  %s230_s11 = sshll.u32 %s3730_s1, 4  ;;  %s231_s11 = int_to_ptr.vmem [resolvable:$true] %s230_s11 }
   0xc   : > { %p2596_p4 = por %p172_p1, %p171_p0  ;;  %s220_s15 = sshll.u32 %s3729_s0, 4  ;;  %s221_s15 = int_to_ptr.vmem [resolvable:$true] %s220_s15 }
   0xd   : > { %p2603_p5 = pnand %p2161_p2, %p208_p3  ;;  %s240_s18 = sshll.u32 %s3731_s2, 4  ;;  %s241_s18 = int_to_ptr.vmem [resolvable:$true] %s240_s18 }
   0xe   : > { %s250_s21 = sshll.u32 %s3732_s3, 4  ;;  %s2513_s22 = smov [#allocation9]   ;;  %s251_s21 = int_to_ptr.vmem [resolvable:$true] %s250_s21 }
   0xf   : > { %p2289_p6 = pneg %p2603_p5  ;;  %s2514_s23 = smov [#allocation6]  }
  0x10   : > { %s2515_s24 = smov [#allocation11]   ;;  %s2516_s25 = smov [#allocation12]  }
  0x11   : > { %p2290_p7 = pnand %p2289_p6, %p172_p1  ;;  %s2621_s26 = sadd.s32 1, %s2511_s8  }
  0x12   : > { %s155_s27 = ssub.s32 %s2511_s8, %s2621_s26  ;;  %s158_s28 = sadd.s32 1, %s2507_s30 }
  0x13   : > { %2295 = dma.vmem_to_smem (!%p2290_p7), %s231_s11, 16, %s2513_s22, [#allocation10]  }
  0x14   : > { %2292 = dma.vmem_to_smem (!%p2290_p7), %s221_s15, 16, %s2514_s23, [#allocation8]  }
  0x15   : > { %2298 = dma.vmem_to_smem (!%p2290_p7), %s241_s18, 16, %s2515_s24, [#allocation10]  }
  0x16   : > { %2301 = dma.vmem_to_smem (!%p2290_p7), %s251_s21, 16, %s2516_s25, [#allocation13]  }
  0x17   : > { %p156_p8 = scmp.eq.s32.totalorder %s155_s27, 0  ;;  %p165_p9 = scmp.ne.s32.totalorder %s2507_s30, %s2503_s29 }
  0x18   : > { %p166_p10 = scmp.eq.s32.totalorder %s2511_s8, 0  ;;  %p2310_p12 = scmp.lt.s32.totalorder %s2511_s8, 2 }
  0x19   : > { %s2630_s9 = scalar_select %p156_p8, %s2507_s30, %s158_s28  }
  0x1a   : > { %p167_p11 = por %p166_p10, %p165_p9  ;;  %s267_s10 = sand.u32 1, %s2507_s30  }
  0x1b   : > { %s2269_s11 = sshll.u32 %s2511_s8, 6  ;;  %s2167_s13 = sshll.u32 %s267_s10, 6 }
  0x1c   : > { %s276_s16 = scalar_lea.hbm %s3735_s6, %s2269_s11  ;;  %s271_s18 = scalar_lea.vmem [#allocation14], %s2167_s13 }
  0x1d   : > { %s277_s17 = sshll.u32 %s276_s16, 4  ;;  %s279_s19 = sshll.u32 %s271_s18, 4  ;;  %s278_s17 = int_to_ptr.hbm [resolvable:$true] %s277_s17  ;;  %s280_s19 = int_to_ptr.vmem [resolvable:$true] %s279_s19 }
  0x1e   : > { %p2638_p13 = pnand %p2310_p12, %p167_p11  ;;  %s268_s21 = scalar_lea.sflag [#allocation7], %s267_s10 }
  0x1f   : > { %s2435_s22 = sshra.s32 %s278_s17, 4  ;;  %s2442_s25 = scalar_lea.hbm %s3735_s6, 128  ;;  %s2436_s22 = int_to_ptr.hbm [resolvable:$true] %s2435_s22 }
  0x20   : > { %s2437_s23 = scalar_lea.hbm %s2436_s22, 64  ;;  %p2439_p2 = pneg %p2638_p13 }
  0x21   : > { %p2438_p0 = scmp.ne.s32.totalorder %s2436_s22, %s2437_s23  ;;  %p2443_p7 = scmp.lt.s32.totalorder %s2436_s22, %s3735_s6 }
  0x22   : > { %p2444_p8 = scmp.lt.s32.totalorder %s2442_s25, %s2437_s23 }
  0x23   : > { %p2440_p3 = pnand %p2439_p2, %p2438_p0 }
  0x24   : > { %p2445_p9 = por %p2444_p8, %p2443_p7 }
  0x25   : > { %p2441_p6 = pneg %p2440_p3 }
  0x27   : > { %p2446_p10 = pnand %p2445_p9, %p2441_p6 }
  0x29   : > { %2449 = shalt.err (!%p2446_p10)
}
  0x2a   : > { %s2517_s10 = smov 128   ;;  %s2518_s11 = smov 8  }
  0x2b   : > { %2305 = dma.hbm_to_vmem [thread:$0]  (!%p2638_p13), %s278_s17, 1024, %s280_s19, %s268_s21, %s2517_s10, %s2517_s10, %s2518_s11  }
  0x2c   : > { %291 = sbr.rel (%p2603_p5) target bundleno = 1013 (0x3f5), region = 48 }
  0x31   : > { %2482 = dma.done.wait (%p172_p1), [#allocation8], 16  }
  0x32   : > { %2484 = vsyncadd (%p172_p1), [#allocation8], 4294967280 }
  0x33   : > { %2486 = dma.done.wait (%p172_p1), [#allocation10], 32  }
  0x34   : > { %2488 = vsyncadd (%p172_p1), [#allocation10], 4294967264 }
  0x35   : > { %2490 = dma.done.wait (%p172_p1), [#allocation13], 16  }
  0x36   : > { %2492 = vsyncadd (%p172_p1), [#allocation13], 4294967280  ;;  %s313_s12 = sand.u32 1, %s2503_s29  }
  0x37   : > { %s2175_s13 = sshll.u32 %s313_s12, 6  ;;  %s314_s14 = scalar_lea.sflag [#allocation7], %s313_s12 }
  0x38   : > { %s2667_s15 = scalar_lea.vmem [#allocation14], %s2175_s13 }
  0x39   : > { %2494 = dma.done.wait (%p2596_p4), %s314_s14, 1024  }
  0x3a   : > { %2496 = vsyncadd (%p2596_p4), %s314_s14, 4294966272 }
  0x3b   : > { %323 = sfence }
  0x3c   : > { %v369_v0 = vld [vmem:[%s2667_s15] sm:$0xff]  ;;  %v371_v1 = vld [vmem:[%s2667_s15 + $0x10] sm:$0xff]  ;;  %vm358_vm0 = vcmask 158720   ;;  %s2519_s16 = smov 2   ;;  %v2520_v3 = vmov 0.0   ;;  %v370_v4 = vld [vmem:[%s2667_s15 + $0x8] sm:$0xff] }
  0x3d   : > { %385 = vrot.lane.b32.xlu0 %v369_v0, %s2519_s16  ;;  %389 = vrot.lane.b32.xlu1 %v371_v1, %s2519_s16  ;;  %v373_v2 = vld [vmem:[%s2667_s15 + $0x20] sm:$0xff]  ;;  %359 = vst.msk [vmem:[#allocation2 + $0x10] sm:$0xf] %vm358_vm0, %v2520_v3  ;;  %v372_v5 = vld [vmem:[%s2667_s15 + $0x18] sm:$0xff]  ;;  %s2183_s5 = sld [smem:[#allocation6 + $0x38]]  ;;  %s2521_s18 = smov 127  }
  0x3e   : > { %393 = vrot.lane.b32.xlu2 %v373_v2, %s2519_s16  ;;  %362 = vst.msk [vmem:[#allocation2 + $0x28] sm:$0xf] %vm358_vm0, %v2520_v3  ;;  %v374_v6 = vld [vmem:[%s2667_s15 + $0x28] sm:$0xff]  ;;  %v376_v7 = vld [vmem:[%s2667_s15 + $0x38] sm:$0xff]  ;;  %s2184_s17 = sld [smem:[#allocation6 + $0x40]]  ;;  %s2522_s19 = smov 126  }
  0x3f   : > { %365 = vst.msk [vmem:[#allocation2 + $0x40] sm:$0xf] %vm358_vm0, %v2520_v3  ;;  %s2192_s20 = sld [smem:[#allocation6 + $0x3a]]  ;;  %vm355_vm1 = vcmask 162816   ;;  %v375_v17 = vld [vmem:[%s2667_s15 + $0x30] sm:$0xff]  ;;  %vm409_vm2 = vcmask 146448  }
  0x40   : > { %368 = vst.msk [vmem:[#allocation2 + $0x58] sm:$0xf] %vm358_vm0, %v2520_v3  ;;  %s2193_s21 = sld [smem:[#allocation6 + $0x42]]  ;;  %vm418_vm6 = vcmask 179200   ;;  %vm421_vm7 = vcmask 177152   ;;  %vm1072_vm8 = vcmask 162832  }
  0x41   : > { %356 = vst.msk [vmem:[#allocation2] sm:$0xff] %vm355_vm1, %v2520_v3  ;;  %s2177_s22 = sld [smem:[#allocation6 + $0x8]]  ;;  %vm1075_vm9 = vcmask 156688   ;;  %p350_p1 = scmp.lt.s32.totalorder %s2588_s4, 1 }
  0x42   : > { %357 = vst.msk [vmem:[#allocation2 + $0x8] sm:$0xff] %vm355_vm1, %v2520_v3  ;;  %s2178_s23 = sld [smem:[#allocation6 + $0x10]] }
  0x43   : > { %v2697_v9 = vstv %s2183_s5  ;;  %360 = vst.msk [vmem:[#allocation2 + $0x18] sm:$0xff] %vm355_vm1, %v2520_v3  ;;  %s2180_s8 = sld [smem:[#allocation6 + $0x20]]  ;;  %s3745_s4 = smov (!%p350_p1, %s2588_s4), 1 }
  0x44   : > { %v2695_v8 = vld [vmem:[#allocation2 + $0x12] sm:$0x3]  ;;  %v2702_v11 = vstv %s2184_s17  ;;  %361 = vst.msk [vmem:[#allocation2 + $0x20] sm:$0xff] %vm355_vm1, %v2520_v3  ;;  %s2181_s24 = sld [smem:[#allocation6 + $0x28]] }
  0x45   : > { %387 = vrot.lane.b32.xlu0 %v370_v4, %s2519_s16  ;;  %391 = vrot.lane.b32.xlu1 %v372_v5, %s2519_s16  ;;  %v543_v10 = vmul.f32 %v2697_v9, %v2695_v8  ;;  %v563_v12 = vmul.f32 %v2702_v11, %v2695_v8  ;;  %v2709_v13 = vld [vmem:[#allocation2 + $0x2a] sm:$0x3]  ;;  %v2711_v14 = vstv %s2192_s20  ;;  %363 = vst.msk [vmem:[#allocation2 + $0x30] sm:$0xff] %vm355_vm1, %v2520_v3  ;;  %s2186_s25 = sld [smem:[#allocation6 + $0xa]] }
  0x46   : > { %395 = vrot.lane.b32.xlu2 %v374_v6, %s2519_s16  ;;  %v697_v15 = vmul.f32 %v2711_v14, %v2709_v13  ;;  %364 = vst.msk [vmem:[#allocation2 + $0x38] sm:$0xff] %vm355_vm1, %v2520_v3  ;;  %v2730_v16 = vstv %s2193_s21  ;;  %s2187_s27 = sld [smem:[#allocation6 + $0x12]] }
  0x47   : > { %366 = vst.msk [vmem:[#allocation2 + $0x48] sm:$0xff] %vm355_vm1, %v2520_v3  ;;  %v717_v18 = vmul.f32 %v2730_v16, %v2709_v13  ;;  %v438_v21 = vstv %s2177_s22  ;;  %s2189_s28 = sld [smem:[#allocation6 + $0x22]] }
  0x48   : > { %367 = vst.msk [vmem:[#allocation2 + $0x50] sm:$0xff] %vm355_vm1, %v2520_v3  ;;  %v458_v26 = vstv %s2178_s23  ;;  %s2190_s10 = sld [smem:[#allocation6 + $0x2a]] }
  0x49   : > { %v489_v33 = vstv %s2180_s8  ;;  %s2195_s11 = sld [smem:[#allocation6 + $0xc]]  ;;  %419 = vst.msk [vmem:[#allocation3] sm:$0xff] %vm418_vm6, %v2520_v3 }
  0x4a   : > { %v509_v40 = vstv %s2181_s24  ;;  %s2196_s12 = sld [smem:[#allocation6 + $0x14]]  ;;  %420 = vst.msk [vmem:[#allocation3 + $0x8] sm:$0xff] %vm418_vm6, %v2520_v3 }
  0x4b   : > { %v592_v50 = vstv %s2186_s25  ;;  %s2198_s13 = sld [smem:[#allocation6 + $0x24]]  ;;  %423 = vst.msk [vmem:[#allocation3 + $0x18] sm:$0xff] %vm418_vm6, %v2520_v3 }
  0x4c   : > { %v612_v55 = vstv %s2187_s27  ;;  %s2199_s14 = sld [smem:[#allocation6 + $0x2c]]  ;;  %424 = vst.msk [vmem:[#allocation3 + $0x20] sm:$0xff] %vm418_vm6, %v2520_v3 }
  0x4d   : > { %399 = vrot.lane.b32.xlu1 %v376_v7, %s2519_s16  ;;  %397 = vrot.lane.b32.xlu0 %v375_v17, %s2519_s16  ;;  %v643_v62 = vstv %s2189_s28  ;;  %s426_s15 = sld [smem:[#allocation6]]  ;;  %422 = vst.msk [vmem:[#allocation3 + $0x10] sm:$0x3f] %vm421_vm7, %v2520_v3 }
  0x4e   : > { %v663_v5 = vstv %s2190_s10  ;;  %s2179_s5 = sld [smem:[#allocation6 + $0x18]]  ;;  %425 = vst.msk [vmem:[#allocation3 + $0x28] sm:$0x3f] %vm421_vm7, %v2520_v3 }
  0x4f   : > { %s2201_s17 = sld [smem:[#allocation6 + $0x3c]] }
  0x50   : > { %s2202_s20 = sld [smem:[#allocation6 + $0x44]] }
  0x51   : > { %s2182_s21 = sld [smem:[#allocation6 + $0x30]] }
  0x52   : > { %s2204_s22 = sld [smem:[#allocation6 + $0xe]] }
  0x53   : > { %s2205_s23 = sld [smem:[#allocation6 + $0x16]] }
  0x54   : > { %s2185_s8 = sld [smem:[#allocation6 + $0x2]] }
  0x55   : > { %551 = vrot.lane.b32.xlu1 %v543_v10, %s2521_s18  ;;  %s2207_s24 = sld [smem:[#allocation6 + $0x26]] }
  0x56   : > { %s2208_s25 = sld [smem:[#allocation6 + $0x2e]] }
  0x57   : > { %s2188_s27 = sld [smem:[#allocation6 + $0x1a]] }
  0x58   : > { %s2210_s28 = sld [smem:[#allocation6 + $0x3e]] }
  0x59   : > { %s2211_s10 = sld [smem:[#allocation6 + $0x46]] }
  0x5d   : > { %571 = vrot.lane.b32.xlu1 %v563_v12, %s2522_s19 }
  0x65   : > { %705 = vrot.lane.b32.xlu1 %v697_v15, %s2521_s18 }
  0x6d   : > { %725 = vrot.lane.b32.xlu1 %v717_v18, %s2522_s19 }
  0x98   : > { %v394_v37 = vpop.permute.xlu2 %393 }
  0x99   : > { %414 = vst.msk [vmem:[#allocation2 + $0x32] sm:$0xff] %vm409_vm2, %v394_v37 }
  0xa0   : > { %v396_v44 = vpop.permute.xlu2 %395 }
  0xa1   : > { %415 = vst.msk [vmem:[#allocation2 + $0x3a] sm:$0xff] %vm409_vm2, %v396_v44 }
  0xa8   : > { %v2824_v10 = vld [vmem:[#allocation2 + $0x40] sm:$0x3] }
  0xaf   : > { %v386_v19 = vpop.permute.xlu0 %385  ;;  %v390_v20 = vpop.permute.xlu1 %389 }
  0xb0   : > { %410 = vst.msk [vmem:[#allocation2 + $0x2] sm:$0xff] %vm409_vm2, %v386_v19  ;;  %v766_v19 = vstv %s2196_s12  ;;  %s2213_s12 = sld [smem:[#allocation6 + $0x9]] }
  0xb1   : > { %412 = vst.msk [vmem:[#allocation2 + $0x1a] sm:$0xff] %vm409_vm2, %v390_v20  ;;  %v769_v20 = vmul.f32 %v766_v19, %v2824_v10 }
  0xb7   : > { %v388_v22 = vpop.permute.xlu0 %387  ;;  %v2739_v23 = vld [vmem:[#allocation2] sm:$0xff]  ;;  %v392_v24 = vpop.permute.xlu1 %391 }
  0xb8   : > { %411 = vst.msk [vmem:[#allocation2 + $0xa] sm:$0xff] %vm409_vm2, %v388_v22  ;;  %v439_v25 = vmul.f32 %v438_v21, %v2739_v23  ;;  %v459_v31 = vmul.f32 %v458_v26, %v2739_v23  ;;  %v2755_v32 = vld [vmem:[#allocation2 + $0x1] sm:$0xff]  ;;  %v2796_v56 = vld [vmem:[#allocation2 + $0x18] sm:$0xff] }
  0xb9   : > { %413 = vst.msk [vmem:[#allocation2 + $0x22] sm:$0xff] %vm409_vm2, %v392_v24  ;;  %v490_v36 = vmul.f32 %v489_v33, %v2755_v32  ;;  %v510_v43 = vmul.f32 %v509_v40, %v2755_v32  ;;  %v2775_v45 = vld [vmem:[#allocation2 + $0x2] sm:$0xff]  ;;  %v593_v58 = vmul.f32 %v592_v50, %v2796_v56  ;;  %v613_v2 = vmul.f32 %v612_v55, %v2796_v56  ;;  %v2816_v4 = vld [vmem:[#allocation2 + $0x19] sm:$0xff] }
  0xba   : > { %445 = vrot.lane.b32.xlu2 %v439_v25, %s2521_s18  ;;  %v541_v48 = vmul.f32 %v2697_v9, %v2775_v45  ;;  %v561_v54 = vmul.f32 %v2702_v11, %v2775_v45  ;;  %v664_v18 = vmul.f32 %v663_v5, %v2816_v4  ;;  %v2843_v25 = vld [vmem:[#allocation2 + $0x41] sm:$0x3] }
  0xbf   : > { %v2745_v27 = vld [vmem:[#allocation2 + $0x10] sm:$0x3]  ;;  %v2747_v28 = vld [vmem:[#allocation2 + $0x8] sm:$0xff]  ;;  %v400_v61 = vpop.permute.xlu1 %399 }
  0xc0   : > { %v441_v29 = vmul.f32 %v438_v21, %v2745_v27  ;;  %v440_v30 = vmul.f32 %v438_v21, %v2747_v28  ;;  %v461_v34 = vmul.f32 %v458_v26, %v2745_v27  ;;  %v460_v35 = vmul.f32 %v458_v26, %v2747_v28  ;;  %v2764_v38 = vld [vmem:[#allocation2 + $0x11] sm:$0x3]  ;;  %v2766_v39 = vld [vmem:[#allocation2 + $0x9] sm:$0xff]  ;;  %417 = vst.msk [vmem:[#allocation2 + $0x52] sm:$0xff] %vm409_vm2, %v400_v61  ;;  %v2808_v63 = vld [vmem:[#allocation2 + $0x20] sm:$0xff] }
  0xc1   : > { %v492_v41 = vmul.f32 %v489_v33, %v2764_v38  ;;  %v491_v42 = vmul.f32 %v489_v33, %v2766_v39  ;;  %v512_v46 = vmul.f32 %v509_v40, %v2764_v38  ;;  %v511_v47 = vmul.f32 %v509_v40, %v2766_v39  ;;  %v2784_v49 = vld [vmem:[#allocation2 + $0x28] sm:$0x3]  ;;  %v2786_v51 = vld [vmem:[#allocation2 + $0xa] sm:$0xff]  ;;  %v2835_v21 = vld [vmem:[#allocation2 + $0x1a] sm:$0xff] }
  0xc2   : > { %449 = vrot.lane.b32.xlu1 %v441_v29, %s2521_s18  ;;  %447 = vrot.lane.b32.xlu0 %v440_v30, %s2521_s18  ;;  %v595_v52 = vmul.f32 %v592_v50, %v2784_v49  ;;  %v542_v53 = vmul.f32 %v2697_v9, %v2786_v51  ;;  %v615_v57 = vmul.f32 %v612_v55, %v2784_v49  ;;  %v2805_v60 = vld [vmem:[#allocation2 + $0x29] sm:$0x3]  ;;  %v2826_v12 = vld [vmem:[#allocation2 + $0x21] sm:$0xff]  ;;  %v2845_v26 = vstv %s2198_s13  ;;  %v398_v29 = vpop.permute.xlu0 %397  ;;  %v2863_v40 = vld [vmem:[#allocation2 + $0x30] sm:$0xff]  ;;  %s2214_s13 = sld [smem:[#allocation6 + $0x11]] }
  0xc3   : > { %465 = vrot.lane.b32.xlu2 %v459_v31, %s2522_s19  ;;  %v562_v59 = vmul.f32 %v2702_v11, %v2786_v51  ;;  %v646_v0 = vmul.f32 %v643_v62, %v2805_v60  ;;  %v594_v1 = vmul.f32 %v592_v50, %v2808_v63  ;;  %v666_v6 = vmul.f32 %v663_v5, %v2805_v60  ;;  %v2850_v31 = vld [vmem:[#allocation2 + $0x22] sm:$0xff] }
  0xc4   : > { %v614_v7 = vmul.f32 %v612_v55, %v2808_v63  ;;  %v644_v9 = vmul.f32 %v643_v62, %v2816_v4  ;;  %v746_v11 = vstv %s2195_s11  ;;  %v645_v17 = vmul.f32 %v643_v62, %v2826_v12  ;;  %416 = vst.msk [vmem:[#allocation2 + $0x4a] sm:$0xff] %vm409_vm2, %v398_v29  ;;  %s2191_s11 = sld [smem:[#allocation6 + $0x32]] }
  0xc5   : > { %v749_v15 = vmul.f32 %v746_v11, %v2824_v10  ;;  %v665_v22 = vmul.f32 %v663_v5, %v2826_v12  ;;  %v695_v24 = vmul.f32 %v2711_v14, %v2835_v21  ;;  %v800_v33 = vmul.f32 %v2845_v26, %v2843_v25  ;;  %v2899_v5 = vld [vmem:[#allocation2 + $0x31] sm:$0xff] }
  0xc6   : > { %v716_v44 = vmul.f32 %v2730_v16, %v2850_v31  ;;  %v767_v62 = vmul.f32 %v766_v19, %v2863_v40 }
  0xc7   : > { %v2847_v30 = vpop.permute.xlu1 %551 }
  0xca   : > { %469 = vrot.lane.b32.xlu1 %v461_v34, %s2522_s19  ;;  %467 = vrot.lane.b32.xlu0 %v460_v35, %s2522_s19  ;;  %v696_v34 = vmul.f32 %v2711_v14, %v2850_v31  ;;  %v715_v35 = vmul.f32 %v2730_v16, %v2835_v21 }
  0xcb   : > { %496 = vrot.lane.b32.xlu2 %v490_v36, %s2521_s18  ;;  %v2861_v36 = vstv %s2199_s14  ;;  %s2194_s14 = sld [smem:[#allocation6 + $0x4]] }
  0xcf   : > { %v2867_v14 = vpop.permute.xlu1 %571 }
  0xd2   : > { %500 = vrot.lane.b32.xlu1 %v492_v41, %s2521_s18  ;;  %498 = vrot.lane.b32.xlu0 %v491_v42, %s2521_s18  ;;  %v820_v41 = vmul.f32 %v2861_v36, %v2843_v25  ;;  %v430_v42 = vstv %s426_s15  ;;  %s2216_s15 = sld [smem:[#allocation6 + $0x21]] }
  0xd3   : > { %516 = vrot.lane.b32.xlu2 %v510_v43, %s2522_s19  ;;  %v747_v43 = vmul.f32 %v746_v11, %v2863_v40 }
  0xda   : > { %520 = vrot.lane.b32.xlu1 %v512_v46, %s2522_s19  ;;  %518 = vrot.lane.b32.xlu0 %v511_v47, %s2522_s19  ;;  %v431_v46 = vmul.f32 %v430_v42, %v2739_v23  ;;  %v2876_v47 = vld [vmem:[#allocation2 + $0x42] sm:$0x3] }
  0xdb   : > { %547 = vrot.lane.b32.xlu2 %v541_v48, %s2521_s18  ;;  %v2878_v48 = vstv %s2179_s5  ;;  %s2217_s5 = sld [smem:[#allocation6 + $0x29]] }
  0xe2   : > { %603 = vrot.lane.b32.xlu1 %v595_v52, %s2521_s18  ;;  %549 = vrot.lane.b32.xlu0 %v542_v53, %s2521_s18  ;;  %v2880_v53 = vstv %s2201_s17  ;;  %s2197_s17 = sld [smem:[#allocation6 + $0x1c]] }
  0xe3   : > { %567 = vrot.lane.b32.xlu2 %v561_v54, %s2522_s19  ;;  %v2882_v54 = vld [vmem:[#allocation2 + $0x38] sm:$0xff]  ;;  %v851_v55 = vmul.f32 %v2880_v53, %v2876_v47 }
  0xea   : > { %623 = vrot.lane.b32.xlu1 %v615_v57, %s2522_s19  ;;  %569 = vrot.lane.b32.xlu0 %v562_v59, %s2522_s19  ;;  %v482_v57 = vmul.f32 %v2878_v48, %v2755_v32  ;;  %v2889_v59 = vpop.permute.xlu1 %705 }
  0xeb   : > { %599 = vrot.lane.b32.xlu2 %v593_v58, %s2521_s18  ;;  %v748_v58 = vmul.f32 %v746_v11, %v2882_v54  ;;  %v2909_v11 = vld [vmem:[#allocation2 + $0x58] sm:$0x3] }
  0xf2   : > { %654 = vrot.lane.b32.xlu1 %v646_v0, %s2521_s18  ;;  %601 = vrot.lane.b32.xlu0 %v594_v1, %s2521_s18  ;;  %v2895_v1 = vstv %s2202_s20  ;;  %s2219_s20 = sld [smem:[#allocation6 + $0x39]] }
  0xf3   : > { %619 = vrot.lane.b32.xlu2 %v613_v2, %s2522_s19  ;;  %v871_v2 = vmul.f32 %v2895_v1, %v2876_v47 }
  0xfa   : > { %674 = vrot.lane.b32.xlu1 %v666_v6, %s2522_s19  ;;  %621 = vrot.lane.b32.xlu0 %v614_v7, %s2522_s19  ;;  %v768_v6 = vmul.f32 %v766_v19, %v2882_v54  ;;  %v798_v7 = vmul.f32 %v2845_v26, %v2899_v5  ;;  %v2915_v19 = vld [vmem:[#allocation2 + $0x39] sm:$0xff] }
  0xfb   : > { %650 = vrot.lane.b32.xlu2 %v644_v9, %s2521_s18  ;;  %v2906_v9 = vpop.permute.xlu1 %725 }
 0x102   : > { %757 = vrot.lane.b32.xlu1 %v749_v15, %s2521_s18  ;;  %652 = vrot.lane.b32.xlu0 %v645_v17, %s2521_s18  ;;  %v2911_v15 = vstv %s2204_s22  ;;  %v2913_v17 = vstv %s2182_s21  ;;  %s2220_s21 = sld [smem:[#allocation6 + $0x41]] }
 0x103   : > { %670 = vrot.lane.b32.xlu2 %v664_v18, %s2522_s19  ;;  %v533_v29 = vmul.f32 %v2913_v17, %v2775_v45  ;;  %s2200_s22 = sld [smem:[#allocation6 + $0x34]] }
 0x10a   : > { %777 = vrot.lane.b32.xlu1 %v769_v20, %s2522_s19  ;;  %672 = vrot.lane.b32.xlu0 %v665_v22, %s2522_s19 }
 0x10b   : > { %701 = vrot.lane.b32.xlu2 %v695_v24, %s2521_s18  ;;  %v903_v24 = vmul.f32 %v2911_v15, %v2909_v11 }
 0x112   : > { %808 = vrot.lane.b32.xlu1 %v800_v33, %s2521_s18  ;;  %703 = vrot.lane.b32.xlu0 %v696_v34, %s2521_s18  ;;  %v799_v33 = vmul.f32 %v2845_v26, %v2915_v19 }
 0x113   : > { %721 = vrot.lane.b32.xlu2 %v715_v35, %s2522_s19  ;;  %v818_v35 = vmul.f32 %v2861_v36, %v2899_v5 }
 0x114   : > { %v446_v37 = vpop.permute.xlu2 %445 }
 0x115   : > { %v454_v50 = vadd.f32 %v446_v37, %v431_v46  ;;  %v2930_v46 = vld [vmem:[#allocation2 + $0x32] sm:$0xff] }
 0x11a   : > { %828 = vrot.lane.b32.xlu1 %v820_v41, %s2522_s19  ;;  %723 = vrot.lane.b32.xlu0 %v716_v44, %s2522_s19  ;;  %v2928_v44 = vstv %s2205_s23  ;;  %s2222_s23 = sld [smem:[#allocation6 + $0xb]] }
 0x11b   : > { %753 = vrot.lane.b32.xlu2 %v747_v43, %s2521_s18  ;;  %v923_v26 = vmul.f32 %v2928_v44, %v2909_v11 }
 0x11d   : > { %v466_v52 = vpop.permute.xlu2 %465 }
 0x11e   : > { %v474_v16 = vadd.f32 %v466_v52, %v454_v50  ;;  %v819_v50 = vmul.f32 %v2861_v36, %v2915_v19  ;;  %v433_v52 = vmul.f32 %v430_v42, %v2745_v27  ;;  %v484_v27 = vmul.f32 %v2878_v48, %v2764_v38 }
 0x120   : > { %v485_v61 = vadd.f32 %v482_v57, %v474_v16  ;;  %v432_v16 = vmul.f32 %v430_v42, %v2747_v28 }
 0x122   : > { %859 = vrot.lane.b32.xlu1 %v851_v55, %s2521_s18  ;;  %755 = vrot.lane.b32.xlu0 %v748_v58, %s2521_s18  ;;  %v849_v55 = vmul.f32 %v2880_v53, %v2930_v46 }
 0x123   : > { %773 = vrot.lane.b32.xlu2 %v767_v62, %s2522_s19 }
 0x125   : > { %v497_v0 = vpop.permute.xlu2 %496 }
 0x126   : > { %v505_v18 = vadd.f32 %v497_v0, %v485_v61  ;;  %v2943_v61 = vstv %s2185_s8  ;;  %s2223_s8 = sld [smem:[#allocation6 + $0x13]] }
 0x12a   : > { %879 = vrot.lane.b32.xlu1 %v871_v2, %s2522_s19  ;;  %775 = vrot.lane.b32.xlu0 %v768_v6, %s2522_s19 }
 0x12b   : > { %804 = vrot.lane.b32.xlu2 %v798_v7, %s2521_s18  ;;  %v2947_v7 = vld [vmem:[#allocation2 + $0x59] sm:$0x3] }
 0x12d   : > { %v517_v20 = vpop.permute.xlu2 %516 }
 0x12e   : > { %v525_v22 = vadd.f32 %v517_v20, %v505_v18  ;;  %v2949_v18 = vstv %s2207_s24  ;;  %v2951_v20 = vld [vmem:[#allocation2 + $0x3a] sm:$0xff]  ;;  %s2203_s24 = sld [smem:[#allocation6 + $0x6]] }
 0x12f   : > { %v954_v38 = vmul.f32 %v2949_v18, %v2947_v7 }
 0x130   : > { %v536_v34 = vadd.f32 %v533_v29, %v525_v22  ;;  %v483_v22 = vmul.f32 %v2878_v48, %v2766_v39  ;;  %v585_v29 = vmul.f32 %v2943_v61, %v2796_v56 }
 0x132   : > { %911 = vrot.lane.b32.xlu1 %v903_v24, %s2521_s18  ;;  %806 = vrot.lane.b32.xlu0 %v799_v33, %s2521_s18 }
 0x133   : > { %824 = vrot.lane.b32.xlu2 %v818_v35, %s2522_s19  ;;  %v850_v35 = vmul.f32 %v2880_v53, %v2951_v20 }
 0x134   : > { %v450_v37 = vpop.permute.xlu1 %449  ;;  %v448_v41 = vpop.permute.xlu0 %447 }
 0x135   : > { %v548_v43 = vpop.permute.xlu2 %547  ;;  %v456_v57 = vadd.f32 %v450_v37, %v433_v52  ;;  %v455_v58 = vadd.f32 %v448_v41, %v432_v16  ;;  %v869_v41 = vmul.f32 %v2895_v1, %v2930_v46  ;;  %v2968_v52 = vld [vmem:[#allocation2 + $0x48] sm:$0xff]  ;;  %v870_v16 = vmul.f32 %v2895_v1, %v2951_v20 }
 0x136   : > { %v556_v62 = vadd.f32 %v548_v43, %v536_v34 }
 0x13a   : > { %931 = vrot.lane.b32.xlu1 %v923_v26, %s2522_s19  ;;  %826 = vrot.lane.b32.xlu0 %v819_v50, %s2522_s19  ;;  %v2966_v50 = vstv %s2208_s25  ;;  %s2225_s25 = sld [smem:[#allocation6 + $0x23]] }
 0x13b   : > { %855 = vrot.lane.b32.xlu2 %v849_v55, %s2521_s18  ;;  %v974_v53 = vmul.f32 %v2966_v50, %v2947_v7  ;;  %v901_v55 = vmul.f32 %v2911_v15, %v2968_v52 }
 0x13c   : > { %v470_v0 = vpop.permute.xlu1 %469  ;;  %v468_v36 = vpop.permute.xlu0 %467 }
 0x13d   : > { %v476_v42 = vadd.f32 %v470_v0, %v456_v57  ;;  %v475_v2 = vadd.f32 %v468_v36, %v455_v58  ;;  %v568_v6 = vpop.permute.xlu2 %567  ;;  %v2981_v0 = vld [vmem:[#allocation2 + $0x5a] sm:$0x3]  ;;  %v2983_v36 = vstv %s2188_s27  ;;  %s2226_s27 = sld [smem:[#allocation6 + $0x2b]] }
 0x13e   : > { %v576_v24 = vadd.f32 %v568_v6, %v556_v62  ;;  %v535_v62 = vmul.f32 %v2913_v17, %v2695_v8 }
 0x13f   : > { %v487_v33 = vadd.f32 %v484_v27, %v476_v42  ;;  %v486_v34 = vadd.f32 %v483_v22, %v475_v2 }
 0x140   : > { %v588_v37 = vadd.f32 %v585_v29, %v576_v24  ;;  %v2985_v24 = vstv %s2210_s28  ;;  %v2987_v29 = vld [vmem:[#allocation2 + $0x50] sm:$0xff]  ;;  %s2206_s28 = sld [smem:[#allocation6 + $0x1e]] }
 0x141   : > { %v1005_v8 = vmul.f32 %v2985_v24, %v2981_v0 }
 0x142   : > { %962 = vrot.lane.b32.xlu1 %v954_v38, %s2521_s18  ;;  %857 = vrot.lane.b32.xlu0 %v850_v35, %s2521_s18  ;;  %v636_v38 = vmul.f32 %v2983_v36, %v2816_v4 }
 0x143   : > { %875 = vrot.lane.b32.xlu2 %v869_v41, %s2522_s19  ;;  %v902_v41 = vmul.f32 %v2911_v15, %v2987_v29 }
 0x144   : > { %v501_v48 = vpop.permute.xlu1 %500  ;;  %v499_v43 = vpop.permute.xlu0 %498 }
 0x145   : > { %v600_v26 = vpop.permute.xlu2 %599  ;;  %v507_v57 = vadd.f32 %v501_v48, %v487_v33  ;;  %v506_v58 = vadd.f32 %v499_v43, %v486_v34  ;;  %v534_v33 = vmul.f32 %v2913_v17, %v2786_v51  ;;  %v587_v17 = vmul.f32 %v2943_v61, %v2784_v49 }
 0x146   : > { %v608_v27 = vadd.f32 %v600_v26, %v588_v37  ;;  %v921_v26 = vmul.f32 %v2928_v44, %v2968_v52 }
 0x14a   : > { %982 = vrot.lane.b32.xlu1 %v974_v53, %s2522_s19  ;;  %877 = vrot.lane.b32.xlu0 %v870_v16, %s2522_s19 }
 0x14b   : > { %907 = vrot.lane.b32.xlu2 %v901_v55, %s2521_s18 }
 0x14c   : > { %v521_v1 = vpop.permute.xlu1 %520  ;;  %v519_v42 = vpop.permute.xlu0 %518 }
 0x14d   : > { %v527_v2 = vadd.f32 %v521_v1, %v507_v57  ;;  %v526_v6 = vadd.f32 %v519_v42, %v506_v58  ;;  %v620_v22 = vpop.permute.xlu2 %619  ;;  %v3019_v42 = vstv %s2191_s11  ;;  %s2229_s11 = sld [smem:[#allocation6 + $0x43]] }
 0x14e   : > { %v628_v34 = vadd.f32 %v620_v22, %v608_v27  ;;  %v922_v27 = vmul.f32 %v2928_v44, %v2987_v29  ;;  %v3021_v44 = vld [vmem:[#allocation2 + $0x10] sm:$0x3] }
 0x14f   : > { %v538_v35 = vadd.f32 %v535_v62, %v527_v2  ;;  %v537_v37 = vadd.f32 %v534_v33, %v526_v6  ;;  %v3010_v62 = vld [vmem:[#allocation2 + $0x49] sm:$0xff] }
 0x150   : > { %v639_v48 = vadd.f32 %v636_v38, %v628_v34  ;;  %v952_v49 = vmul.f32 %v2949_v18, %v3010_v62  ;;  %v3023_v38 = vld [vmem:[#allocation2 + $0x51] sm:$0xff] }
 0x151   : > { %v558_v43 = vadd.f32 %v2847_v30, %v538_v35  ;;  %v3006_v30 = vstv %s2211_s10  ;;  %v638_v35 = vmul.f32 %v2983_v36, %v2805_v60  ;;  %v972_v60 = vmul.f32 %v2966_v50, %v3010_v62  ;;  %s2228_s10 = sld [smem:[#allocation6 + $0x3b]] }
 0x152   : > { %1013 = vrot.lane.b32.xlu1 %v1005_v8, %s2521_s18  ;;  %909 = vrot.lane.b32.xlu0 %v902_v41, %s2521_s18  ;;  %v1025_v58 = vmul.f32 %v3006_v30, %v2981_v0 }
 0x153   : > { %927 = vrot.lane.b32.xlu2 %v921_v26, %s2522_s19  ;;  %v578_v53 = vadd.f32 %v2867_v14, %v558_v43  ;;  %v687_v43 = vmul.f32 %v3019_v42, %v2835_v21 }
 0x154   : > { %v604_v16 = vpop.permute.xlu1 %603  ;;  %v550_v15 = vpop.permute.xlu0 %549 }
 0x155   : > { %v590_v55 = vadd.f32 %v587_v17, %v578_v53  ;;  %v651_v57 = vpop.permute.xlu2 %650  ;;  %v557_v1 = vadd.f32 %v550_v15, %v537_v37  ;;  %v586_v37 = vmul.f32 %v2943_v61, %v2808_v63 }
 0x156   : > { %v659_v2 = vadd.f32 %v651_v57, %v639_v48  ;;  %v3031_v48 = vstv %s2213_s12  ;;  %s2209_s12 = sld [smem:[#allocation6 + $0x36]] }
 0x157   : > { %v610_v14 = vadd.f32 %v604_v16, %v590_v55  ;;  %v1092_v53 = vmul.f32 %v3031_v48, %v3021_v44  ;;  %v953_v16 = vmul.f32 %v2949_v18, %v3023_v38 }
 0x15a   : > { %1033 = vrot.lane.b32.xlu1 %v1025_v58, %s2522_s19  ;;  %929 = vrot.lane.b32.xlu0 %v922_v27, %s2522_s19  ;;  %v3042_v58 = vld [vmem:[#allocation2 + $0x4a] sm:$0xff]  ;;  %v3044_v27 = vstv %s2214_s13  ;;  %s1041_s13 = sld [smem:[#allocation9]] }
 0x15b   : > { %958 = vrot.lane.b32.xlu2 %v952_v49, %s2521_s18  ;;  %v1112_v18 = vmul.f32 %v3044_v27, %v3021_v44  ;;  %v973_v49 = vmul.f32 %v2966_v50, %v3023_v38 }
 0x15c   : > { %v624_v6 = vpop.permute.xlu1 %623  ;;  %v570_v22 = vpop.permute.xlu0 %569 }
 0x15d   : > { %v630_v33 = vadd.f32 %v624_v6, %v610_v14  ;;  %v577_v34 = vadd.f32 %v570_v22, %v557_v1  ;;  %v671_v8 = vpop.permute.xlu2 %670  ;;  %v1003_v14 = vmul.f32 %v2985_v24, %v3042_v58  ;;  %v689_v6 = vmul.f32 %v3019_v42, %v2709_v13 }
 0x15e   : > { %v679_v41 = vadd.f32 %v671_v8, %v659_v2  ;;  %v3057_v22 = vstv %s2194_s14  ;;  %s1046_s14 = sld [smem:[#allocation11]] }
 0x15f   : > { %v641_v26 = vadd.f32 %v638_v35, %v630_v33  ;;  %v589_v17 = vadd.f32 %v586_v37, %v577_v34 }
 0x160   : > { %v690_v15 = vadd.f32 %v687_v43, %v679_v41  ;;  %v3059_v41 = vld [vmem:[#allocation2 + $0x11] sm:$0x3] }
 0x161   : > { %v3061_v43 = vld [vmem:[#allocation2 + $0x52] sm:$0xff] }
 0x162   : > { %1100 = vrot.lane.b32.xlu1 %v1092_v53, %s2521_s18  ;;  %960 = vrot.lane.b32.xlu0 %v953_v16, %s2521_s18  ;;  %v739_v53 = vmul.f32 %v3057_v22, %v2863_v40  ;;  %v3067_v16 = vstv %s2216_s15  ;;  %s2212_s15 = sld [smem:[#allocation6 + $0x1]] }
 0x163   : > { %978 = vrot.lane.b32.xlu2 %v972_v60, %s2522_s19  ;;  %v1143_v60 = vmul.f32 %v3067_v16, %v3059_v41 }
 0x164   : > { %v655_v61 = vpop.permute.xlu1 %654  ;;  %v602_v55 = vpop.permute.xlu0 %601 }
 0x165   : > { %v702_v57 = vpop.permute.xlu2 %701  ;;  %v661_v1 = vadd.f32 %v655_v61, %v641_v26  ;;  %v609_v2 = vadd.f32 %v602_v55, %v589_v17  ;;  %v637_v26 = vmul.f32 %v2983_v36, %v2826_v12  ;;  %v1004_v61 = vmul.f32 %v2985_v24, %v3061_v43 }
 0x166   : > { %v710_v33 = vadd.f32 %v702_v57, %v690_v15  ;;  %v1023_v36 = vmul.f32 %v3006_v30, %v3042_v58 }
 0x16a   : > { %1120 = vrot.lane.b32.xlu1 %v1112_v18, %s2522_s19  ;;  %980 = vrot.lane.b32.xlu0 %v973_v49, %s2522_s19  ;;  %v741_v18 = vmul.f32 %v3057_v22, %v2824_v10 }
 0x16b   : > { %1009 = vrot.lane.b32.xlu2 %v1003_v14, %s2521_s18 }
 0x16c   : > { %v675_v34 = vpop.permute.xlu1 %674  ;;  %v622_v8 = vpop.permute.xlu0 %621 }
 0x16d   : > { %v681_v50 = vadd.f32 %v675_v34, %v661_v1  ;;  %v629_v35 = vadd.f32 %v622_v8, %v609_v2  ;;  %v722_v37 = vpop.permute.xlu2 %721  ;;  %v3082_v2 = vstv %s2217_s5  ;;  %v1090_v34 = vmul.f32 %v3031_v48, %v2739_v23  ;;  %v3093_v8 = vld [vmem:[#allocation2 + $0x12] sm:$0x3]  ;;  %s2231_s5 = sld [smem:[#allocation6 + $0xd]] }
 0x16e   : > { %v730_v17 = vadd.f32 %v722_v37, %v710_v33  ;;  %v1024_v33 = vmul.f32 %v3006_v30, %v3061_v43 }
 0x16f   : > { %v692_v13 = vadd.f32 %v689_v6, %v681_v50  ;;  %v640_v15 = vadd.f32 %v637_v26, %v629_v35  ;;  %v1163_v6 = vmul.f32 %v3082_v2, %v3059_v41  ;;  %v3095_v50 = vstv %s2197_s17  ;;  %s2215_s17 = sld [smem:[#allocation6 + $0x19]] }
 0x170   : > { %v742_v55 = vadd.f32 %v739_v53, %v730_v17  ;;  %v3097_v17 = vstv %s2219_s20  ;;  %s2232_s20 = sld [smem:[#allocation6 + $0x15]] }
 0x171   : > { %v712_v57 = vadd.f32 %v2889_v59, %v692_v13 }
 0x172   : > { %1151 = vrot.lane.b32.xlu1 %v1143_v60, %s2521_s18  ;;  %1011 = vrot.lane.b32.xlu0 %v1004_v61, %s2521_s18  ;;  %v792_v60 = vmul.f32 %v3095_v50, %v2843_v25  ;;  %v1110_v25 = vmul.f32 %v3044_v27, %v2739_v23  ;;  %v1141_v23 = vmul.f32 %v3067_v16, %v2755_v32 }
 0x173   : > { %1029 = vrot.lane.b32.xlu2 %v1023_v36, %s2522_s19  ;;  %v732_v49 = vadd.f32 %v2906_v9, %v712_v57  ;;  %v1194_v57 = vmul.f32 %v3097_v17, %v3093_v8 }
 0x174   : > { %v758_v14 = vpop.permute.xlu1 %757  ;;  %v653_v24 = vpop.permute.xlu0 %652 }
 0x175   : > { %v744_v1 = vadd.f32 %v741_v18, %v732_v49  ;;  %v754_v59 = vpop.permute.xlu2 %753  ;;  %v660_v9 = vadd.f32 %v653_v24, %v640_v15  ;;  %v688_v15 = vmul.f32 %v3019_v42, %v2850_v31  ;;  %v1091_v49 = vmul.f32 %v3031_v48, %v2747_v28 }
 0x176   : > { %v762_v35 = vadd.f32 %v754_v59, %v742_v55  ;;  %v790_v55 = vmul.f32 %v3095_v50, %v2899_v5  ;;  %v3114_v59 = vstv %s2220_s21  ;;  %v1111_v48 = vmul.f32 %v3044_v27, %v2747_v28  ;;  %s2218_s21 = sld [smem:[#allocation6 + $0x31]] }
 0x177   : > { %v764_v10 = vadd.f32 %v758_v14, %v744_v1  ;;  %v740_v28 = vmul.f32 %v3057_v22, %v2882_v54 }
 0x17a   : > { %1171 = vrot.lane.b32.xlu1 %v1163_v6, %s2522_s19  ;;  %1031 = vrot.lane.b32.xlu0 %v1024_v33, %s2522_s19  ;;  %v1214_v6 = vmul.f32 %v3114_v59, %v3093_v8 }
 0x17b   : > { %1096 = vrot.lane.b32.xlu2 %v1090_v34, %s2521_s18  ;;  %v3125_v34 = vstv %s2200_s22  ;;  %s2234_s22 = sld [smem:[#allocation6 + $0x25]] }
 0x17c   : > { %v778_v37 = vpop.permute.xlu1 %777  ;;  %v673_v26 = vpop.permute.xlu0 %672 }
 0x17d   : > { %v784_v30 = vadd.f32 %v778_v37, %v764_v10  ;;  %v680_v53 = vadd.f32 %v673_v26, %v660_v9  ;;  %v774_v13 = vpop.permute.xlu2 %773 }
 0x17e   : > { %v782_v61 = vadd.f32 %v774_v13, %v762_v35  ;;  %v3133_v13 = vstv %s2222_s23  ;;  %s2235_s23 = sld [smem:[#allocation6 + $0x2d]] }
 0x17f   : > { %v795_v36 = vadd.f32 %v792_v60, %v784_v30  ;;  %v691_v18 = vadd.f32 %v688_v15, %v680_v53  ;;  %v3127_v30 = vld [vmem:[#allocation2 + $0x28] sm:$0x3]  ;;  %v841_v53 = vmul.f32 %v3125_v34, %v2930_v46 }
 0x180   : > { %v793_v14 = vadd.f32 %v790_v55, %v782_v61  ;;  %v1245_v15 = vmul.f32 %v3133_v13, %v3127_v30  ;;  %v1142_v61 = vmul.f32 %v3067_v16, %v2766_v39  ;;  %v1161_v55 = vmul.f32 %v3082_v2, %v2755_v32 }
 0x181   : > { %v3146_v16 = vstv %s2223_s8  ;;  %s2237_s8 = sld [smem:[#allocation6 + $0x3d]] }
 0x182   : > { %1202 = vrot.lane.b32.xlu1 %v1194_v57, %s2521_s18  ;;  %1098 = vrot.lane.b32.xlu0 %v1091_v49, %s2521_s18  ;;  %v1265_v32 = vmul.f32 %v3146_v16, %v3127_v30 }
 0x183   : > { %1116 = vrot.lane.b32.xlu2 %v1110_v25, %s2522_s19 }
 0x184   : > { %v809_v42 = vpop.permute.xlu1 %808  ;;  %v704_v24 = vpop.permute.xlu0 %703 }
 0x185   : > { %v805_v1 = vpop.permute.xlu2 %804  ;;  %v711_v33 = vadd.f32 %v704_v24, %v691_v18  ;;  %v815_v54 = vadd.f32 %v809_v42, %v795_v36  ;;  %v1162_v24 = vmul.f32 %v3082_v2, %v2766_v39  ;;  %v1192_v36 = vmul.f32 %v3097_v17, %v2775_v45  ;;  %v3159_v2 = vld [vmem:[#allocation2 + $0x29] sm:$0x3] }
 0x186   : > { %v813_v10 = vadd.f32 %v805_v1, %v793_v14  ;;  %v843_v14 = vmul.f32 %v3125_v34, %v2876_v47  ;;  %v3156_v42 = vstv %s2203_s24  ;;  %s2221_s24 = sld [smem:[#allocation6 + $0x3]] }
 0x18a   : > { %1222 = vrot.lane.b32.xlu1 %v1214_v6, %s2522_s19  ;;  %1118 = vrot.lane.b32.xlu0 %v1111_v48, %s2522_s19 }
 0x18b   : > { %1147 = vrot.lane.b32.xlu2 %v1141_v23, %s2521_s18 }
 0x18c   : > { %v829_v9 = vpop.permute.xlu1 %828  ;;  %v724_v35 = vpop.permute.xlu0 %723 }
 0x18d   : > { %v731_v37 = vadd.f32 %v724_v35, %v711_v33  ;;  %v825_v26 = vpop.permute.xlu2 %824  ;;  %v835_v49 = vadd.f32 %v829_v9, %v815_v54  ;;  %v895_v35 = vmul.f32 %v3156_v42, %v2909_v11  ;;  %v1212_v11 = vmul.f32 %v3114_v59, %v2775_v45 }
 0x18e   : > { %v833_v27 = vadd.f32 %v825_v26, %v813_v10  ;;  %v3178_v54 = vstv %s2226_s27  ;;  %v1243_v45 = vmul.f32 %v3133_v13, %v2796_v56  ;;  %s2240_s27 = sld [smem:[#allocation6 + $0xf]] }
 0x18f   : > { %v743_v60 = vadd.f32 %v740_v28, %v731_v37  ;;  %v846_v1 = vadd.f32 %v843_v14, %v835_v49  ;;  %v791_v37 = vmul.f32 %v3095_v50, %v2915_v19  ;;  %v893_v28 = vmul.f32 %v3156_v42, %v2968_v52 }
 0x190   : > { %v844_v57 = vadd.f32 %v841_v53, %v833_v27  ;;  %v3167_v27 = vstv %s2225_s25  ;;  %s2238_s25 = sld [smem:[#allocation6 + $0x45]] }
 0x192   : > { %1253 = vrot.lane.b32.xlu1 %v1245_v15, %s2521_s18  ;;  %1149 = vrot.lane.b32.xlu0 %v1142_v61, %s2521_s18  ;;  %v1296_v15 = vmul.f32 %v3167_v27, %v3159_v2  ;;  %v1193_v61 = vmul.f32 %v3097_v17, %v2786_v51  ;;  %v1316_v17 = vmul.f32 %v3178_v54, %v3159_v2 }
 0x193   : > { %1167 = vrot.lane.b32.xlu2 %v1161_v55, %s2522_s19 }
 0x194   : > { %v860_v22 = vpop.permute.xlu1 %859  ;;  %v756_v18 = vpop.permute.xlu0 %755 }
 0x195   : > { %v856_v25 = vpop.permute.xlu2 %855  ;;  %v866_v47 = vadd.f32 %v860_v22, %v846_v1  ;;  %v763_v6 = vadd.f32 %v756_v18, %v743_v60  ;;  %v1213_v22 = vmul.f32 %v3114_v59, %v2786_v51  ;;  %v3188_v18 = vstv %s2206_s28  ;;  %s2224_s28 = sld [smem:[#allocation6 + $0x1b]] }
 0x196   : > { %v864_v48 = vadd.f32 %v856_v25, %v844_v57  ;;  %v3191_v25 = vld [vmem:[#allocation2 + $0x2a] sm:$0x3] }
 0x19a   : > { %1273 = vrot.lane.b32.xlu1 %v1265_v32, %s2522_s19  ;;  %1169 = vrot.lane.b32.xlu0 %v1162_v24, %s2522_s19 }
 0x19b   : > { %1198 = vrot.lane.b32.xlu2 %v1192_v36, %s2521_s18  ;;  %v3193_v36 = vstv %s2228_s10  ;;  %s2241_s10 = sld [smem:[#allocation6 + $0x17]] }
 0x19c   : > { %v880_v23 = vpop.permute.xlu1 %879  ;;  %v776_v33 = vpop.permute.xlu0 %775 }
 0x19d   : > { %v886_v10 = vadd.f32 %v880_v23, %v866_v47  ;;  %v783_v9 = vadd.f32 %v776_v33, %v763_v6  ;;  %v876_v39 = vpop.permute.xlu2 %875  ;;  %v946_v6 = vmul.f32 %v3188_v18, %v2947_v7  ;;  %v1347_v33 = vmul.f32 %v3193_v36, %v3191_v25 }
 0x19e   : > { %v884_v26 = vadd.f32 %v876_v39, %v864_v48  ;;  %v842_v48 = vmul.f32 %v3125_v34, %v2951_v20  ;;  %v1263_v7 = vmul.f32 %v3146_v16, %v2796_v56  ;;  %v1294_v56 = vmul.f32 %v3167_v27, %v2816_v4 }
 0x19f   : > { %v898_v53 = vadd.f32 %v895_v35, %v886_v10  ;;  %v794_v60 = vadd.f32 %v791_v37, %v783_v9  ;;  %v944_v10 = vmul.f32 %v3188_v18, %v3010_v62  ;;  %v1244_v35 = vmul.f32 %v3133_v13, %v2808_v63 }
 0x1a0   : > { %v896_v57 = vadd.f32 %v893_v28, %v884_v26  ;;  %v3210_v28 = vstv %s2229_s11  ;;  %v1264_v13 = vmul.f32 %v3146_v16, %v2808_v63  ;;  %v894_v63 = vmul.f32 %v3156_v42, %v2987_v29  ;;  %s2243_s11 = sld [smem:[#allocation6 + $0x27]] }
 0x1a2   : > { %1304 = vrot.lane.b32.xlu1 %v1296_v15, %s2521_s18  ;;  %1200 = vrot.lane.b32.xlu0 %v1193_v61, %s2521_s18  ;;  %v3221_v15 = vstv %s2209_s12  ;;  %s2227_s12 = sld [smem:[#allocation6 + $0x33]] }
 0x1a3   : > { %1218 = vrot.lane.b32.xlu2 %v1212_v11, %s2522_s19  ;;  %v997_v42 = vmul.f32 %v3221_v15, %v2981_v0 }
 0x1a4   : > { %v912_v19 = vpop.permute.xlu1 %911  ;;  %v807_v50 = vpop.permute.xlu0 %806 }
 0x1a5   : > { %v908_v55 = vpop.permute.xlu2 %907  ;;  %v918_v49 = vadd.f32 %v912_v19, %v898_v53  ;;  %v814_v14 = vadd.f32 %v807_v50, %v794_v60  ;;  %v1367_v53 = vmul.f32 %v3210_v28, %v3191_v25 }
 0x1a6   : > { %v916_v32 = vadd.f32 %v908_v55, %v896_v57  ;;  %v995_v55 = vmul.f32 %v3221_v15, %v3042_v58 }
 0x1aa   : > { %1324 = vrot.lane.b32.xlu1 %v1316_v17, %s2522_s19  ;;  %1220 = vrot.lane.b32.xlu0 %v1213_v22, %s2522_s19  ;;  %v1295_v22 = vmul.f32 %v3167_v27, %v2826_v12  ;;  %v1315_v27 = vmul.f32 %v3178_v54, %v2826_v12  ;;  %v945_v12 = vmul.f32 %v3188_v18, %v3023_v38 }
 0x1ab   : > { %1249 = vrot.lane.b32.xlu2 %v1243_v45, %s2521_s18 }
 0x1ac   : > { %v932_v24 = vpop.permute.xlu1 %931  ;;  %v827_v1 = vpop.permute.xlu0 %826 }
 0x1ad   : > { %v938_v51 = vadd.f32 %v932_v24, %v918_v49  ;;  %v834_v59 = vadd.f32 %v827_v1, %v814_v14  ;;  %v928_v47 = vpop.permute.xlu2 %927  ;;  %v1314_v49 = vmul.f32 %v3178_v54, %v2816_v4  ;;  %v1345_v4 = vmul.f32 %v3193_v36, %v2835_v21 }
 0x1ae   : > { %v936_v23 = vadd.f32 %v928_v47, %v916_v32  ;;  %v3245_v54 = vstv %s1046_s14  ;;  %s2246_s14 = sld [smem:[#allocation6 + $0x3f]] }
 0x1af   : > { %v949_v9 = vadd.f32 %v946_v6, %v938_v51  ;;  %v845_v39 = vadd.f32 %v842_v48, %v834_v59  ;;  %v3241_v6 = vstv %s1041_s13  ;;  %s2244_s13 = sld [smem:[#allocation6 + $0x2f]] }
 0x1b0   : > { %v947_v37 = vadd.f32 %v944_v10, %v936_v23 }
 0x1b2   : > { %1355 = vrot.lane.b32.xlu1 %v1347_v33, %s2521_s18  ;;  %1251 = vrot.lane.b32.xlu0 %v1244_v35, %s2521_s18 }
 0x1b3   : > { %1269 = vrot.lane.b32.xlu2 %v1263_v7, %s2522_s19 }
 0x1b4   : > { %v963_v20 = vpop.permute.xlu1 %962  ;;  %v858_v34 = vpop.permute.xlu0 %857 }
 0x1b5   : > { %v959_v26 = vpop.permute.xlu2 %958  ;;  %v865_v60 = vadd.f32 %v858_v34, %v845_v39  ;;  %v969_v14 = vadd.f32 %v963_v20, %v949_v9  ;;  %v1365_v20 = vmul.f32 %v3210_v28, %v2835_v21  ;;  %v3253_v34 = vstv %s2212_s15  ;;  %s2230_s15 = sld [smem:[#allocation6 + $0x5]] }
 0x1b6   : > { %v967_v61 = vadd.f32 %v959_v26, %v947_v37  ;;  %v1346_v37 = vmul.f32 %v3193_v36, %v2850_v31  ;;  %v1084_v38 = vmul.f32 %v3253_v34, %v3021_v44  ;;  %v1366_v44 = vmul.f32 %v3210_v28, %v2850_v31 }
 0x1ba   : > { %1375 = vrot.lane.b32.xlu1 %v1367_v53, %s2522_s19  ;;  %1271 = vrot.lane.b32.xlu0 %v1264_v13, %s2522_s19  ;;  %v2357_v13 = vld [vmem:[#allocation2] sm:$0xff] }
 0x1bb   : > { %1300 = vrot.lane.b32.xlu2 %v1294_v56, %s2521_s18  ;;  %v1082_v56 = vmul.f32 %v2357_v13, %v3253_v34 }
 0x1bc   : > { %v983_v57 = vpop.permute.xlu1 %982  ;;  %v878_v11 = vpop.permute.xlu0 %877 }
 0x1bd   : > { %v885_v19 = vadd.f32 %v878_v11, %v865_v60  ;;  %v979_v50 = vpop.permute.xlu2 %978  ;;  %v989_v29 = vadd.f32 %v983_v57, %v969_v14 }
 0x1be   : > { %v987_v16 = vadd.f32 %v979_v50, %v967_v61 }
 0x1bf   : > { %v897_v17 = vadd.f32 %v894_v63, %v885_v19  ;;  %v1000_v51 = vadd.f32 %v997_v42, %v989_v29  ;;  %v3262_v19 = vstv %s2231_s5  ;;  %v3268_v63 = vld [vmem:[#allocation2 + $0x40] sm:$0x3]  ;;  %s2247_s5 = sld [smem:[#allocation6 + $0x47]] }
 0x1c0   : > { %v998_v45 = vadd.f32 %v995_v55, %v987_v16  ;;  %v1396_v50 = vmul.f32 %v3262_v19, %v2863_v40  ;;  %v1398_v31 = vmul.f32 %v3262_v19, %v3268_v63 }
 0x1c2   : > { %1302 = vrot.lane.b32.xlu0 %v1295_v22, %s2521_s18 }
 0x1c3   : > { %1320 = vrot.lane.b32.xlu2 %v1314_v49, %s2522_s19 }
 0x1c4   : > { %v1014_v32 = vpop.permute.xlu1 %1013  ;;  %v910_v24 = vpop.permute.xlu0 %909 }
 0x1c5   : > { %v1010_v1 = vpop.permute.xlu2 %1009  ;;  %v1020_v59 = vadd.f32 %v1014_v32, %v1000_v51  ;;  %v917_v47 = vadd.f32 %v910_v24, %v897_v17  ;;  %v3273_v17 = vstv %s2215_s17  ;;  %v996_v24 = vmul.f32 %v3221_v15, %v3061_v43  ;;  %s2233_s17 = sld [smem:[#allocation6 + $0x1d]] }
 0x1c6   : > { %v1018_v35 = vadd.f32 %v1010_v1, %v998_v45  ;;  %v1135_v32 = vmul.f32 %v3273_v17, %v3059_v41  ;;  %v2358_v1 = vld [vmem:[#allocation2 + $0x1] sm:$0xff] }
 0x1ca   : > { %1322 = vrot.lane.b32.xlu0 %v1315_v27, %s2522_s19  ;;  %v1133_v27 = vmul.f32 %v2358_v1, %v3273_v17 }
 0x1cb   : > { %1351 = vrot.lane.b32.xlu2 %v1345_v4, %s2521_s18 }
 0x1cc   : > { %v1034_v48 = vpop.permute.xlu1 %1033  ;;  %v930_v0 = vpop.permute.xlu0 %929 }
 0x1cd   : > { %v1040_v23 = vadd.f32 %v1034_v48, %v1020_v59  ;;  %v937_v33 = vadd.f32 %v930_v0, %v917_v47  ;;  %v1030_v10 = vpop.permute.xlu2 %1029  ;;  %v3284_v48 = vstv %s2232_s20  ;;  %s2255_s20 = sld [smem:[#allocation12 + $0xc]] }
 0x1ce   : > { %v1038_v26 = vadd.f32 %v1030_v10, %v1018_v35  ;;  %v1418_v15 = vmul.f32 %v3284_v48, %v3268_v63  ;;  %v1416_v10 = vmul.f32 %v3284_v48, %v2863_v40  ;;  %v3296_v35 = vstv %s2218_s21  ;;  %v2359_v40 = vld [vmem:[#allocation2 + $0x2] sm:$0xff]  ;;  %s2236_s21 = sld [smem:[#allocation6 + $0x35]] }
 0x1cf   : > { %v1045_v9 = vmul.f32 %v3241_v6, %v1040_v23  ;;  %v948_v39 = vadd.f32 %v945_v12, %v937_v33  ;;  %v3291_v12 = vld [vmem:[#allocation2 + $0x41] sm:$0x3] }
 0x1d0   : > { %v1043_v57 = vmul.f32 %v3241_v6, %v1038_v26 }
 0x1d1   : > { %v1050_v7 = vadd.f32 %v3245_v54, %v1045_v9 }
 0x1d2   : > { %1353 = vrot.lane.b32.xlu0 %v1346_v37, %s2521_s18  ;;  %v1048_v16 = vadd.f32 %v3245_v54, %v1043_v57  ;;  %v2360_v57 = vld [vmem:[#allocation2 + $0x8] sm:$0xff] }
 0x1d3   : > { %1371 = vrot.lane.b32.xlu2 %v1365_v20, %s2522_s19  ;;  %vm1053_vm3 = vcmp.gt.f32.partialorder %v1050_v7, 0.0  ;;  %v1056_v18 = vmul.f32 0.01, %v1050_v7 }
 0x1d4   : > { %v1101_v53 = vpop.permute.xlu1 %1100  ;;  %v961_v36 = vpop.permute.xlu0 %960  ;;  %v1054_v42 = vmul.f32 0.01, %v1048_v16  ;;  %vm1051_vm4 = vcmp.gt.f32.partialorder %v1048_v16, 0.0 }
 0x1d5   : > { %v1107_v60 = vadd.f32 %v1101_v53, %v1084_v38  ;;  %v1097_v21 = vpop.permute.xlu2 %1096  ;;  %v1059_v61 = vsel %vm1053_vm3, %v1050_v7, %v1056_v18  ;;  %v968_v55 = vadd.f32 %v961_v36, %v948_v39  ;;  %v3294_v39 = vstv %s2234_s22  ;;  %s2239_s22 = sld [smem:[#allocation6 + $0x7]] }
 0x1d6   : > { %v1105_v11 = vadd.f32 %v1097_v21, %v1082_v56  ;;  %1067 = vrot.lane.b32.xlu1 %v1059_v61, %s2519_s16  ;;  %v1057_v47 = vsel %vm1051_vm4, %v1048_v16, %v1054_v42  ;;  %v1449_v20 = vmul.f32 %v3294_v39, %v3291_v12  ;;  %v1184_v36 = vmul.f32 %v2359_v40, %v3296_v35  ;;  %v3350_v40 = vld [vmem:[#allocation2 + $0x58] sm:$0x3] }
 0x1d7   : > { %v1186_v56 = vmul.f32 %v3296_v35, %v3093_v8  ;;  %v1447_v61 = vmul.f32 %v3294_v39, %v2899_v5 }
 0x1da   : > { %1373 = vrot.lane.b32.xlu0 %v1366_v44, %s2522_s19 }
 0x1db   : > { %1402 = vrot.lane.b32.xlu2 %v1396_v50, %s2521_s18  ;;  %v3310_v50 = vstv %s2235_s23  ;;  %s2242_s23 = sld [smem:[#allocation6 + $0x1f]] }
 0x1dc   : > { %v1121_v22 = vpop.permute.xlu1 %1120  ;;  %v981_v45 = vpop.permute.xlu0 %980 }
 0x1dd   : > { %v1127_v28 = vadd.f32 %v1121_v22, %v1107_v60  ;;  %v988_v49 = vadd.f32 %v981_v45, %v968_v55  ;;  %v1117_v14 = vpop.permute.xlu2 %1116 }
 0x1de   : > { %v1125_v29 = vadd.f32 %v1117_v14, %v1105_v11  ;;  %1406 = vrot.lane.b32.xlu1 %v1398_v31, %s2521_s18  ;;  %v1083_v11 = vmul.f32 %v2360_v57, %v3253_v34  ;;  %v3316_v34 = vld [vmem:[#allocation2 + $0x42] sm:$0x3]  ;;  %v3320_v14 = vstv %s2237_s8  ;;  %s1724_s8 = sld [smem:[#allocation12]] }
 0x1df   : > { %v1138_v51 = vadd.f32 %v1135_v32, %v1127_v28  ;;  %v999_v4 = vadd.f32 %v996_v24, %v988_v49  ;;  %v1467_v49 = vmul.f32 %v3310_v50, %v2899_v5  ;;  %v3322_v32 = vld [vmem:[#allocation2 + $0x38] sm:$0xff]  ;;  %v1500_v24 = vmul.f32 %v3320_v14, %v3316_v34 }
 0x1e0   : > { %v1136_v59 = vadd.f32 %v1133_v27, %v1125_v29  ;;  %v3327_v29 = vstv %s2221_s24  ;;  %v1397_v27 = vmul.f32 %v3262_v19, %v3322_v32  ;;  %s2252_s24 = sld [smem:[#allocation12 + $0x6]] }
 0x1e3   : > { %1063 = vrot.lane.b32.xlu2 %v1057_v47, %s2519_s16  ;;  %v2361_v47 = vld [vmem:[#allocation2 + $0x9] sm:$0xff] }
 0x1e4   : > { %v1152_v41 = vpop.permute.xlu1 %1151  ;;  %v1012_v43 = vpop.permute.xlu0 %1011 }
 0x1e5   : > { %v1158_v0 = vadd.f32 %v1152_v41, %v1138_v51  ;;  %v1148_v23 = vpop.permute.xlu2 %1147  ;;  %v1019_v9 = vadd.f32 %v1012_v43, %v999_v4  ;;  %v1134_v41 = vmul.f32 %v2361_v47, %v3273_v17  ;;  %v3386_v47 = vld [vmem:[#allocation2 + $0x3a] sm:$0xff] }
 0x1e6   : > { %v1156_v33 = vadd.f32 %v1148_v23, %v1136_v59  ;;  %1426 = vrot.lane.b32.xlu1 %v1418_v15, %s2522_s19  ;;  %v1237_v59 = vmul.f32 %v3327_v29, %v3127_v30  ;;  %v2362_v15 = vld [vmem:[#allocation2 + $0x18] sm:$0xff] }
 0x1eb   : > { %1422 = vrot.lane.b32.xlu2 %v1416_v10, %s2522_s19  ;;  %v1498_v10 = vmul.f32 %v3320_v14, %v2930_v46 }
 0x1ec   : > { %v1172_v37 = vpop.permute.xlu1 %1171  ;;  %v1032_v7 = vpop.permute.xlu0 %1031 }
 0x1ed   : > { %v1178_v26 = vadd.f32 %v1172_v37, %v1158_v0  ;;  %v1039_v38 = vadd.f32 %v1032_v7, %v1019_v9  ;;  %v1168_v18 = vpop.permute.xlu2 %1167  ;;  %v1235_v0 = vmul.f32 %v2362_v15, %v3327_v29  ;;  %v3339_v9 = vstv %s2238_s25  ;;  %s2245_s25 = sld [smem:[#allocation6 + $0x37]] }
 0x1ee   : > { %v1176_v53 = vadd.f32 %v1168_v18, %v1156_v33  ;;  %1457 = vrot.lane.b32.xlu1 %v1449_v20, %s2521_s18  ;;  %v1520_v30 = vmul.f32 %v3339_v9, %v3316_v34  ;;  %v1417_v7 = vmul.f32 %v3284_v48, %v3322_v32  ;;  %v3357_v48 = vstv %s2224_s28  ;;  %s2249_s28 = sld [smem:[#allocation11 + $0x1]] }
 0x1ef   : > { %v1044_v13 = vmul.f32 %v3241_v6, %v1039_v38  ;;  %v1189_v44 = vadd.f32 %v1186_v56, %v1178_v26 }
 0x1f0   : > { %v1187_v60 = vadd.f32 %v1184_v36, %v1176_v53  ;;  %v1518_v53 = vmul.f32 %v3339_v9, %v2930_v46  ;;  %v3352_v36 = vstv %s2240_s27  ;;  %s2248_s27 = sld [smem:[#allocation9 + $0x1]] }
 0x1f1   : > { %v1049_v21 = vadd.f32 %v3245_v54, %v1044_v13  ;;  %v1469_v54 = vmul.f32 %v3310_v50, %v3291_v12  ;;  %v3354_v13 = vld [vmem:[#allocation2 + $0x39] sm:$0xff] }
 0x1f3   : > { %1453 = vrot.lane.b32.xlu2 %v1447_v61, %s2521_s18  ;;  %vm1052_vm5 = vcmp.gt.f32.partialorder %v1049_v21, 0.0  ;;  %v1055_v6 = vmul.f32 0.01, %v1049_v21  ;;  %v1448_v61 = vmul.f32 %v3294_v39, %v3354_v13 }
 0x1f4   : > { %v1203_v16 = vpop.permute.xlu1 %1202  ;;  %v1099_v8 = vpop.permute.xlu0 %1098 }
 0x1f5   : > { %v1209_v55 = vadd.f32 %v1203_v16, %v1189_v44  ;;  %v1106_v22 = vadd.f32 %v1099_v8, %v1083_v11  ;;  %v1199_v45 = vpop.permute.xlu2 %1198  ;;  %v1058_v31 = vsel %vm1052_vm5, %v1049_v21, %v1055_v6  ;;  %v1551_v21 = vmul.f32 %v3352_v36, %v3350_v40  ;;  %v2363_v6 = vld [vmem:[#allocation2 + $0xa] sm:$0xff] }
 0x1f6   : > { %v1207_v28 = vadd.f32 %v1199_v45, %v1187_v60  ;;  %1477 = vrot.lane.b32.xlu1 %v1469_v54, %s2522_s19  ;;  %1065 = vrot.lane.b32.xlu0 %v1058_v31, %s2519_s16  ;;  %v1288_v44 = vmul.f32 %v3357_v48, %v3159_v2  ;;  %v1185_v16 = vmul.f32 %v2363_v6, %v3296_v35  ;;  %v2364_v54 = vld [vmem:[#allocation2 + $0x19] sm:$0xff] }
 0x1f7   : > { %v1549_v31 = vmul.f32 %v3352_v36, %v2968_v52 }
 0x1fb   : > { %1473 = vrot.lane.b32.xlu2 %v1467_v49, %s2522_s19 }
 0x1fc   : > { %v1223_v42 = vpop.permute.xlu1 %1222  ;;  %v1119_v1 = vpop.permute.xlu0 %1118 }
 0x1fd   : > { %v1229_v51 = vadd.f32 %v1223_v42, %v1209_v55  ;;  %v1126_v4 = vadd.f32 %v1119_v1, %v1106_v22  ;;  %v1219_v5 = vpop.permute.xlu2 %1218  ;;  %v1286_v55 = vmul.f32 %v2364_v54, %v3357_v48 }
 0x1fe   : > { %v1227_v43 = vadd.f32 %v1219_v5, %v1207_v28  ;;  %1508 = vrot.lane.b32.xlu1 %v1500_v24, %s2521_s18  ;;  %1404 = vrot.lane.b32.xlu0 %v1397_v27, %s2521_s18  ;;  %v3371_v28 = vstv %s2241_s10  ;;  %v1468_v24 = vmul.f32 %v3310_v50, %v3354_v13  ;;  %v3382_v5 = vld [vmem:[#allocation2 + $0x59] sm:$0x3]  ;;  %v3389_v50 = vstv %s2227_s12  ;;  %s2250_s10 = sld [smem:[#allocation12 + $0x2]] }
 0x1ff   : > { %v1240_v23 = vadd.f32 %v1237_v59, %v1229_v51  ;;  %v1137_v33 = vadd.f32 %v1134_v41, %v1126_v4  ;;  %v1571_v49 = vmul.f32 %v3371_v28, %v3350_v40  ;;  %v1569_v4 = vmul.f32 %v3371_v28, %v2968_v52  ;;  %s2253_s12 = sld [smem:[#allocation12 + $0x8]] }
 0x200   : > { %v1238_v19 = vadd.f32 %v1235_v0, %v1227_v43  ;;  %v3384_v59 = vstv %s2243_s11  ;;  %v1499_v0 = vmul.f32 %v3320_v14, %v3386_v47  ;;  %v1339_v14 = vmul.f32 %v3389_v50, %v3191_v25  ;;  %s2251_s11 = sld [smem:[#allocation12 + $0x4]] }
 0x201   : > { %v1602_v15 = vmul.f32 %v3384_v59, %v3382_v5 }
 0x203   : > { %1504 = vrot.lane.b32.xlu2 %v1498_v10, %s2521_s18 }
 0x204   : > { %v1254_v17 = vpop.permute.xlu1 %1253  ;;  %v1150_v37 = vpop.permute.xlu0 %1149 }
 0x205   : > { %v1260_v20 = vadd.f32 %v1254_v17, %v1240_v23  ;;  %v1157_v26 = vadd.f32 %v1150_v37, %v1137_v33  ;;  %v1250_v38 = vpop.permute.xlu2 %1249  ;;  %v2366_v17 = vld [vmem:[#allocation2 + $0x1a] sm:$0xff] }
 0x206   : > { %v1258_v18 = vadd.f32 %v1250_v38, %v1238_v19  ;;  %1528 = vrot.lane.b32.xlu1 %v1520_v30, %s2522_s19  ;;  %1424 = vrot.lane.b32.xlu0 %v1417_v7, %s2522_s19  ;;  %v2365_v19 = vld [vmem:[#allocation2 + $0x20] sm:$0xff]  ;;  %v1337_v37 = vmul.f32 %v2366_v17, %v3389_v50 }
 0x207   : > { %v1236_v10 = vmul.f32 %v2365_v19, %v3327_v29  ;;  %v1600_v29 = vmul.f32 %v3384_v59, %v3010_v62  ;;  %v2369_v19 = vld [vmem:[#allocation2 + $0x22] sm:$0xff] }
 0x20b   : > { %1524 = vrot.lane.b32.xlu2 %v1518_v53, %s2522_s19 }
 0x20c   : > { %v1274_v56 = vpop.permute.xlu1 %1273  ;;  %v1170_v60 = vpop.permute.xlu0 %1169 }
 0x20d   : > { %v1280_v46 = vadd.f32 %v1274_v56, %v1260_v20  ;;  %v1177_v57 = vadd.f32 %v1170_v60, %v1157_v26  ;;  %v1270_v11 = vpop.permute.xlu2 %1269  ;;  %v3406_v26 = vstv %s2244_s13  ;;  %v1519_v56 = vmul.f32 %v3339_v9, %v3386_v47  ;;  %v3424_v9 = vld [vmem:[#allocation2 + $0x50] sm:$0xff]  ;;  %s2254_s13 = sld [smem:[#allocation12 + $0xa]] }
 0x20e   : > { %v1278_v8 = vadd.f32 %v1270_v11, %v1258_v18  ;;  %1559 = vrot.lane.b32.xlu1 %v1551_v21, %s2521_s18  ;;  %1455 = vrot.lane.b32.xlu0 %v1448_v61, %s2521_s18  ;;  %v1622_v53 = vmul.f32 %v3406_v26, %v3382_v5  ;;  %v1620_v11 = vmul.f32 %v3406_v26, %v3010_v62 }
 0x20f   : > { %v1291_v22 = vadd.f32 %v1288_v44, %v1280_v46  ;;  %v1188_v45 = vadd.f32 %v1185_v16, %v1177_v57  ;;  %v3416_v57 = vld [vmem:[#allocation2 + $0x5a] sm:$0x3]  ;;  %v3422_v44 = vstv %s2246_s14  ;;  %v3429_v16 = vstv %s2230_s15  ;;  %s2256_s14 = sld [smem:[#allocation12 + $0xe]] }
 0x210   : > { %v1289_v39 = vadd.f32 %v1286_v55, %v1278_v8  ;;  %v1653_v6 = vmul.f32 %v3422_v44, %v3416_v57  ;;  %v1550_v3 = vmul.f32 %v3352_v36, %v3424_v9  ;;  %s2257_s15 = sld [smem:[#allocation12 + $0x10]] }
 0x213   : > { %1555 = vrot.lane.b32.xlu2 %v1549_v31, %s2521_s18  ;;  %v1390_v31 = vmul.f32 %v3429_v16, %v3268_v63 }
 0x214   : > { %v1305_v2 = vpop.permute.xlu1 %1304  ;;  %v1201_v35 = vpop.permute.xlu0 %1200 }
 0x215   : > { %v1311_v42 = vadd.f32 %v1305_v2, %v1291_v22  ;;  %v1208_v1 = vadd.f32 %v1201_v35, %v1188_v45  ;;  %v1301_v27 = vpop.permute.xlu2 %1300  ;;  %v2367_v45 = vld [vmem:[#allocation2 + $0x21] sm:$0xff]  ;;  %v2368_v35 = vld [vmem:[#allocation2 + $0x30] sm:$0xff] }
 0x216   : > { %v1309_v51 = vadd.f32 %v1301_v27, %v1289_v39  ;;  %1579 = vrot.lane.b32.xlu1 %v1571_v49, %s2522_s19  ;;  %1475 = vrot.lane.b32.xlu0 %v1468_v24, %s2522_s19  ;;  %v1287_v39 = vmul.f32 %v2367_v45, %v3357_v48  ;;  %v1388_v49 = vmul.f32 %v2368_v35, %v3429_v16  ;;  %v1670_v27 = vstv %s2247_s5  ;;  %s2260_s5 = sld [smem:[#allocation12 + $0x5]] }
 0x217   : > { %v1673_v48 = vmul.f32 %v1670_v27, %v3416_v57 }
 0x21b   : > { %1575 = vrot.lane.b32.xlu2 %v1569_v4, %s2522_s19 }
 0x21c   : > { %v1325_v41 = vpop.permute.xlu1 %1324  ;;  %v1221_v43 = vpop.permute.xlu0 %1220 }
 0x21d   : > { %v1331_v52 = vadd.f32 %v1325_v41, %v1311_v42  ;;  %v1228_v23 = vadd.f32 %v1221_v43, %v1208_v1  ;;  %v1321_v33 = vpop.permute.xlu2 %1320  ;;  %v1651_v1 = vmul.f32 %v3422_v44, %v3042_v58 }
 0x21e   : > { %v1329_v30 = vadd.f32 %v1321_v33, %v1309_v51  ;;  %1610 = vrot.lane.b32.xlu1 %v1602_v15, %s2521_s18  ;;  %1506 = vrot.lane.b32.xlu0 %v1499_v0, %s2521_s18  ;;  %v1570_v51 = vmul.f32 %v3371_v28, %v3424_v9  ;;  %v1671_v15 = vmul.f32 %v1670_v27, %v3042_v58  ;;  %v3448_v0 = vld [vmem:[#allocation2 + $0x51] sm:$0xff] }
 0x21f   : > { %v1239_v7 = vadd.f32 %v1236_v10, %v1228_v23  ;;  %v1342_v38 = vadd.f32 %v1339_v14, %v1331_v52  ;;  %v1601_v23 = vmul.f32 %v3384_v59, %v3448_v0  ;;  %v1338_v10 = vmul.f32 %v2369_v19, %v3389_v50  ;;  %v2370_v59 = vld [vmem:[#allocation2 + $0x31] sm:$0xff] }
 0x220   : > { %v1340_v20 = vadd.f32 %v1337_v37, %v1329_v30  ;;  %v3456_v30 = vstv %s2233_s17  ;;  %v1621_v37 = vmul.f32 %v3406_v26, %v3448_v0  ;;  %s2262_s17 = sld [smem:[#allocation12 + $0x9]] }
 0x221   : > { %v1439_v50 = vmul.f32 %v2370_v59, %v3456_v30 }
 0x223   : > { %1606 = vrot.lane.b32.xlu2 %v1600_v29, %s2521_s18 }
 0x224   : > { %v1356_v18 = vpop.permute.xlu1 %1355  ;;  %v1252_v25 = vpop.permute.xlu0 %1251 }
 0x225   : > { %v1362_v60 = vadd.f32 %v1356_v18, %v1342_v38  ;;  %v1259_v21 = vadd.f32 %v1252_v25, %v1239_v7  ;;  %v1352_v61 = vpop.permute.xlu2 %1351  ;;  %v3463_v18 = vld [vmem:[#allocation2 + $0x52] sm:$0xff] }
 0x226   : > { %v1360_v46 = vadd.f32 %v1352_v61, %v1340_v20  ;;  %1630 = vrot.lane.b32.xlu1 %v1622_v53, %s2522_s19  ;;  %1526 = vrot.lane.b32.xlu0 %v1519_v56, %s2522_s19  ;;  %v1652_v26 = vmul.f32 %v3422_v44, %v3463_v18 }
 0x22b   : > { %1626 = vrot.lane.b32.xlu2 %v1620_v11, %s2522_s19  ;;  %v3472_v11 = vstv %s2255_s20  ;;  %s2263_s20 = sld [smem:[#allocation12 + $0xb]] }
 0x22c   : > { %v1376_v8 = vpop.permute.xlu1 %1375  ;;  %v1272_v54 = vpop.permute.xlu0 %1271 }
 0x22d   : > { %v1382_v55 = vadd.f32 %v1376_v8, %v1362_v60  ;;  %v1279_v22 = vadd.f32 %v1272_v54, %v1259_v21  ;;  %v1372_v62 = vpop.permute.xlu2 %1371  ;;  %v1389_v60 = vmul.f32 %v3429_v16, %v3322_v32  ;;  %v3478_v8 = vstv %s2236_s21  ;;  %v2371_v32 = vld [vmem:[#allocation2 + $0x32] sm:$0xff]  ;;  %s2265_s21 = sld [smem:[#allocation12 + $0xf]] }
 0x22e   : > { %v1380_v2 = vadd.f32 %v1372_v62, %v1360_v46  ;;  %1661 = vrot.lane.b32.xlu1 %v1653_v6, %s2521_s18  ;;  %1557 = vrot.lane.b32.xlu0 %v1550_v3, %s2521_s18  ;;  %v1672_v54 = vmul.f32 %v1670_v27, %v3463_v18  ;;  %v1490_v16 = vmul.f32 %v2371_v32, %v3478_v8 }
 0x22f   : > { %v1290_v24 = vadd.f32 %v1287_v39, %v1279_v22  ;;  %v1393_v42 = vadd.f32 %v1390_v31, %v1382_v55  ;;  %v1441_v31 = vmul.f32 %v3456_v30, %v3291_v12 }
 0x230   : > { %v1391_v36 = vadd.f32 %v1388_v49, %v1380_v2 }
 0x233   : > { %1657 = vrot.lane.b32.xlu2 %v1651_v1, %s2521_s18 }
 0x234   : > { %v1303_v63 = vpop.permute.xlu0 %1302 }
 0x235   : > { %v1310_v4 = vadd.f32 %v1303_v63, %v1290_v24  ;;  %v1403_v41 = vpop.permute.xlu2 %1402  ;;  %v3485_v24 = vstv %s2239_s22  ;;  %s2266_s22 = sld [smem:[#allocation12 + $0x11]] }
 0x236   : > { %v1411_v43 = vadd.f32 %v1403_v41, %v1391_v36  ;;  %1681 = vrot.lane.b32.xlu1 %v1673_v48, %s2522_s19  ;;  %1577 = vrot.lane.b32.xlu0 %v1570_v51, %s2522_s19  ;;  %v2372_v48 = vld [vmem:[#allocation2 + $0x48] sm:$0xff] }
 0x237   : > { %v1541_v63 = vmul.f32 %v2372_v48, %v3485_v24 }
 0x23b   : > { %1677 = vrot.lane.b32.xlu2 %v1671_v15, %s2522_s19 }
 0x23c   : > { %v1323_v52 = vpop.permute.xlu0 %1322 }
 0x23d   : > { %v1330_v28 = vadd.f32 %v1323_v52, %v1310_v4  ;;  %v1064_v33 = vpop.permute.xlu2 %1063 }
 0x23e   : > { %1073 = vst.msk [vmem:[#allocation3 + $0x2] sm:$0xff] %vm1072_vm8, %v1064_v33  ;;  %1608 = vrot.lane.b32.xlu0 %v1601_v23, %s2521_s18  ;;  %v1492_v23 = vmul.f32 %v3478_v8, %v3316_v34 }
 0x23f   : > { %v1341_v58 = vadd.f32 %v1338_v10, %v1330_v28 }
 0x244   : > { %v1354_v17 = vpop.permute.xlu0 %1353 }
 0x245   : > { %v1361_v14 = vadd.f32 %v1354_v17, %v1341_v58  ;;  %v1423_v7 = vpop.permute.xlu2 %1422  ;;  %v3501_v17 = vstv %s2242_s23  ;;  %s2258_s23 = sld [smem:[#allocation12 + $0x1]] }
 0x246   : > { %v1431_v20 = vadd.f32 %v1423_v7, %v1411_v43  ;;  %1628 = vrot.lane.b32.xlu0 %v1621_v37, %s2522_s19  ;;  %v3503_v37 = vstv %s1724_s8  ;;  %s2261_s8 = sld [smem:[#allocation12 + $0x7]] }
 0x248   : > { %v1068_v29 = vpop.permute.xlu1 %1067  ;;  %v1442_v38 = vadd.f32 %v1439_v50, %v1431_v20 }
 0x249   : > { %1076 = vst.msk [vmem:[#allocation3 + $0x12] sm:$0x3] %vm1075_vm9, %v1068_v29 }
 0x24c   : > { %v1374_v25 = vpop.permute.xlu0 %1373 }
 0x24d   : > { %v1381_v53 = vadd.f32 %v1374_v25, %v1361_v14  ;;  %v1454_v56 = vpop.permute.xlu2 %1453  ;;  %v3505_v14 = vstv %s2252_s24  ;;  %s2264_s24 = sld [smem:[#allocation12 + $0xd]] }
 0x24e   : > { %1659 = vrot.lane.b32.xlu0 %v1652_v26, %s2521_s18  ;;  %v1462_v44 = vadd.f32 %v1454_v56, %v1442_v38 }
 0x24f   : > { %v1392_v21 = vadd.f32 %v1389_v60, %v1381_v53  ;;  %v2373_v53 = vld [vmem:[#allocation2 + $0x49] sm:$0xff] }
 0x250   : > { %v1407_v61 = vpop.permute.xlu1 %1406  ;;  %v3470_v46 = vld [vmem:[#allocation3 + $0x12] sm:$0xf]  ;;  %v1592_v56 = vmul.f32 %v2373_v53, %v3501_v17 }
 0x251   : > { %v3476_v6 = vmul.f32 %v3472_v11, %v3470_v46  ;;  %v1413_v22 = vadd.f32 %v1407_v61, %v1393_v42 }
 0x255   : > { %v1474_v3 = vpop.permute.xlu2 %1473 }
 0x256   : > { %v1482_v55 = vadd.f32 %v1474_v3, %v1462_v44  ;;  %1679 = vrot.lane.b32.xlu0 %v1672_v54, %s2522_s19 }
 0x258   : > { %v1427_v62 = vpop.permute.xlu1 %1426  ;;  %v1493_v45 = vadd.f32 %v1490_v16, %v1482_v55  ;;  %v1543_v16 = vmul.f32 %v3485_v24, %v3350_v40 }
 0x259   : > { %v1433_v39 = vadd.f32 %v1427_v62, %v1413_v22  ;;  %v1440_v22 = vmul.f32 %v3456_v30, %v3354_v13 }
 0x25b   : > { %v1444_v2 = vadd.f32 %v1441_v31, %v1433_v39 }
 0x25d   : > { %v1505_v35 = vpop.permute.xlu2 %1504 }
 0x25e   : > { %v1513_v36 = vadd.f32 %v1505_v35, %v1493_v45  ;;  %v3532_v35 = vstv %s2245_s25  ;;  %s2035_s25 = sld [smem:[#allocation5]] }
 0x260   : > { %v1458_v49 = vpop.permute.xlu1 %1457 }
 0x261   : > { %v1464_v41 = vadd.f32 %v1458_v49, %v1444_v2 }
 0x265   : > { %v1525_v1 = vpop.permute.xlu2 %1524 }
 0x266   : > { %v1533_v27 = vadd.f32 %v1525_v1, %v1513_v36  ;;  %v2374_v1 = vld [vmem:[#allocation2 + $0x4a] sm:$0xff] }
 0x268   : > { %v1478_v51 = vpop.permute.xlu1 %1477  ;;  %v1066_v42 = vpop.permute.xlu0 %1065  ;;  %v1544_v4 = vadd.f32 %v1541_v63, %v1533_v27  ;;  %v1643_v27 = vmul.f32 %v2374_v1, %v3532_v35 }
 0x269   : > { %1074 = vst.msk [vmem:[#allocation3 + $0xa] sm:$0xff] %vm1072_vm8, %v1066_v42  ;;  %v1484_v52 = vadd.f32 %v1478_v51, %v1464_v41 }
 0x26b   : > { %v1495_v59 = vadd.f32 %v1492_v23, %v1484_v52 }
 0x26d   : > { %v1556_v12 = vpop.permute.xlu2 %1555 }
 0x26e   : > { %v1564_v7 = vadd.f32 %v1556_v12, %v1544_v4  ;;  %v1594_v4 = vmul.f32 %v3501_v17, %v3382_v5  ;;  %v1491_v12 = vmul.f32 %v3478_v8, %v3386_v47  ;;  %v1542_v8 = vmul.f32 %v3485_v24, %v3424_v9 }
 0x270   : > { %v1509_v43 = vpop.permute.xlu1 %1508  ;;  %v1405_v15 = vpop.permute.xlu0 %1404  ;;  %v3491_v28 = vld [vmem:[#allocation3 + $0x10] sm:$0xf]  ;;  %v3495_v19 = vld [vmem:[#allocation3 + $0x8] sm:$0xff] }
 0x271   : > { %v3493_v33 = vld [vmem:[#allocation3 + $0x11] sm:$0xf]  ;;  %v3497_v10 = vld [vmem:[#allocation3 + $0x9] sm:$0xff]  ;;  %v3509_v34 = vmul.f32 %v3503_v37, %v3491_v28  ;;  %v3517_v29 = vmul.f32 %v3503_v37, %v3495_v19  ;;  %v1515_v60 = vadd.f32 %v1509_v43, %v1495_v59  ;;  %v1412_v61 = vadd.f32 %v1405_v15, %v1392_v21 }
 0x272   : > { %v3499_v58 = vld [vmem:[#allocation3 + $0xa] sm:$0xff]  ;;  %v3513_v20 = vmul.f32 %v3505_v14, %v3493_v33  ;;  %v3521_v38 = vmul.f32 %v3505_v14, %v3497_v10  ;;  %v3539_v59 = vstv %s2248_s27  ;;  %s2270_s27 = smul.u32 24, %s3745_s4 }
 0x273   : > { %v3525_v25 = vmul.f32 %v3472_v11, %v3499_v58 }
 0x275   : > { %v1576_v50 = vpop.permute.xlu2 %1575 }
 0x276   : > { %v1584_v26 = vadd.f32 %v1576_v50, %v1564_v7 }
 0x278   : > { %v1529_v44 = vpop.permute.xlu1 %1528  ;;  %v1425_v54 = vpop.permute.xlu0 %1424  ;;  %v1595_v3 = vadd.f32 %v1592_v56, %v1584_v26  ;;  %v3541_v56 = vstv %s2249_s28 }
 0x279   : > { %v1535_v55 = vadd.f32 %v1529_v44, %v1515_v60  ;;  %v1432_v32 = vadd.f32 %v1425_v54, %v1412_v61 }
 0x27b   : > { %v1546_v62 = vadd.f32 %v1543_v16, %v1535_v55  ;;  %v1443_v45 = vadd.f32 %v1440_v22, %v1432_v32 }
 0x27d   : > { %v1607_v39 = vpop.permute.xlu2 %1606 }
 0x27e   : > { %v1615_v21 = vadd.f32 %v1607_v39, %v1595_v3  ;;  %v3550_v39 = vld [vmem:[#allocation3] sm:$0xff] }
 0x280   : > { %v1560_v31 = vpop.permute.xlu1 %1559  ;;  %v1456_v2 = vpop.permute.xlu0 %1455 }
 0x281   : > { %v1566_v48 = vadd.f32 %v1560_v31, %v1546_v62  ;;  %v1463_v63 = vadd.f32 %v1456_v2, %v1443_v45  ;;  %v1645_v45 = vmul.f32 %v3532_v35, %v3416_v57  ;;  %v3552_v31 = vstv %s2250_s10 }
 0x282   : > { %v1737_v24 = vmul.f32 %v3552_v31, %v3550_v39  ;;  %v1593_v57 = vmul.f32 %v3501_v17, %v3448_v0  ;;  %v1787_v0 = vstv %s2253_s12 }
 0x285   : > { %v1627_v49 = vpop.permute.xlu2 %1626 }
 0x286   : > { %v1635_v36 = vadd.f32 %v1627_v49, %v1615_v21 }
 0x288   : > { %v1580_v40 = vpop.permute.xlu1 %1579  ;;  %v1476_v51 = vpop.permute.xlu0 %1475  ;;  %v1646_v42 = vadd.f32 %v1643_v27, %v1635_v36 }
 0x289   : > { %v1586_v13 = vadd.f32 %v1580_v40, %v1566_v48  ;;  %v1483_v30 = vadd.f32 %v1476_v51, %v1463_v63  ;;  %v1756_v48 = vstv %s2251_s11 }
 0x28b   : > { %v1597_v41 = vadd.f32 %v1594_v4, %v1586_v13  ;;  %v1494_v43 = vadd.f32 %v1491_v12, %v1483_v30  ;;  %v3564_v12 = vld [vmem:[#allocation3 + $0x1] sm:$0xff] }
 0x28c   : > { %v1788_v17 = vmul.f32 %v1787_v0, %v3564_v12 }
 0x28d   : > { %v1658_v15 = vpop.permute.xlu2 %1657 }
 0x28e   : > { %v1666_v7 = vadd.f32 %v1658_v15, %v1646_v42  ;;  %v1757_v42 = vmul.f32 %v1756_v48, %v3550_v39  ;;  %v1739_v15 = vmul.f32 %v3552_v31, %v3491_v28 }
 0x290   : > { %v1611_v52 = vpop.permute.xlu1 %1610  ;;  %v1507_v23 = vpop.permute.xlu0 %1506 }
 0x291   : > { %v1514_v53 = vadd.f32 %v1507_v23, %v1494_v43  ;;  %v1617_v32 = vadd.f32 %v1611_v52, %v1597_v41  ;;  %v1644_v23 = vmul.f32 %v3532_v35, %v3463_v18 }
 0x295   : > { %v1678_v50 = vpop.permute.xlu2 %1677 }
 0x296   : > { %v1686_v26 = vadd.f32 %v1678_v50, %v1666_v7  ;;  %v1807_v7 = vstv %s2254_s13 }
 0x298   : > { %v1691_v5 = vmul.f32 %v3539_v59, %v1686_v26  ;;  %v1631_v60 = vpop.permute.xlu1 %1630  ;;  %v1527_v61 = vpop.permute.xlu0 %1526  ;;  %v1808_v26 = vmul.f32 %v1807_v7, %v3564_v12 }
 0x299   : > { %v1534_v47 = vadd.f32 %v1527_v61, %v1514_v53  ;;  %v1637_v62 = vadd.f32 %v1631_v60, %v1617_v32  ;;  %v3577_v60 = vld [vmem:[#allocation3 + $0x2] sm:$0xff]  ;;  %v1838_v61 = vstv %s2256_s14 }
 0x29a   : > { %v1696_v44 = vadd.f32 %v3541_v56, %v1691_v5  ;;  %v1759_v5 = vmul.f32 %v1756_v48, %v3491_v28  ;;  %v1839_v18 = vmul.f32 %v1838_v61, %v3577_v60 }
 0x29b   : > { %v1545_v54 = vadd.f32 %v1542_v8, %v1534_v47  ;;  %v1648_v9 = vadd.f32 %v1645_v45, %v1637_v62  ;;  %v1790_v8 = vmul.f32 %v1787_v0, %v3493_v33  ;;  %v1841_v62 = vmul.f32 %v1838_v61, %v3470_v46 }
 0x29c   : > { %vm1699_vm10 = vcmp.gt.f32.partialorder %v1696_v44, 0.0  ;;  %v1702_v3 = vmul.f32 0.01, %v1696_v44  ;;  %v1758_v45 = vmul.f32 %v1756_v48, %v3495_v19 }
 0x29e   : > { %v1705_v55 = vsel %vm1699_vm10, %v1696_v44, %v1702_v3 }
 0x29f   : > { %1711 = vrot.lane.b32.xlu2 %v1705_v55, %s2519_s16 }
 0x2a0   : > { %v1662_v16 = vpop.permute.xlu1 %1661  ;;  %v1558_v22 = vpop.permute.xlu0 %1557 }
 0x2a1   : > { %v1668_v2 = vadd.f32 %v1662_v16, %v1648_v9  ;;  %v1565_v21 = vadd.f32 %v1558_v22, %v1545_v54  ;;  %v1858_v54 = vstv %s2257_s15  ;;  %v1810_v16 = vmul.f32 %v1807_v7, %v3493_v33 }
 0x2a2   : > { %v1859_v55 = vmul.f32 %v1858_v54, %v3577_v60  ;;  %v1789_v33 = vmul.f32 %v1787_v0, %v3497_v10  ;;  %v1809_v9 = vmul.f32 %v1807_v7, %v3497_v10 }
 0x2a7   : > { %1743 = vrot.lane.b32.xlu2 %v1737_v24, %s2521_s18 }
 0x2a8   : > { %v1682_v49 = vpop.permute.xlu1 %1681  ;;  %v1578_v36 = vpop.permute.xlu0 %1577 }
 0x2a9   : > { %v1688_v1 = vadd.f32 %v1682_v49, %v1668_v2  ;;  %v1585_v27 = vadd.f32 %v1578_v36, %v1565_v21  ;;  %v1729_v49 = vmul.f32 %v3503_v37, %v3550_v39  ;;  %v3614_v36 = vstv %s2260_s5 }
 0x2ab   : > { %v1693_v63 = vmul.f32 %v3539_v59, %v1688_v1  ;;  %v1596_v40 = vadd.f32 %v1593_v57, %v1585_v27 }
 0x2ad   : > { %v1698_v51 = vadd.f32 %v3541_v56, %v1693_v63 }
 0x2af   : > { %1763 = vrot.lane.b32.xlu2 %v1757_v42, %s2522_s19  ;;  %vm1701_vm11 = vcmp.gt.f32.partialorder %v1698_v51, 0.0  ;;  %v1704_v13 = vmul.f32 0.01, %v1698_v51  ;;  %v3627_v42 = vstv %s2263_s20 }
 0x2b0   : > { %v1609_v30 = vpop.permute.xlu0 %1608 }
 0x2b1   : > { %v1707_v4 = vsel %vm1701_vm11, %v1698_v51, %v1704_v13  ;;  %v1616_v41 = vadd.f32 %v1609_v30, %v1596_v40  ;;  %v3622_v51 = vstv %s2262_s17 }
 0x2b2   : > { %1715 = vrot.lane.b32.xlu1 %v1707_v4, %s2519_s16 }
 0x2b7   : > { %1794 = vrot.lane.b32.xlu2 %v1788_v17, %s2521_s18 }
 0x2b8   : > { %v1629_v43 = vpop.permute.xlu0 %1628 }
 0x2b9   : > { %v1636_v52 = vadd.f32 %v1629_v43, %v1616_v41  ;;  %v3636_v41 = vstv %s2265_s21 }
 0x2ba   : > { %1747 = vrot.lane.b32.xlu1 %v1739_v15, %s2521_s18 }
 0x2bb   : > { %v1647_v50 = vadd.f32 %v1644_v23, %v1636_v52  ;;  %v3642_v23 = vstv %s2266_s22 }
 0x2bf   : > { %1814 = vrot.lane.b32.xlu2 %v1808_v26, %s2522_s19 }
 0x2c0   : > { %v1660_v53 = vpop.permute.xlu0 %1659 }
 0x2c1   : > { %v1667_v35 = vadd.f32 %v1660_v53, %v1647_v50 }
 0x2c2   : > { %1767 = vrot.lane.b32.xlu1 %v1759_v5, %s2522_s19 }
 0x2c7   : > { %1845 = vrot.lane.b32.xlu2 %v1839_v18, %s2521_s18 }
 0x2c8   : > { %v1680_v47 = vpop.permute.xlu0 %1679 }
 0x2c9   : > { %v1687_v44 = vadd.f32 %v1680_v47, %v1667_v35 }
 0x2ca   : > { %1798 = vrot.lane.b32.xlu1 %v1790_v8, %s2521_s18 }
 0x2cb   : > { %v1692_v28 = vmul.f32 %v3539_v59, %v1687_v44  ;;  %v1738_v59 = vmul.f32 %v3552_v31, %v3495_v19  ;;  %v1840_v31 = vmul.f32 %v1838_v61, %v3499_v58  ;;  %v1860_v19 = vmul.f32 %v1858_v54, %v3499_v58 }
 0x2cc   : > { %v1780_v58 = vmul.f32 %v3505_v14, %v3564_v12  ;;  %v1831_v12 = vmul.f32 %v3472_v11, %v3577_v60  ;;  %v3644_v11 = vstv %s2258_s23 }
 0x2cd   : > { %v1697_v3 = vadd.f32 %v3541_v56, %v1692_v28  ;;  %v1861_v56 = vmul.f32 %v1858_v54, %v3470_v46 }
 0x2cf   : > { %1865 = vrot.lane.b32.xlu2 %v1859_v55, %s2522_s19  ;;  %vm1700_vm12 = vcmp.gt.f32.partialorder %v1697_v3, 0.0  ;;  %v1703_v32 = vmul.f32 0.01, %v1697_v3 }
 0x2d1   : > { %v1706_v22 = vsel %vm1700_vm12, %v1697_v3, %v1703_v32 }
 0x2d2   : > { %1818 = vrot.lane.b32.xlu1 %v1810_v16, %s2522_s19  ;;  %1713 = vrot.lane.b32.xlu0 %v1706_v22, %s2519_s16  ;;  %s2259_s16 = sld [smem:[#allocation12 + $0x3]] }
 0x2d8   : > { %v3606_v46 = vstv %s2259_s16 }
 0x2da   : > { %1849 = vrot.lane.b32.xlu1 %v1841_v62, %s2521_s18  ;;  %1745 = vrot.lane.b32.xlu0 %v1738_v59, %s2521_s18 }
 0x2e2   : > { %1869 = vrot.lane.b32.xlu1 %v1861_v56, %s2522_s19  ;;  %1765 = vrot.lane.b32.xlu0 %v1758_v45, %s2522_s19 }
 0x2ea   : > { %1796 = vrot.lane.b32.xlu0 %v1789_v33, %s2521_s18 }
 0x2f2   : > { %1816 = vrot.lane.b32.xlu0 %v1809_v9, %s2522_s19 }
 0x2f9   : > { %v1712_v24 = vpop.permute.xlu2 %1711 }
 0x2fa   : > { %1721 = vst.msk [vmem:[#allocation3 + $0x1a] sm:$0xff] %vm1072_vm8, %v1712_v24  ;;  %1847 = vrot.lane.b32.xlu0 %v1840_v31, %s2521_s18 }
 0x301   : > { %v1744_v2 = vpop.permute.xlu2 %1743  ;;  %v1878_v21 = vld [vmem:[#allocation3 + $0x18] sm:$0xff] }
 0x302   : > { %1867 = vrot.lane.b32.xlu0 %v1860_v19, %s2522_s19  ;;  %v1890_v10 = vmul.f32 %v3606_v46, %v1878_v21  ;;  %v1752_v1 = vadd.f32 %v1744_v2, %v1729_v49  ;;  %v1910_v48 = vmul.f32 %v3614_v36, %v1878_v21  ;;  %v3620_v40 = vld [vmem:[#allocation3 + $0x19] sm:$0xff]  ;;  %v1882_v5 = vmul.f32 %v3644_v11, %v1878_v21 }
 0x303   : > { %v1941_v39 = vmul.f32 %v3622_v51, %v3620_v40  ;;  %v1961_v4 = vmul.f32 %v3627_v42, %v3620_v40  ;;  %v3634_v17 = vld [vmem:[#allocation3 + $0x1a] sm:$0xff] }
 0x304   : > { %1896 = vrot.lane.b32.xlu2 %v1890_v10, %s2521_s18  ;;  %v1992_v15 = vmul.f32 %v3636_v41, %v3634_v17  ;;  %v2012_v53 = vmul.f32 %v3642_v23, %v3634_v17 }
 0x309   : > { %v1764_v27 = vpop.permute.xlu2 %1763 }
 0x30a   : > { %v1772_v57 = vadd.f32 %v1764_v27, %v1752_v1 }
 0x30c   : > { %1916 = vrot.lane.b32.xlu2 %v1910_v48, %s2522_s19  ;;  %v1783_v63 = vadd.f32 %v1780_v58, %v1772_v57  ;;  %v3677_v48 = vstv %s2261_s8 }
 0x311   : > { %v1795_v37 = vpop.permute.xlu2 %1794 }
 0x312   : > { %v1803_v13 = vadd.f32 %v1795_v37, %v1783_v63 }
 0x314   : > { %1947 = vrot.lane.b32.xlu2 %v1941_v39, %s2521_s18 }
 0x319   : > { %v1815_v30 = vpop.permute.xlu2 %1814 }
 0x31a   : > { %v1823_v14 = vadd.f32 %v1815_v30, %v1803_v13 }
 0x31c   : > { %1967 = vrot.lane.b32.xlu2 %v1961_v4, %s2522_s19  ;;  %v1834_v0 = vadd.f32 %v1831_v12, %v1823_v14  ;;  %v1933_v14 = vmul.f32 %v3677_v48, %v3620_v40  ;;  %v1983_v40 = vstv %s2264_s24 }
 0x321   : > { %v1846_v43 = vpop.permute.xlu2 %1845 }
 0x322   : > { %v1854_v7 = vadd.f32 %v1846_v43, %v1834_v0 }
 0x324   : > { %1998 = vrot.lane.b32.xlu2 %v1992_v15, %s2521_s18  ;;  %v1716_v52 = vpop.permute.xlu1 %1715 }
 0x325   : > { %1723 = vst.msk [vmem:[#allocation3 + $0x2a] sm:$0x3] %vm1075_vm9, %v1716_v52 }
 0x329   : > { %v1866_v50 = vpop.permute.xlu2 %1865 }
 0x32a   : > { %v1874_v26 = vadd.f32 %v1866_v50, %v1854_v7 }
 0x32c   : > { %2018 = vrot.lane.b32.xlu2 %v2012_v53, %s2522_s19  ;;  %v1748_v60 = vpop.permute.xlu1 %1747  ;;  %v1885_v61 = vadd.f32 %v1882_v5, %v1874_v26  ;;  %v1982_v12 = vld [vmem:[#allocation3 + $0x2a] sm:$0xf] }
 0x32d   : > { %v1754_v18 = vadd.f32 %v1748_v60, %v3509_v34  ;;  %v1994_v15 = vmul.f32 %v3636_v41, %v1982_v12 }
 0x334   : > { %v1768_v35 = vpop.permute.xlu1 %1767 }
 0x335   : > { %v1774_v47 = vadd.f32 %v1768_v35, %v1754_v18  ;;  %v1984_v18 = vmul.f32 %v1983_v40, %v3634_v17 }
 0x337   : > { %v1785_v8 = vadd.f32 %v3513_v20, %v1774_v47 }
 0x33c   : > { %v1799_v44 = vpop.permute.xlu1 %1798 }
 0x33d   : > { %v1805_v54 = vadd.f32 %v1799_v44, %v1785_v8 }
 0x344   : > { %v1819_v28 = vpop.permute.xlu1 %1818  ;;  %v1714_v3 = vpop.permute.xlu0 %1713 }
 0x345   : > { %v1825_v55 = vadd.f32 %v1819_v28, %v1805_v54  ;;  %1722 = vst.msk [vmem:[#allocation3 + $0x22] sm:$0xff] %vm1072_vm8, %v1714_v3 }
 0x347   : > { %v1836_v32 = vadd.f32 %v3476_v6, %v1825_v55 }
 0x34c   : > { %v1850_v16 = vpop.permute.xlu1 %1849  ;;  %v1746_v22 = vpop.permute.xlu0 %1745  ;;  %v1880_v62 = vld [vmem:[#allocation3 + $0x28] sm:$0xf]  ;;  %v1879_v59 = vld [vmem:[#allocation3 + $0x20] sm:$0xff] }
 0x34d   : > { %v1892_v56 = vmul.f32 %v3606_v46, %v1880_v62  ;;  %v1891_v34 = vmul.f32 %v3606_v46, %v1879_v59  ;;  %v1856_v20 = vadd.f32 %v1850_v16, %v1836_v32  ;;  %v1753_v45 = vadd.f32 %v1746_v22, %v3517_v29  ;;  %v3667_v10 = vld [vmem:[#allocation3 + $0x29] sm:$0xf]  ;;  %v3669_v29 = vld [vmem:[#allocation3 + $0x21] sm:$0xff] }
 0x34e   : > { %v1912_v31 = vmul.f32 %v3614_v36, %v1880_v62  ;;  %v1911_v19 = vmul.f32 %v3614_v36, %v1879_v59  ;;  %v1884_v2 = vmul.f32 %v3644_v11, %v1880_v62  ;;  %v1943_v1 = vmul.f32 %v3622_v51, %v3667_v10  ;;  %v1981_v0 = vld [vmem:[#allocation3 + $0x22] sm:$0xff] }
 0x34f   : > { %1900 = vrot.lane.b32.xlu1 %v1892_v56, %s2521_s18  ;;  %1898 = vrot.lane.b32.xlu0 %v1891_v34, %s2521_s18  ;;  %v1942_v36 = vmul.f32 %v3622_v51, %v3669_v29  ;;  %v1963_v37 = vmul.f32 %v3627_v42, %v3667_v10  ;;  %v1962_v39 = vmul.f32 %v3627_v42, %v3669_v29 }
 0x350   : > { %v1993_v42 = vmul.f32 %v3636_v41, %v1981_v0  ;;  %v2013_v5 = vmul.f32 %v3642_v23, %v1981_v0  ;;  %v1883_v60 = vmul.f32 %v3644_v11, %v1879_v59  ;;  %v2036_v11 = vstv %s2035_s25 }
 0x354   : > { %v1870_v33 = vpop.permute.xlu1 %1869  ;;  %v1766_v9 = vpop.permute.xlu0 %1765 }
 0x355   : > { %v1876_v6 = vadd.f32 %v1870_v33, %v1856_v20  ;;  %v1773_v24 = vadd.f32 %v1766_v9, %v1753_v45  ;;  %v1935_v33 = vmul.f32 %v3677_v48, %v3667_v10  ;;  %v1934_v9 = vmul.f32 %v3677_v48, %v3669_v29 }
 0x357   : > { %1920 = vrot.lane.b32.xlu1 %v1912_v31, %s2522_s19  ;;  %1918 = vrot.lane.b32.xlu0 %v1911_v19, %s2522_s19  ;;  %v1784_v46 = vadd.f32 %v3521_v38, %v1773_v24  ;;  %v3665_v21 = vadd.f32 %v1884_v2, %v1876_v6 }
 0x35c   : > { %v1797_v49 = vpop.permute.xlu0 %1796 }
 0x35d   : > { %v1804_v38 = vadd.f32 %v1797_v49, %v1784_v46 }
 0x35e   : > { %v1897_v27 = vpop.permute.xlu2 %1896 }
 0x35f   : > { %1951 = vrot.lane.b32.xlu1 %v1943_v1, %s2521_s18  ;;  %1949 = vrot.lane.b32.xlu0 %v1942_v36, %s2521_s18  ;;  %v1905_v58 = vadd.f32 %v1897_v27, %v1885_v61  ;;  %v1986_v27 = vmul.f32 %v1983_v40, %v1982_v12 }
 0x364   : > { %v1817_v57 = vpop.permute.xlu0 %1816 }
 0x365   : > { %v1824_v63 = vadd.f32 %v1817_v57, %v1804_v38  ;;  %v1985_v38 = vmul.f32 %v1983_v40, %v1981_v0 }
 0x366   : > { %v1917_v13 = vpop.permute.xlu2 %1916 }
 0x367   : > { %v1925_v30 = vadd.f32 %v1917_v13, %v1905_v58  ;;  %1971 = vrot.lane.b32.xlu1 %v1963_v37, %s2522_s19  ;;  %1969 = vrot.lane.b32.xlu0 %v1962_v39, %s2522_s19  ;;  %v1835_v51 = vadd.f32 %v3525_v25, %v1824_v63  ;;  %v2014_v25 = vmul.f32 %v3642_v23, %v1982_v12 }
 0x369   : > { %v1936_v4 = vadd.f32 %v1933_v14, %v1925_v30 }
 0x36c   : > { %v1848_v43 = vpop.permute.xlu0 %1847 }
 0x36d   : > { %v1855_v7 = vadd.f32 %v1848_v43, %v1835_v51 }
 0x36e   : > { %v1948_v52 = vpop.permute.xlu2 %1947 }
 0x36f   : > { %2002 = vrot.lane.b32.xlu1 %v1994_v15, %s2521_s18  ;;  %2000 = vrot.lane.b32.xlu0 %v1993_v42, %s2521_s18  ;;  %v1956_v26 = vadd.f32 %v1948_v52, %v1936_v4  ;;  %s2030_s18 = sld [smem:[#allocation4]] }
 0x374   : > { %v1868_v50 = vpop.permute.xlu0 %1867 }
 0x375   : > { %v1875_v53 = vadd.f32 %v1868_v50, %v1855_v7  ;;  %v2031_v54 = vstv %s2030_s18 }
 0x376   : > { %v1968_v61 = vpop.permute.xlu2 %1967 }
 0x377   : > { %v1976_v41 = vadd.f32 %v1968_v61, %v1956_v26  ;;  %2022 = vrot.lane.b32.xlu1 %v2014_v25, %s2522_s19  ;;  %2020 = vrot.lane.b32.xlu0 %v2013_v5, %s2522_s19  ;;  %v1886_v35 = vadd.f32 %v1883_v60, %v1875_v53  ;;  %s3703_s19 = scalar_lea.vmem %s3736_s7, %s2270_s27 }
 0x379   : > { %v1987_v47 = vadd.f32 %v1984_v18, %v1976_v41 }
 0x37e   : > { %v1999_v8 = vpop.permute.xlu2 %1998 }
 0x37f   : > { %v2007_v44 = vadd.f32 %v1999_v8, %v1987_v47 }
 0x386   : > { %v2019_v23 = vpop.permute.xlu2 %2018 }
 0x387   : > { %v2027_v28 = vadd.f32 %v2019_v23, %v2007_v44 }
 0x389   : > { %v2032_v3 = vmul.f32 %v2031_v54, %v2027_v28 }
 0x38b   : > { %v2037_v55 = vadd.f32 %v2036_v11, %v2032_v3 }
 0x38d   : > { %vm2040_vm13 = vcmp.gt.f32.partialorder %v2037_v55, 0.0  ;;  %v2043_v17 = vmul.f32 0.01, %v2037_v55 }
 0x38f   : > { %v2046_v32 = vsel %vm2040_vm13, %v2037_v55, %v2043_v17 }
 0x390   : > { %2049 = vst.msk [vmem:[%s3703_s19] sm:$0xff] %vm355_vm1, %v2046_v32 }
 0x3c1   : > { %v1901_v16 = vpop.permute.xlu1 %1900  ;;  %v1899_v22 = vpop.permute.xlu0 %1898 }
 0x3c2   : > { %v1907_v62 = vadd.f32 %v1901_v16, %v3665_v21  ;;  %v1906_v59 = vadd.f32 %v1899_v22, %v1886_v35 }
 0x3c9   : > { %v1921_v56 = vpop.permute.xlu1 %1920  ;;  %v1919_v34 = vpop.permute.xlu0 %1918 }
 0x3ca   : > { %v1927_v20 = vadd.f32 %v1921_v56, %v1907_v62  ;;  %v1926_v45 = vadd.f32 %v1919_v34, %v1906_v59 }
 0x3cc   : > { %v1938_v31 = vadd.f32 %v1935_v33, %v1927_v20  ;;  %v1937_v6 = vadd.f32 %v1934_v9, %v1926_v45 }
 0x3d1   : > { %v1952_v24 = vpop.permute.xlu1 %1951  ;;  %v1950_v19 = vpop.permute.xlu0 %1949 }
 0x3d2   : > { %v1958_v2 = vadd.f32 %v1952_v24, %v1938_v31  ;;  %v1957_v46 = vadd.f32 %v1950_v19, %v1937_v6 }
 0x3d9   : > { %v1972_v49 = vpop.permute.xlu1 %1971  ;;  %v1970_v1 = vpop.permute.xlu0 %1969 }
 0x3da   : > { %v1978_v21 = vadd.f32 %v1972_v49, %v1958_v2  ;;  %v1977_v36 = vadd.f32 %v1970_v1, %v1957_v46 }
 0x3dc   : > { %v1989_v57 = vadd.f32 %v1986_v27, %v1978_v21  ;;  %v1988_v58 = vadd.f32 %v1985_v38, %v1977_v36 }
 0x3e1   : > { %v2003_v63 = vpop.permute.xlu1 %2002  ;;  %v2001_v37 = vpop.permute.xlu0 %2000 }
 0x3e2   : > { %v2009_v10 = vadd.f32 %v2003_v63, %v1989_v57  ;;  %v2008_v39 = vadd.f32 %v2001_v37, %v1988_v58 }
 0x3e9   : > { %v2023_v29 = vpop.permute.xlu1 %2022  ;;  %v2021_v48 = vpop.permute.xlu0 %2020 }
 0x3ea   : > { %v2029_v13 = vadd.f32 %v2023_v29, %v2009_v10  ;;  %v2028_v30 = vadd.f32 %v2021_v48, %v2008_v39 }
 0x3ec   : > { %v2034_v51 = vmul.f32 %v2031_v54, %v2029_v13  ;;  %v2033_v14 = vmul.f32 %v2031_v54, %v2028_v30 }
 0x3ee   : > { %v2039_v4 = vadd.f32 %v2036_v11, %v2034_v51  ;;  %v2038_v43 = vadd.f32 %v2036_v11, %v2033_v14 }
 0x3f0   : > { %vm2042_vm14 = vcmp.gt.f32.partialorder %v2039_v4, 0.0  ;;  %v2045_v15 = vmul.f32 0.01, %v2039_v4  ;;  %vm2041_vm15 = vcmp.gt.f32.partialorder %v2038_v43, 0.0  ;;  %v2044_v12 = vmul.f32 0.01, %v2038_v43 }
 0x3f2   : > { %v2048_v0 = vsel %vm2042_vm14, %v2039_v4, %v2045_v15  ;;  %v2047_v42 = vsel %vm2041_vm15, %v2038_v43, %v2044_v12 }
 0x3f3   : > { %2051 = vst.msk [vmem:[%s3703_s19 + $0x10] sm:$0xf] %vm358_vm0, %v2048_v0 }
 0x3f4   : > { %2050 = vst.msk [vmem:[%s3703_s19 + $0x8] sm:$0xff] %vm355_vm1, %v2047_v42 }
 0x3f5 PF: > { %p22_p4 = scmp.ge.s32.totalorder %s2621_s26, 4   ;;  %s3740_s28 = smov %s2503_s29 }
 0x3f6   : > { %s3741_s29 = smov %s2507_s30  ;;  %s3742_s30 = smov %s2630_s9 }
 0x3f7   : > { %s3743_s8 = smov %s2621_s26  ;;  %24 = sbr.rel (!%p22_p4) target bundleno = 9 (0x9), region = 109 }
 0x3fc   :  { %2073 = vsyncpa [#allocation7], 1 }
 0x3fd   :  { %2075 = vsyncpa [#allocation7 + $0x1], 1 }
 0x3fe   :  { %2076 = vsyncpa [#allocation8], 1 }
 0x3ff   :  { %2078 = vsyncpa [#allocation8 + $0x1], 1 }
 0x400   :  { %2079 = vsyncpa [#allocation10], 1 }
 0x401   :  { %2080 = vsyncpa [#allocation13], 1 }

</bundles_post_ra>
